<compile_context>
chip_gen: v7x
topology: tpu7x:2x2x1
jax: 0.10.0
libtpu: 0.0.40
codegen_flags: <defaults>
</compile_context>

<pallas_src>
import functools
import math
import numpy as np

import jax
import jax.numpy as jnp
from jax.experimental import pallas as pl
from jax.experimental.pallas import tpu as pltpu


def decoder_layer_kernel(
    # inputs
    x_full_ref, x_tile_ref, mask_ref, ln_w_ref, csm_ref,
    wqkv_ref, wo_ref, wgu_ref, wd_ref,
    s_qkv_ref, b_qkv_ref, s_gu_ref, b_gu_ref, b_o_ref, b_d_ref,
    cos_ref, sin_ref, scales_ref,
    # outputs
    out_ref,
    # scratch
    q_scr, k_scr, v_scr,
    *, num_heads, head_dim, hidden, inter, q_tile, rms_eps):
    t = pl.program_id(1)
    H = hidden
    half = head_dim // 2

    def rmsnorm(v, w):
        var = jnp.mean(v * v, axis=-1, keepdims=True)
        return v * jax.lax.rsqrt(var + rms_eps) * w

    def quant(v):
        # emulates .round().clamp(-128, 127).to(torch.int8); int8 values are exact in bf16,
        # so bf16 x bf16 -> fp32-acc MXU matmuls reproduce the int8 GEMMs exactly.
        return jnp.clip(jnp.round(v), -128.0, 127.0).astype(jnp.bfloat16)

    def rot_half(v):
        # rotate-half sign is folded into the sin table, so this is a pure half-roll.
        if head_dim % 128 == 0:
            return pltpu.roll(v, shift=half, axis=-1)          # native lane rotate (XLU)
        return jnp.concatenate([v[..., half:], v[..., :half]], axis=-1)

    # ---- once per batch element: input LN + CSM + fused QKV GEMM + RoPE, head-major stash ----
    @pl.when(t == 0)
    def _():
        x_full = x_full_ref[0]                                              # (S, H) fp32
        h = rmsnorm(x_full, ln_w_ref[0])                                    # input_layernorm
        h = jnp.dot(h, csm_ref[...], preferred_element_type=jnp.float32)    # input_layernorm_csm
        h8 = quant(h)
        qkv = jnp.dot(h8, wqkv_ref[...], preferred_element_type=jnp.float32)
        qkv = qkv * s_qkv_ref[...] + b_qkv_ref[...]                         # (S, 3H) fp32
        # lane -> head-major layout shuffle only (once per batch element); all matmuls /
        # softmax below operate batched over heads.
        for hh in range(num_heads):
            lo = hh * head_dim
            q_scr[hh] = qkv[:, lo:lo + head_dim]
            k_scr[hh] = qkv[:, H + lo:H + lo + head_dim]
            v_scr[hh] = qkv[:, 2 * H + lo:2 * H + lo + head_dim]
        cos = cos_ref[...][None]                                            # (1, S, hd)
        sin = sin_ref[...][None]                                            # sign-folded sin
        q_scr[...] = q_scr[...] * cos + rot_half(q_scr[...]) * sin
        k_scr[...] = k_scr[...] * cos + rot_half(k_scr[...]) * sin

    # ---- per query tile: attention + o_proj + residual + MLP ----
    row0 = pl.multiple_of(t * q_tile, q_tile)
    q_t = q_scr[:, pl.ds(row0, q_tile), :]                                  # (nh, tq, hd)
    k_all = k_scr[...]
    v_all = v_scr[...]

    # 1/sqrt(head_dim) already folded into the q scale/bias.
    s = jnp.einsum('hqd,hkd->hqk', q_t, k_all, preferred_element_type=jnp.float32)
    s = s + mask_ref[0][None]                                               # (nh, tq, S)
    m = jnp.max(s, axis=-1, keepdims=True)
    p = jnp.exp(s - m)
    p = p * pl.reciprocal(jnp.sum(p, axis=-1, keepdims=True), approx=True)
    o_h = jnp.einsum('hqk,hkd->hqd', p, v_all, preferred_element_type=jnp.float32)
    attn = jnp.concatenate([o_h[hh] for hh in range(num_heads)], axis=-1)   # (tq, H)

    # TODO(synk): Int8LlamaAttention source was not provided; quantization of the attention
    # output before o_proj (W8A8BFP32OFP32) is reconstructed torch_int-style.
    attn8 = quant(attn)
    o = (jnp.dot(attn8, wo_ref[...], preferred_element_type=jnp.float32) * scales_ref[0]
         + b_o_ref[...])
    h1 = x_tile_ref[0] + o                                                  # residual add

    h2 = rmsnorm(h1, ln_w_ref[1])                                           # post_attention_layernorm
    h2 = jnp.dot(h2, csm_ref[...], preferred_element_type=jnp.float32)      # post_attention_layernorm_csm
    h2q = quant(h2)
    gu = jnp.dot(h2q, wgu_ref[...], preferred_element_type=jnp.float32)
    gu = gu * s_gu_ref[...] + b_gu_ref[...]                                 # (tq, 2I)
    g = gu[:, :inter]
    u = gu[:, inter:]
    mlp8 = quant(g * jax.nn.sigmoid(g) * u)                                 # SiLU(gate)*up, quantized
    d = (jnp.dot(mlp8, wd_ref[...], preferred_element_type=jnp.float32) * scales_ref[1]
         + b_d_ref[...])
    out_ref[0] = h1 + d


def int8_llama_decoder_layer(x, attn_mask, params, *, num_heads, head_dim,
                             q_tile=None, rms_eps=1e-6):
    B, S, H = x.shape
    I = params["w_gu"].shape[1] // 2
    assert H == num_heads * head_dim
    if q_tile is None:
        q_tile = min(S, 256)
    assert S % q_tile == 0 and q_tile % 8 == 0
    T = S // q_tile
    Bm = attn_mask.shape[0]
    assert Bm in (1, B) and attn_mask.shape[1:] == (S, S)

    kernel = functools.partial(
        decoder_layer_kernel, num_heads=num_heads, head_dim=head_dim,
        hidden=H, inter=I, q_tile=q_tile, rms_eps=rms_eps)

    const = lambda b, t: (0, 0)
    mask_map = (lambda b, t: (b, t, 0)) if Bm == B else (lambda b, t: (0, t, 0))

    in_specs = [
        pl.BlockSpec((1, S, H), lambda b, t: (b, 0, 0)),       # x, full seq (resident across t)
        pl.BlockSpec((1, q_tile, H), lambda b, t: (b, t, 0)),  # x, residual row tile
        pl.BlockSpec((1, q_tile, S), mask_map),                # additive attention mask
        pl.BlockSpec((2, H), const),                           # [input_ln_w, post_attn_ln_w]
        pl.BlockSpec((H, H), const),                           # CSM split+merge matrix (fp32)
        pl.BlockSpec((H, 3 * H), const),                       # fused Wq|Wk|Wv   (bf16, in x out)
        pl.BlockSpec((H, H), const),                           # Wo               (bf16)
        pl.BlockSpec((H, 2 * I), const),                       # fused Wgate|Wup  (bf16)
        pl.BlockSpec((I, H), const),                           # Wdown            (bf16)
        pl.BlockSpec((1, 3 * H), const),                       # qkv alpha row (1/sqrt(d) folded into q)
        pl.BlockSpec((1, 3 * H), const),                       # qkv bias row
        pl.BlockSpec((1, 2 * I), const),                       # gate/up alpha row
        pl.BlockSpec((1, 2 * I), const),                       # gate/up bias row
        pl.BlockSpec((1, H), const),                           # o_proj bias
        pl.BlockSpec((1, H), const),                           # down_proj bias
        pl.BlockSpec((S, head_dim), const),                    # rope cos
        pl.BlockSpec((S, head_dim), const),                    # rope sin (rotate-half sign folded)
        pl.BlockSpec(memory_space=pltpu.MemorySpace.SMEM),     # [alpha_o, alpha_down]
    ]
    out_specs = pl.BlockSpec((1, q_tile, H), lambda b, t: (b, t, 0))

    flops = int(B * S * (4 * H * H          # two CSM matmuls
                         + 6 * H * H        # fused qkv
                         + 2 * H * H        # o_proj
                         + 4 * H * I        # fused gate/up
                         + 2 * I * H        # down_proj
                         + 4 * S * H))      # attention BMMs
    cost = pl.CostEstimate(
        flops=flops,
        transcendentals=int(B * S * (num_heads * S + I + 2)),
        bytes_accessed=int(2 * (3 * H * H + H * H + 2 * H * I + I * H)  # bf16 weights
                           + 4 * H * H                                  # csm fp32
                           + B * S * H * 4 * 2 + Bm * S * S * 4))

    return pl.pallas_call(
        kernel,
        out_shape=jax.ShapeDtypeStruct((B, S, H), jnp.float32),
        grid=(B, T),
        in_specs=in_specs,
        out_specs=out_specs,
        scratch_shapes=[
            pltpu.VMEM((num_heads, S, head_dim), jnp.float32),   # Q (RoPE'd, pre-scaled)
            pltpu.VMEM((num_heads, S, head_dim), jnp.float32),   # K (RoPE'd)
            pltpu.VMEM((num_heads, S, head_dim), jnp.float32),   # V
        ],
        compiler_params=pltpu.CompilerParams(
            dimension_semantics=("parallel", "arbitrary"),
            vmem_limit_bytes=64 * 1024 * 1024),
        cost_estimate=cost,
    )(x, x, attn_mask, params["ln_w"], params["csm"],
      params["w_qkv"], params["w_o"], params["w_gu"], params["w_down"],
      params["s_qkv"], params["b_qkv"], params["s_gu"], params["b_gu"],
      params["b_o"], params["b_down"], params["cos"], params["sin_rot"],
      params["scales_od"])


if __name__ == "__main__":
    # small config consistent with LlamaConfig-style fields
    B, S, H, I = 2, 16, 128, 256
    num_heads, head_dim = 4, 32
    channel_ratio = 1.0 / 16.0
    nc = int(channel_ratio * H)          # num_channels = 8
    rms_eps = 1e-6
    q_tile = 8                           # S // q_tile = 2 query tiles per batch element

    key = jax.random.PRNGKey(0)
    ks = jax.random.split(key, 12)

    def randi(k, shape):
        # small int8 weight values so split/merge column sums stay within int8 range
        return np.asarray(jax.random.randint(k, shape, -4, 5, dtype=jnp.int32))

    # base (out_features, in_features) int8 weights, PyTorch convention
    wq0 = randi(ks[0], (H, H)); wk0 = randi(ks[1], (H, H)); wv0 = randi(ks[2], (H, H))
    wo0 = randi(ks[3], (H, H))
    wg0 = randi(ks[4], (I, H)); wu0 = randi(ks[5], (I, H))
    wd0 = randi(ks[6], (H, I))

    # ---- CSM buffers exactly as built in Int8LlamaDecoderLayer.__init__ ----
    exp = H + nc - 1
    index = np.concatenate([np.zeros(nc, np.int64), np.arange(1, H)])   # num_split_to_index
    scaling = np.ones(exp, np.float32); scaling[0] = 1.0 / nc
    src = 2 * np.arange(nc - 1)          # even expanded positions (src_idx in merge_fc)
    dst = src + 1                        # odd expanded positions  (dst_idx in merge_fc)
    keep = np.setdiff1d(np.arange(exp), src)

    # split_fc + merge_fc applied to downstream weights (q/k/v, gate/up)
    def split_merge_weight(w):
        ws = w[:, index].copy()          # repeat_interleave along in-channels
        ws[:, dst] += ws[:, src]         # scatter_reduce 'sum'
        wf = ws[:, keep]                 # drop merged source columns
        return np.clip(wf, -128, 127)    # int8 storage

    wq = split_merge_weight(wq0); wk = split_merge_weight(wk0); wv = split_merge_weight(wv0)
    wg = split_merge_weight(wg0); wu = split_merge_weight(wu0)
    wo = np.clip(wo0, -128, 127); wd = np.clip(wd0, -128, 127)

    # TODO(synk): CSMModule.forward source not provided; reconstructed as QLLM-style channel
    # disassembly (gather by `index` * scaling_factors) + assembly (merged pair -> mean),
    # expressed as a single (H, H) linear map applied in-kernel.
    S_mat = np.zeros((H, exp), np.float32)
    S_mat[index, np.arange(exp)] = scaling
    M_mat = np.zeros((exp, H), np.float32)
    dst_set = set(dst.tolist())
    for j, p in enumerate(keep):
        if p in dst_set:
            M_mat[p, j] = 0.5
            M_mat[p - 1, j] = 0.5
        else:
            M_mat[p, j] = 1.0
    csm_mat = jnp.asarray(S_mat @ M_mat, jnp.float32)

    # int8-valued weights in bf16, pre-transposed to (in, out); q/k/v and gate/up fused.
    def to_in_out(w):
        return np.asarray(w, np.float32).T
    w_qkv = jnp.asarray(np.concatenate([to_in_out(wq), to_in_out(wk), to_in_out(wv)], 1),
                        jnp.bfloat16)
    w_o = jnp.asarray(to_in_out(wo), jnp.bfloat16)
    w_gu = jnp.asarray(np.concatenate([to_in_out(wg), to_in_out(wu)], 1), jnp.bfloat16)
    w_down = jnp.asarray(to_in_out(wd), jnp.bfloat16)

    # RoPE tables (HF Llama convention); rotate-half sign folded into the sin table.
    inv_freq = 1.0 / (10000.0 ** (np.arange(0, head_dim, 2) / head_dim))
    freqs = np.outer(np.arange(S), inv_freq)
    cos = jnp.asarray(np.concatenate([np.cos(freqs), np.cos(freqs)], -1), jnp.float32)
    sin_rot = jnp.asarray(np.concatenate([-np.sin(freqs), np.sin(freqs)], -1), jnp.float32)

    # causal additive attention mask shared across the batch, (1, S, S)
    attn_mask = jnp.asarray(np.triu(np.full((S, S), -1e9, np.float32), k=1)[None])

    # W8A8BFP32OFP32Linear alpha scales and fp32 biases
    a_q = a_k = a_v = 0.02; a_o = 0.03; a_g = a_u = 0.015; a_d = 0.01
    inv_sqrt_d = 1.0 / math.sqrt(head_dim)
    b_q = 0.01 * np.asarray(jax.random.normal(ks[7], (3, H)))     # q, k, v biases
    b_o = 0.01 * np.asarray(jax.random.normal(ks[8], (1, H)))
    b_gu = 0.01 * np.asarray(jax.random.normal(ks[9], (2, I)))
    b_d = 0.01 * np.asarray(jax.random.normal(ks[11], (1, H)))

    s_qkv = np.concatenate([np.full(H, a_q * inv_sqrt_d), np.full(H, a_k), np.full(H, a_v)])
    bias_qkv = np.concatenate([b_q[0] * inv_sqrt_d, b_q[1], b_q[2]])
    s_gu = np.concatenate([np.full(I, a_g), np.full(I, a_u)])
    bias_gu = np.concatenate([b_gu[0], b_gu[1]])

    params = {
        "ln_w": jnp.ones((2, H), jnp.float32),
        "csm": csm_mat,
        "w_qkv": w_qkv, "w_o": w_o, "w_gu": w_gu, "w_down": w_down,
        "s_qkv": jnp.asarray(s_qkv, jnp.float32).reshape(1, 3 * H),
        "b_qkv": jnp.asarray(bias_qkv, jnp.float32).reshape(1, 3 * H),
        "s_gu": jnp.asarray(s_gu, jnp.float32).reshape(1, 2 * I),
        "b_gu": jnp.asarray(bias_gu, jnp.float32).reshape(1, 2 * I),
        "b_o": jnp.asarray(b_o, jnp.float32).reshape(1, H),
        "b_down": jnp.asarray(b_d, jnp.float32).reshape(1, H),
        "scales_od": jnp.asarray([a_o, a_d], jnp.float32),        # alpha for o_proj, down_proj
        "cos": cos, "sin_rot": sin_rot,
    }

    x = jax.random.normal(ks[10], (B, S, H), jnp.float32)

    out = int8_llama_decoder_layer(x, attn_mask, params, num_heads=num_heads,
                                   head_dim=head_dim, q_tile=q_tile, rms_eps=rms_eps)
    out = jax.block_until_ready(out)
    assert out.shape == (B, S, H) and bool(jnp.all(jnp.isfinite(out)))
    print("KERNEL_OK")
</pallas_src>

<mosaic_0001>
module attributes {stable_mosaic.version = 11 : i64} {
  func.func @decoder_layer_kernel(%arg0: i32, %arg1: i32, %arg2: memref<1x16x128xf32, #tpu.memory_space<vmem>>, %arg3: memref<1x8x128xf32, #tpu.memory_space<vmem>>, %arg4: memref<1x8x16xf32, #tpu.memory_space<vmem>>, %arg5: memref<2x128xf32, #tpu.memory_space<vmem>>, %arg6: memref<128x128xf32, #tpu.memory_space<vmem>>, %arg7: memref<128x384xbf16, #tpu.memory_space<vmem>>, %arg8: memref<128x128xbf16, #tpu.memory_space<vmem>>, %arg9: memref<128x512xbf16, #tpu.memory_space<vmem>>, %arg10: memref<256x128xbf16, #tpu.memory_space<vmem>>, %arg11: memref<1x384xf32, #tpu.memory_space<vmem>>, %arg12: memref<1x384xf32, #tpu.memory_space<vmem>>, %arg13: memref<1x512xf32, #tpu.memory_space<vmem>>, %arg14: memref<1x512xf32, #tpu.memory_space<vmem>>, %arg15: memref<1x128xf32, #tpu.memory_space<vmem>>, %arg16: memref<1x128xf32, #tpu.memory_space<vmem>>, %arg17: memref<16x32xf32, #tpu.memory_space<vmem>>, %arg18: memref<16x32xf32, #tpu.memory_space<vmem>>, %arg19: memref<2xf32, #tpu.memory_space<smem>>, %arg20: memref<1x8x128xf32, #tpu.memory_space<vmem>>, %arg21: memref<4x16x32xf32, #tpu.memory_space<vmem>>, %arg22: memref<4x16x32xf32, #tpu.memory_space<vmem>>, %arg23: memref<4x16x32xf32, #tpu.memory_space<vmem>>) attributes {dimension_semantics = [#tpu.dimension_semantics<parallel>, #tpu.dimension_semantics<arbitrary>], iteration_bounds = array<i64: 2, 2>, scalar_prefetch = 0 : i64, scratch_operands = 3 : i64, tpu.core_type = #tpu.core_type<tc>, window_params = [{transform_indices = @transform_0, window_bounds = array<i64: 1, 16, 128>}, {transform_indices = @transform_1, window_bounds = array<i64: 1, 8, 128>}, {transform_indices = @transform_2, window_bounds = array<i64: 1, 8, 16>}, {pipeline_mode = #tpu.pipeline_mode<synchronous>, transform_indices = @transform_3, window_bounds = array<i64: 2, 128>}, {pipeline_mode = #tpu.pipeline_mode<synchronous>, transform_indices = @transform_4, window_bounds = array<i64: 128, 128>}, {pipeline_mode = #tpu.pipeline_mode<synchronous>, transform_indices = @transform_5, window_bounds = array<i64: 128, 384>}, {pipeline_mode = #tpu.pipeline_mode<synchronous>, transform_indices = @transform_6, window_bounds = array<i64: 128, 128>}, {pipeline_mode = #tpu.pipeline_mode<synchronous>, transform_indices = @transform_7, window_bounds = array<i64: 128, 512>}, {pipeline_mode = #tpu.pipeline_mode<synchronous>, transform_indices = @transform_8, window_bounds = array<i64: 256, 128>}, {pipeline_mode = #tpu.pipeline_mode<synchronous>, transform_indices = @transform_9, window_bounds = array<i64: 1, 384>}, {pipeline_mode = #tpu.pipeline_mode<synchronous>, transform_indices = @transform_10, window_bounds = array<i64: 1, 384>}, {pipeline_mode = #tpu.pipeline_mode<synchronous>, transform_indices = @transform_11, window_bounds = array<i64: 1, 512>}, {pipeline_mode = #tpu.pipeline_mode<synchronous>, transform_indices = @transform_12, window_bounds = array<i64: 1, 512>}, {pipeline_mode = #tpu.pipeline_mode<synchronous>, transform_indices = @transform_13, window_bounds = array<i64: 1, 128>}, {pipeline_mode = #tpu.pipeline_mode<synchronous>, transform_indices = @transform_14, window_bounds = array<i64: 1, 128>}, {pipeline_mode = #tpu.pipeline_mode<synchronous>, transform_indices = @transform_15, window_bounds = array<i64: 16, 32>}, {pipeline_mode = #tpu.pipeline_mode<synchronous>, transform_indices = @transform_16, window_bounds = array<i64: 16, 32>}, {transform_indices = @transform_17, window_bounds = array<i64: 2>}, {transform_indices = @transform_18, window_bounds = array<i64: 1, 8, 128>}]} {
    %c0_i32 = arith.constant 0 : i32
    %0 = arith.cmpi eq, %arg1, %c0_i32 : i32
    %1 = arith.extui %0 : i1 to i32
    %c0_i32_0 = arith.constant 0 : i32
    %2 = arith.cmpi ne, %1, %c0_i32_0 : i32
    scf.if %2 {
      %c0_53 = arith.constant 0 : index
      %c0_54 = arith.constant 0 : index
      %c0_55 = arith.constant 0 : index
      %110 = vector.load %arg2[%c0_53, %c0_54, %c0_55] : memref<1x16x128xf32, #tpu.memory_space<vmem>>, vector<1x16x128xf32>
      %111 = vector.shape_cast %110 : vector<1x16x128xf32> to vector<16x128xf32>
      %c0_56 = arith.constant 0 : index
      %c0_57 = arith.constant 0 : index
      %112 = vector.load %arg5[%c0_56, %c0_57] : memref<2x128xf32, #tpu.memory_space<vmem>>, vector<1x128xf32>
      %113 = vector.shape_cast %112 : vector<1x128xf32> to vector<128xf32>
      %114 = arith.mulf %111, %111 : vector<16x128xf32>
      %cst_58 = arith.constant dense<0.000000e+00> : vector<16xf32>
      %115 = vector.multi_reduction <add>, %114, %cst_58 [1] : vector<16x128xf32> to vector<16xf32>
      %116 = vector.shape_cast %115 : vector<16xf32> to vector<16x1xf32>
      %cst_59 = arith.constant 1.280000e+02 : f32
      %117 = vector.broadcast %cst_59 : f32 to vector<16x1xf32>
      %118 = arith.divf %116, %117 : vector<16x1xf32>
      %cst_60 = arith.constant 9.99999997E-7 : f32
      %119 = vector.broadcast %cst_60 : f32 to vector<16x1xf32>
      %120 = arith.addf %118, %119 : vector<16x1xf32>
      %121 = math.rsqrt %120 : vector<16x1xf32>
      %122 = vector.broadcast %121 : vector<16x1xf32> to vector<16x128xf32>
      %123 = arith.mulf %111, %122 : vector<16x128xf32>
      %124 = vector.shape_cast %113 : vector<128xf32> to vector<1x128xf32>
      %125 = vector.broadcast %124 : vector<1x128xf32> to vector<16x128xf32>
      %126 = arith.mulf %123, %125 : vector<16x128xf32>
      %c0_61 = arith.constant 0 : index
      %c0_62 = arith.constant 0 : index
      %127 = vector.load %arg6[%c0_61, %c0_62] : memref<128x128xf32, #tpu.memory_space<vmem>>, vector<128x128xf32>
      %cst_63 = arith.constant dense<0.000000e+00> : vector<16x128xf32>
      %128 = tpu.matmul %126, %127, %cst_63 {dimension_numbers = #tpu.dot_dimension_numbers<[1], [0], [0], [1], [0, 0, 1, 1], [], []>} : vector<16x128xf32>, vector<128x128xf32>, vector<16x128xf32> -> vector<16x128xf32>
      %129 = math.roundeven %128 : vector<16x128xf32>
      %cst_64 = arith.constant -1.280000e+02 : f32
      %cst_65 = arith.constant 1.270000e+02 : f32
      %130 = vector.broadcast %cst_64 : f32 to vector<16x128xf32>
      %131 = arith.maximumf %130, %129 : vector<16x128xf32>
      %132 = vector.broadcast %cst_65 : f32 to vector<16x128xf32>
      %133 = arith.minimumf %132, %131 : vector<16x128xf32>
      %134 = arith.truncf %133 : vector<16x128xf32> to vector<16x128xbf16>
      %c0_66 = arith.constant 0 : index
      %c0_67 = arith.constant 0 : index
      %135 = vector.load %arg7[%c0_66, %c0_67] : memref<128x384xbf16, #tpu.memory_space<vmem>>, vector<128x384xbf16>
      %cst_68 = arith.constant dense<0.000000e+00> : vector<16x384xf32>
      %136 = tpu.matmul %134, %135, %cst_68 {dimension_numbers = #tpu.dot_dimension_numbers<[1], [0], [0], [1], [0, 0, 1, 1], [], []>} : vector<16x128xbf16>, vector<128x384xbf16>, vector<16x384xf32> -> vector<16x384xf32>
      %c0_69 = arith.constant 0 : index
      %c0_70 = arith.constant 0 : index
      %137 = vector.load %arg11[%c0_69, %c0_70] : memref<1x384xf32, #tpu.memory_space<vmem>>, vector<1x384xf32>
      %138 = vector.broadcast %137 : vector<1x384xf32> to vector<16x384xf32>
      %139 = arith.mulf %136, %138 : vector<16x384xf32>
      %c0_71 = arith.constant 0 : index
      %c0_72 = arith.constant 0 : index
      %140 = vector.load %arg12[%c0_71, %c0_72] : memref<1x384xf32, #tpu.memory_space<vmem>>, vector<1x384xf32>
      %141 = vector.broadcast %140 : vector<1x384xf32> to vector<16x384xf32>
      %142 = arith.addf %139, %141 : vector<16x384xf32>
      %143 = vector.extract_strided_slice %142 {offsets = [0, 0], sizes = [16, 32], strides = [1, 1]} : vector<16x384xf32> to vector<16x32xf32>
      %c0_73 = arith.constant 0 : index
      %c0_74 = arith.constant 0 : index
      %c0_75 = arith.constant 0 : index
      %144 = vector.load %arg21[%c0_73, %c0_74, %c0_75] : memref<4x16x32xf32, #tpu.memory_space<vmem>>, vector<1x16x32xf32>
      %145 = vector.shape_cast %144 : vector<1x16x32xf32> to vector<16x32xf32>
      %146 = vector.shape_cast %143 : vector<16x32xf32> to vector<1x16x32xf32>
      tpu.vector_store %arg21[%c0_73, %c0_74, %c0_75], %146 {strides = array<i32>} : memref<4x16x32xf32, #tpu.memory_space<vmem>>, vector<1x16x32xf32>,
      %147 = vector.extract_strided_slice %142 {offsets = [0, 128], sizes = [16, 32], strides = [1, 1]} : vector<16x384xf32> to vector<16x32xf32>
      %c0_76 = arith.constant 0 : index
      %c0_77 = arith.constant 0 : index
      %c0_78 = arith.constant 0 : index
      %148 = vector.load %arg22[%c0_76, %c0_77, %c0_78] : memref<4x16x32xf32, #tpu.memory_space<vmem>>, vector<1x16x32xf32>
      %149 = vector.shape_cast %148 : vector<1x16x32xf32> to vector<16x32xf32>
      %150 = vector.shape_cast %147 : vector<16x32xf32> to vector<1x16x32xf32>
      tpu.vector_store %arg22[%c0_76, %c0_77, %c0_78], %150 {strides = array<i32>} : memref<4x16x32xf32, #tpu.memory_space<vmem>>, vector<1x16x32xf32>,
      %151 = vector.extract_strided_slice %142 {offsets = [0, 256], sizes = [16, 32], strides = [1, 1]} : vector<16x384xf32> to vector<16x32xf32>
      %c0_79 = arith.constant 0 : index
      %c0_80 = arith.constant 0 : index
      %c0_81 = arith.constant 0 : index
      %152 = vector.load %arg23[%c0_79, %c0_80, %c0_81] : memref<4x16x32xf32, #tpu.memory_space<vmem>>, vector<1x16x32xf32>
      %153 = vector.shape_cast %152 : vector<1x16x32xf32> to vector<16x32xf32>
      %154 = vector.shape_cast %151 : vector<16x32xf32> to vector<1x16x32xf32>
      tpu.vector_store %arg23[%c0_79, %c0_80, %c0_81], %154 {strides = array<i32>} : memref<4x16x32xf32, #tpu.memory_space<vmem>>, vector<1x16x32xf32>,
      %155 = vector.extract_strided_slice %142 {offsets = [0, 32], sizes = [16, 32], strides = [1, 1]} : vector<16x384xf32> to vector<16x32xf32>
      %c1_82 = arith.constant 1 : index
      %c0_83 = arith.constant 0 : index
      %c0_84 = arith.constant 0 : index
      %156 = vector.load %arg21[%c1_82, %c0_83, %c0_84] : memref<4x16x32xf32, #tpu.memory_space<vmem>>, vector<1x16x32xf32>
      %157 = vector.shape_cast %156 : vector<1x16x32xf32> to vector<16x32xf32>
      %158 = vector.shape_cast %155 : vector<16x32xf32> to vector<1x16x32xf32>
      tpu.vector_store %arg21[%c1_82, %c0_83, %c0_84], %158 {strides = array<i32>} : memref<4x16x32xf32, #tpu.memory_space<vmem>>, vector<1x16x32xf32>,
      %159 = vector.extract_strided_slice %142 {offsets = [0, 160], sizes = [16, 32], strides = [1, 1]} : vector<16x384xf32> to vector<16x32xf32>
      %c1_85 = arith.constant 1 : index
      %c0_86 = arith.constant 0 : index
      %c0_87 = arith.constant 0 : index
      %160 = vector.load %arg22[%c1_85, %c0_86, %c0_87] : memref<4x16x32xf32, #tpu.memory_space<vmem>>, vector<1x16x32xf32>
      %161 = vector.shape_cast %160 : vector<1x16x32xf32> to vector<16x32xf32>
      %162 = vector.shape_cast %159 : vector<16x32xf32> to vector<1x16x32xf32>
      tpu.vector_store %arg22[%c1_85, %c0_86, %c0_87], %162 {strides = array<i32>} : memref<4x16x32xf32, #tpu.memory_space<vmem>>, vector<1x16x32xf32>,
      %163 = vector.extract_strided_slice %142 {offsets = [0, 288], sizes = [16, 32], strides = [1, 1]} : vector<16x384xf32> to vector<16x32xf32>
      %c1_88 = arith.constant 1 : index
      %c0_89 = arith.constant 0 : index
      %c0_90 = arith.constant 0 : index
      %164 = vector.load %arg23[%c1_88, %c0_89, %c0_90] : memref<4x16x32xf32, #tpu.memory_space<vmem>>, vector<1x16x32xf32>
      %165 = vector.shape_cast %164 : vector<1x16x32xf32> to vector<16x32xf32>
      %166 = vector.shape_cast %163 : vector<16x32xf32> to vector<1x16x32xf32>
      tpu.vector_store %arg23[%c1_88, %c0_89, %c0_90], %166 {strides = array<i32>} : memref<4x16x32xf32, #tpu.memory_space<vmem>>, vector<1x16x32xf32>,
      %167 = vector.extract_strided_slice %142 {offsets = [0, 64], sizes = [16, 32], strides = [1, 1]} : vector<16x384xf32> to vector<16x32xf32>
      %c2 = arith.constant 2 : index
      %c0_91 = arith.constant 0 : index
      %c0_92 = arith.constant 0 : index
      %168 = vector.load %arg21[%c2, %c0_91, %c0_92] : memref<4x16x32xf32, #tpu.memory_space<vmem>>, vector<1x16x32xf32>
      %169 = vector.shape_cast %168 : vector<1x16x32xf32> to vector<16x32xf32>
      %170 = vector.shape_cast %167 : vector<16x32xf32> to vector<1x16x32xf32>
      tpu.vector_store %arg21[%c2, %c0_91, %c0_92], %170 {strides = array<i32>} : memref<4x16x32xf32, #tpu.memory_space<vmem>>, vector<1x16x32xf32>,
      %171 = vector.extract_strided_slice %142 {offsets = [0, 192], sizes = [16, 32], strides = [1, 1]} : vector<16x384xf32> to vector<16x32xf32>
      %c2_93 = arith.constant 2 : index
      %c0_94 = arith.constant 0 : index
      %c0_95 = arith.constant 0 : index
      %172 = vector.load %arg22[%c2_93, %c0_94, %c0_95] : memref<4x16x32xf32, #tpu.memory_space<vmem>>, vector<1x16x32xf32>
      %173 = vector.shape_cast %172 : vector<1x16x32xf32> to vector<16x32xf32>
      %174 = vector.shape_cast %171 : vector<16x32xf32> to vector<1x16x32xf32>
      tpu.vector_store %arg22[%c2_93, %c0_94, %c0_95], %174 {strides = array<i32>} : memref<4x16x32xf32, #tpu.memory_space<vmem>>, vector<1x16x32xf32>,
      %175 = vector.extract_strided_slice %142 {offsets = [0, 320], sizes = [16, 32], strides = [1, 1]} : vector<16x384xf32> to vector<16x32xf32>
      %c2_96 = arith.constant 2 : index
      %c0_97 = arith.constant 0 : index
      %c0_98 = arith.constant 0 : index
      %176 = vector.load %arg23[%c2_96, %c0_97, %c0_98] : memref<4x16x32xf32, #tpu.memory_space<vmem>>, vector<1x16x32xf32>
      %177 = vector.shape_cast %176 : vector<1x16x32xf32> to vector<16x32xf32>
      %178 = vector.shape_cast %175 : vector<16x32xf32> to vector<1x16x32xf32>
      tpu.vector_store %arg23[%c2_96, %c0_97, %c0_98], %178 {strides = array<i32>} : memref<4x16x32xf32, #tpu.memory_space<vmem>>, vector<1x16x32xf32>,
      %179 = vector.extract_strided_slice %142 {offsets = [0, 96], sizes = [16, 32], strides = [1, 1]} : vector<16x384xf32> to vector<16x32xf32>
      %c3 = arith.constant 3 : index
      %c0_99 = arith.constant 0 : index
      %c0_100 = arith.constant 0 : index
      %180 = vector.load %arg21[%c3, %c0_99, %c0_100] : memref<4x16x32xf32, #tpu.memory_space<vmem>>, vector<1x16x32xf32>
      %181 = vector.shape_cast %180 : vector<1x16x32xf32> to vector<16x32xf32>
      %182 = vector.shape_cast %179 : vector<16x32xf32> to vector<1x16x32xf32>
      tpu.vector_store %arg21[%c3, %c0_99, %c0_100], %182 {strides = array<i32>} : memref<4x16x32xf32, #tpu.memory_space<vmem>>, vector<1x16x32xf32>,
      %183 = vector.extract_strided_slice %142 {offsets = [0, 224], sizes = [16, 32], strides = [1, 1]} : vector<16x384xf32> to vector<16x32xf32>
      %c3_101 = arith.constant 3 : index
      %c0_102 = arith.constant 0 : index
      %c0_103 = arith.constant 0 : index
      %184 = vector.load %arg22[%c3_101, %c0_102, %c0_103] : memref<4x16x32xf32, #tpu.memory_space<vmem>>, vector<1x16x32xf32>
      %185 = vector.shape_cast %184 : vector<1x16x32xf32> to vector<16x32xf32>
      %186 = vector.shape_cast %183 : vector<16x32xf32> to vector<1x16x32xf32>
      tpu.vector_store %arg22[%c3_101, %c0_102, %c0_103], %186 {strides = array<i32>} : memref<4x16x32xf32, #tpu.memory_space<vmem>>, vector<1x16x32xf32>,
      %187 = vector.extract_strided_slice %142 {offsets = [0, 352], sizes = [16, 32], strides = [1, 1]} : vector<16x384xf32> to vector<16x32xf32>
      %c3_104 = arith.constant 3 : index
      %c0_105 = arith.constant 0 : index
      %c0_106 = arith.constant 0 : index
      %188 = vector.load %arg23[%c3_104, %c0_105, %c0_106] : memref<4x16x32xf32, #tpu.memory_space<vmem>>, vector<1x16x32xf32>
      %189 = vector.shape_cast %188 : vector<1x16x32xf32> to vector<16x32xf32>
      %190 = vector.shape_cast %187 : vector<16x32xf32> to vector<1x16x32xf32>
      tpu.vector_store %arg23[%c3_104, %c0_105, %c0_106], %190 {strides = array<i32>} : memref<4x16x32xf32, #tpu.memory_space<vmem>>, vector<1x16x32xf32>,
      %c0_107 = arith.constant 0 : index
      %c0_108 = arith.constant 0 : index
      %191 = vector.load %arg17[%c0_107, %c0_108] : memref<16x32xf32, #tpu.memory_space<vmem>>, vector<16x32xf32>
      %192 = vector.shape_cast %191 : vector<16x32xf32> to vector<1x16x32xf32>
      %c0_109 = arith.constant 0 : index
      %c0_110 = arith.constant 0 : index
      %193 = vector.load %arg18[%c0_109, %c0_110] : memref<16x32xf32, #tpu.memory_space<vmem>>, vector<16x32xf32>
      %194 = vector.shape_cast %193 : vector<16x32xf32> to vector<1x16x32xf32>
      %c0_111 = arith.constant 0 : index
      %c0_112 = arith.constant 0 : index
      %c0_113 = arith.constant 0 : index
      %195 = vector.load %arg21[%c0_111, %c0_112, %c0_113] : memref<4x16x32xf32, #tpu.memory_space<vmem>>, vector<4x16x32xf32>
      %196 = vector.broadcast %192 : vector<1x16x32xf32> to vector<4x16x32xf32>
      %197 = arith.mulf %195, %196 : vector<4x16x32xf32>
      %c0_114 = arith.constant 0 : index
      %c0_115 = arith.constant 0 : index
      %c0_116 = arith.constant 0 : index
      %198 = vector.load %arg21[%c0_114, %c0_115, %c0_116] : memref<4x16x32xf32, #tpu.memory_space<vmem>>, vector<4x16x32xf32>
      %199 = vector.extract_strided_slice %198 {offsets = [0, 0, 16], sizes = [4, 16, 16], strides = [1, 1, 1]} : vector<4x16x32xf32> to vector<4x16x16xf32>
      %200 = vector.extract_strided_slice %198 {offsets = [0, 0, 0], sizes = [4, 16, 16], strides = [1, 1, 1]} : vector<4x16x32xf32> to vector<4x16x16xf32>
      %201 = tpu.concatenate %199, %200 in 2 : vector<4x16x16xf32>, vector<4x16x16xf32> -> vector<4x16x32xf32>
      %202 = vector.broadcast %194 : vector<1x16x32xf32> to vector<4x16x32xf32>
      %203 = arith.mulf %201, %202 : vector<4x16x32xf32>
      %204 = arith.addf %197, %203 : vector<4x16x32xf32>
      %c0_117 = arith.constant 0 : index
      %c0_118 = arith.constant 0 : index
      %c0_119 = arith.constant 0 : index
      %205 = vector.load %arg21[%c0_117, %c0_118, %c0_119] : memref<4x16x32xf32, #tpu.memory_space<vmem>>, vector<4x16x32xf32>
      tpu.vector_store %arg21[%c0_117, %c0_118, %c0_119], %204 {strides = array<i32>} : memref<4x16x32xf32, #tpu.memory_space<vmem>>, vector<4x16x32xf32>,
      %c0_120 = arith.constant 0 : index
      %c0_121 = arith.constant 0 : index
      %c0_122 = arith.constant 0 : index
      %206 = vector.load %arg22[%c0_120, %c0_121, %c0_122] : memref<4x16x32xf32, #tpu.memory_space<vmem>>, vector<4x16x32xf32>
      %207 = vector.broadcast %192 : vector<1x16x32xf32> to vector<4x16x32xf32>
      %208 = arith.mulf %206, %207 : vector<4x16x32xf32>
      %c0_123 = arith.constant 0 : index
      %c0_124 = arith.constant 0 : index
      %c0_125 = arith.constant 0 : index
      %209 = vector.load %arg22[%c0_123, %c0_124, %c0_125] : memref<4x16x32xf32, #tpu.memory_space<vmem>>, vector<4x16x32xf32>
      %210 = vector.extract_strided_slice %209 {offsets = [0, 0, 16], sizes = [4, 16, 16], strides = [1, 1, 1]} : vector<4x16x32xf32> to vector<4x16x16xf32>
      %211 = vector.extract_strided_slice %209 {offsets = [0, 0, 0], sizes = [4, 16, 16], strides = [1, 1, 1]} : vector<4x16x32xf32> to vector<4x16x16xf32>
      %212 = tpu.concatenate %210, %211 in 2 : vector<4x16x16xf32>, vector<4x16x16xf32> -> vector<4x16x32xf32>
      %213 = vector.broadcast %194 : vector<1x16x32xf32> to vector<4x16x32xf32>
      %214 = arith.mulf %212, %213 : vector<4x16x32xf32>
      %215 = arith.addf %208, %214 : vector<4x16x32xf32>
      %c0_126 = arith.constant 0 : index
      %c0_127 = arith.constant 0 : index
      %c0_128 = arith.constant 0 : index
      %216 = vector.load %arg22[%c0_126, %c0_127, %c0_128] : memref<4x16x32xf32, #tpu.memory_space<vmem>>, vector<4x16x32xf32>
      tpu.vector_store %arg22[%c0_126, %c0_127, %c0_128], %215 {strides = array<i32>} : memref<4x16x32xf32, #tpu.memory_space<vmem>>, vector<4x16x32xf32>,
    } else {
    }
    %c8_i32 = arith.constant 8 : i32
    %3 = arith.muli %arg1, %c8_i32 : i32
    %4 = tpu.assume_multiple %3, 8 : i32
    %c0 = arith.constant 0 : index
    %5 = arith.index_cast %4 : i32 to index
    %c0_1 = arith.constant 0 : index
    %6 = vector.load %arg21[%c0, %5, %c0_1] : memref<4x16x32xf32, #tpu.memory_space<vmem>>, vector<4x8x32xf32>
    %c0_2 = arith.constant 0 : index
    %c0_3 = arith.constant 0 : index
    %c0_4 = arith.constant 0 : index
    %7 = vector.load %arg22[%c0_2, %c0_3, %c0_4] : memref<4x16x32xf32, #tpu.memory_space<vmem>>, vector<4x16x32xf32>
    %c0_5 = arith.constant 0 : index
    %c0_6 = arith.constant 0 : index
    %c0_7 = arith.constant 0 : index
    %8 = vector.load %arg23[%c0_5, %c0_6, %c0_7] : memref<4x16x32xf32, #tpu.memory_space<vmem>>, vector<4x16x32xf32>
    "tpu.trace_start"() <{level = 10 : i32, message = "hqd,hkd->hqk"}> : () -> ()
    %cst = arith.constant dense<0.000000e+00> : vector<4x8x16xf32>
    %9 = tpu.matmul %6, %7, %cst {dimension_numbers = #tpu.dot_dimension_numbers<[2], [2], [1], [1], [0, 0, 0, 1, 1, 1], [0], [0]>} : vector<4x8x32xf32>, vector<4x16x32xf32>, vector<4x8x16xf32> -> vector<4x8x16xf32>
    "tpu.trace_stop"() : () -> ()
    %c0_8 = arith.constant 0 : index
    %c0_9 = arith.constant 0 : index
    %c0_10 = arith.constant 0 : index
    %10 = vector.load %arg4[%c0_8, %c0_9, %c0_10] : memref<1x8x16xf32, #tpu.memory_space<vmem>>, vector<1x8x16xf32>
    %11 = vector.shape_cast %10 : vector<1x8x16xf32> to vector<8x16xf32>
    %12 = vector.shape_cast %11 : vector<8x16xf32> to vector<1x8x16xf32>
    %13 = vector.broadcast %12 : vector<1x8x16xf32> to vector<4x8x16xf32>
    %14 = arith.addf %9, %13 : vector<4x8x16xf32>
    %cst_11 = arith.constant dense<0xFF800000> : vector<4x8xf32>
    %15 = vector.multi_reduction <maximumf>, %14, %cst_11 [2] : vector<4x8x16xf32> to vector<4x8xf32>
    %16 = vector.shape_cast %15 : vector<4x8xf32> to vector<4x8x1xf32>
    %17 = vector.broadcast %16 : vector<4x8x1xf32> to vector<4x8x16xf32>
    %18 = arith.subf %14, %17 : vector<4x8x16xf32>
    %19 = math.exp %18 : vector<4x8x16xf32>
    %cst_12 = arith.constant dense<0.000000e+00> : vector<4x8xf32>
    %20 = vector.multi_reduction <add>, %19, %cst_12 [2] : vector<4x8x16xf32> to vector<4x8xf32>
    %21 = vector.shape_cast %20 : vector<4x8xf32> to vector<4x8x1xf32>
    %22 = tpu.reciprocal %21 {approx = true} : vector<4x8x1xf32> -> vector<4x8x1xf32>
    %23 = vector.broadcast %22 : vector<4x8x1xf32> to vector<4x8x16xf32>
    %24 = arith.mulf %19, %23 : vector<4x8x16xf32>
    "tpu.trace_start"() <{level = 10 : i32, message = "hqk,hkd->hqd"}> : () -> ()
    %cst_13 = arith.constant dense<0.000000e+00> : vector<4x8x32xf32>
    %25 = tpu.matmul %24, %8, %cst_13 {dimension_numbers = #tpu.dot_dimension_numbers<[2], [1], [1], [2], [0, 0, 0, 1, 1, 2], [0], [0]>} : vector<4x8x16xf32>, vector<4x16x32xf32>, vector<4x8x32xf32> -> vector<4x8x32xf32>
    "tpu.trace_stop"() : () -> ()
    %26 = vector.extract_strided_slice %25 {offsets = [0, 0, 0], sizes = [1, 8, 32], strides = [1, 1, 1]} : vector<4x8x32xf32> to vector<1x8x32xf32>
    %27 = vector.shape_cast %26 : vector<1x8x32xf32> to vector<8x32xf32>
    %28 = vector.extract_strided_slice %25 {offsets = [1, 0, 0], sizes = [1, 8, 32], strides = [1, 1, 1]} : vector<4x8x32xf32> to vector<1x8x32xf32>
    %29 = vector.shape_cast %28 : vector<1x8x32xf32> to vector<8x32xf32>
    %30 = vector.extract_strided_slice %25 {offsets = [2, 0, 0], sizes = [1, 8, 32], strides = [1, 1, 1]} : vector<4x8x32xf32> to vector<1x8x32xf32>
    %31 = vector.shape_cast %30 : vector<1x8x32xf32> to vector<8x32xf32>
    %32 = vector.extract_strided_slice %25 {offsets = [3, 0, 0], sizes = [1, 8, 32], strides = [1, 1, 1]} : vector<4x8x32xf32> to vector<1x8x32xf32>
    %33 = vector.shape_cast %32 : vector<1x8x32xf32> to vector<8x32xf32>
    %34 = tpu.concatenate %27, %29, %31, %33 in 1 : vector<8x32xf32>, vector<8x32xf32>, vector<8x32xf32>, vector<8x32xf32> -> vector<8x128xf32>
    %35 = math.roundeven %34 : vector<8x128xf32>
    %cst_14 = arith.constant -1.280000e+02 : f32
    %cst_15 = arith.constant 1.270000e+02 : f32
    %36 = vector.broadcast %cst_14 : f32 to vector<8x128xf32>
    %37 = arith.maximumf %36, %35 : vector<8x128xf32>
    %38 = vector.broadcast %cst_15 : f32 to vector<8x128xf32>
    %39 = arith.minimumf %38, %37 : vector<8x128xf32>
    %40 = arith.truncf %39 : vector<8x128xf32> to vector<8x128xbf16>
    %c0_16 = arith.constant 0 : index
    %c0_17 = arith.constant 0 : index
    %41 = vector.load %arg8[%c0_16, %c0_17] : memref<128x128xbf16, #tpu.memory_space<vmem>>, vector<128x128xbf16>
    %cst_18 = arith.constant dense<0.000000e+00> : vector<8x128xf32>
    %42 = tpu.matmul %40, %41, %cst_18 {dimension_numbers = #tpu.dot_dimension_numbers<[1], [0], [0], [1], [0, 0, 1, 1], [], []>} : vector<8x128xbf16>, vector<128x128xbf16>, vector<8x128xf32> -> vector<8x128xf32>
    %c0_19 = arith.constant 0 : index
    %43 = memref.load %arg19[%c0_19] : memref<2xf32, #tpu.memory_space<smem>>
    %44 = vector.broadcast %43 : f32 to vector<8x128xf32>
    %45 = arith.mulf %42, %44 : vector<8x128xf32>
    %c0_20 = arith.constant 0 : index
    %c0_21 = arith.constant 0 : index
    %46 = vector.load %arg15[%c0_20, %c0_21] : memref<1x128xf32, #tpu.memory_space<vmem>>, vector<1x128xf32>
    %47 = vector.broadcast %46 : vector<1x128xf32> to vector<8x128xf32>
    %48 = arith.addf %45, %47 : vector<8x128xf32>
    %c0_22 = arith.constant 0 : index
    %c0_23 = arith.constant 0 : index
    %c0_24 = arith.constant 0 : index
    %49 = vector.load %arg3[%c0_22, %c0_23, %c0_24] : memref<1x8x128xf32, #tpu.memory_space<vmem>>, vector<1x8x128xf32>
    %50 = vector.shape_cast %49 : vector<1x8x128xf32> to vector<8x128xf32>
    %51 = arith.addf %50, %48 : vector<8x128xf32>
    %c1 = arith.constant 1 : index
    %c0_25 = arith.constant 0 : index
    %52 = vector.load %arg5[%c1, %c0_25] : memref<2x128xf32, #tpu.memory_space<vmem>>, vector<1x128xf32>
    %53 = vector.shape_cast %52 : vector<1x128xf32> to vector<128xf32>
    %54 = arith.mulf %51, %51 : vector<8x128xf32>
    %cst_26 = arith.constant dense<0.000000e+00> : vector<8xf32>
    %55 = vector.multi_reduction <add>, %54, %cst_26 [1] : vector<8x128xf32> to vector<8xf32>
    %56 = vector.shape_cast %55 : vector<8xf32> to vector<8x1xf32>
    %cst_27 = arith.constant 1.280000e+02 : f32
    %57 = vector.broadcast %cst_27 : f32 to vector<8x1xf32>
    %58 = arith.divf %56, %57 : vector<8x1xf32>
    %cst_28 = arith.constant 9.99999997E-7 : f32
    %59 = vector.broadcast %cst_28 : f32 to vector<8x1xf32>
    %60 = arith.addf %58, %59 : vector<8x1xf32>
    %61 = math.rsqrt %60 : vector<8x1xf32>
    %62 = vector.broadcast %61 : vector<8x1xf32> to vector<8x128xf32>
    %63 = arith.mulf %51, %62 : vector<8x128xf32>
    %64 = vector.shape_cast %53 : vector<128xf32> to vector<1x128xf32>
    %65 = vector.broadcast %64 : vector<1x128xf32> to vector<8x128xf32>
    %66 = arith.mulf %63, %65 : vector<8x128xf32>
    %c0_29 = arith.constant 0 : index
    %c0_30 = arith.constant 0 : index
    %67 = vector.load %arg6[%c0_29, %c0_30] : memref<128x128xf32, #tpu.memory_space<vmem>>, vector<128x128xf32>
    %cst_31 = arith.constant dense<0.000000e+00> : vector<8x128xf32>
    %68 = tpu.matmul %66, %67, %cst_31 {dimension_numbers = #tpu.dot_dimension_numbers<[1], [0], [0], [1], [0, 0, 1, 1], [], []>} : vector<8x128xf32>, vector<128x128xf32>, vector<8x128xf32> -> vector<8x128xf32>
    %69 = math.roundeven %68 : vector<8x128xf32>
    %cst_32 = arith.constant -1.280000e+02 : f32
    %cst_33 = arith.constant 1.270000e+02 : f32
    %70 = vector.broadcast %cst_32 : f32 to vector<8x128xf32>
    %71 = arith.maximumf %70, %69 : vector<8x128xf32>
    %72 = vector.broadcast %cst_33 : f32 to vector<8x128xf32>
    %73 = arith.minimumf %72, %71 : vector<8x128xf32>
    %74 = arith.truncf %73 : vector<8x128xf32> to vector<8x128xbf16>
    %c0_34 = arith.constant 0 : index
    %c0_35 = arith.constant 0 : index
    %75 = vector.load %arg9[%c0_34, %c0_35] : memref<128x512xbf16, #tpu.memory_space<vmem>>, vector<128x512xbf16>
    %cst_36 = arith.constant dense<0.000000e+00> : vector<8x512xf32>
    %76 = tpu.matmul %74, %75, %cst_36 {dimension_numbers = #tpu.dot_dimension_numbers<[1], [0], [0], [1], [0, 0, 1, 1], [], []>} : vector<8x128xbf16>, vector<128x512xbf16>, vector<8x512xf32> -> vector<8x512xf32>
    %c0_37 = arith.constant 0 : index
    %c0_38 = arith.constant 0 : index
    %77 = vector.load %arg13[%c0_37, %c0_38] : memref<1x512xf32, #tpu.memory_space<vmem>>, vector<1x512xf32>
    %78 = vector.broadcast %77 : vector<1x512xf32> to vector<8x512xf32>
    %79 = arith.mulf %76, %78 : vector<8x512xf32>
    %c0_39 = arith.constant 0 : index
    %c0_40 = arith.constant 0 : index
    %80 = vector.load %arg14[%c0_39, %c0_40] : memref<1x512xf32, #tpu.memory_space<vmem>>, vector<1x512xf32>
    %81 = vector.broadcast %80 : vector<1x512xf32> to vector<8x512xf32>
    %82 = arith.addf %79, %81 : vector<8x512xf32>
    %83 = vector.extract_strided_slice %82 {offsets = [0, 0], sizes = [8, 256], strides = [1, 1]} : vector<8x512xf32> to vector<8x256xf32>
    %84 = vector.extract_strided_slice %82 {offsets = [0, 256], sizes = [8, 256], strides = [1, 1]} : vector<8x512xf32> to vector<8x256xf32>
    %85 = arith.negf %83 : vector<8x256xf32>
    %86 = math.exp %85 : vector<8x256xf32>
    %cst_41 = arith.constant 1.000000e+00 : f32
    %87 = vector.broadcast %cst_41 : f32 to vector<8x256xf32>
    %88 = arith.addf %87, %86 : vector<8x256xf32>
    %89 = arith.divf %87, %88 : vector<8x256xf32>
    %90 = arith.mulf %83, %89 : vector<8x256xf32>
    %91 = arith.mulf %90, %84 : vector<8x256xf32>
    %92 = math.roundeven %91 : vector<8x256xf32>
    %cst_42 = arith.constant -1.280000e+02 : f32
    %cst_43 = arith.constant 1.270000e+02 : f32
    %93 = vector.broadcast %cst_42 : f32 to vector<8x256xf32>
    %94 = arith.maximumf %93, %92 : vector<8x256xf32>
    %95 = vector.broadcast %cst_43 : f32 to vector<8x256xf32>
    %96 = arith.minimumf %95, %94 : vector<8x256xf32>
    %97 = arith.truncf %96 : vector<8x256xf32> to vector<8x256xbf16>
    %c0_44 = arith.constant 0 : index
    %c0_45 = arith.constant 0 : index
    %98 = vector.load %arg10[%c0_44, %c0_45] : memref<256x128xbf16, #tpu.memory_space<vmem>>, vector<256x128xbf16>
    %cst_46 = arith.constant dense<0.000000e+00> : vector<8x128xf32>
    %99 = tpu.matmul %97, %98, %cst_46 {dimension_numbers = #tpu.dot_dimension_numbers<[1], [0], [0], [1], [0, 0, 1, 1], [], []>} : vector<8x256xbf16>, vector<256x128xbf16>, vector<8x128xf32> -> vector<8x128xf32>
    %c1_47 = arith.constant 1 : index
    %100 = memref.load %arg19[%c1_47] : memref<2xf32, #tpu.memory_space<smem>>
    %101 = vector.broadcast %100 : f32 to vector<8x128xf32>
    %102 = arith.mulf %99, %101 : vector<8x128xf32>
    %c0_48 = arith.constant 0 : index
    %c0_49 = arith.constant 0 : index
    %103 = vector.load %arg16[%c0_48, %c0_49] : memref<1x128xf32, #tpu.memory_space<vmem>>, vector<1x128xf32>
    %104 = vector.broadcast %103 : vector<1x128xf32> to vector<8x128xf32>
    %105 = arith.addf %102, %104 : vector<8x128xf32>
    %106 = arith.addf %51, %105 : vector<8x128xf32>
    %c0_50 = arith.constant 0 : index
    %c0_51 = arith.constant 0 : index
    %c0_52 = arith.constant 0 : index
    %107 = vector.load %arg20[%c0_50, %c0_51, %c0_52] : memref<1x8x128xf32, #tpu.memory_space<vmem>>, vector<1x8x128xf32>
    %108 = vector.shape_cast %107 : vector<1x8x128xf32> to vector<8x128xf32>
    %109 = vector.shape_cast %106 : vector<8x128xf32> to vector<1x8x128xf32>
    tpu.vector_store %arg20[%c0_50, %c0_51, %c0_52], %109 {strides = array<i32>} : memref<1x8x128xf32, #tpu.memory_space<vmem>>, vector<1x8x128xf32>,
    return
  }
  func.func @transform_0(%arg0: i32, %arg1: i32) -> (i32, i32, i32) {
    %c0_i32 = arith.constant 0 : i32
    %c0_i32_0 = arith.constant 0 : i32
    %c0_i32_1 = arith.constant 0 : i32
    return %arg0, %c0_i32, %c0_i32_0 : i32, i32, i32
  }
  func.func @transform_1(%arg0: i32, %arg1: i32) -> (i32, i32, i32) {
    %c0_i32 = arith.constant 0 : i32
    %c0_i32_0 = arith.constant 0 : i32
    return %arg0, %arg1, %c0_i32 : i32, i32, i32
  }
  func.func @transform_2(%arg0: i32, %arg1: i32) -> (i32, i32, i32) {
    %c0_i32 = arith.constant 0 : i32
    %c0_i32_0 = arith.constant 0 : i32
    %c0_i32_1 = arith.constant 0 : i32
    return %c0_i32, %arg1, %c0_i32_0 : i32, i32, i32
  }
  func.func @transform_3(%arg0: i32, %arg1: i32) -> (i32, i32) {
    %c0_i32 = arith.constant 0 : i32
    %c0_i32_0 = arith.constant 0 : i32
    %c0_i32_1 = arith.constant 0 : i32
    return %c0_i32, %c0_i32_0 : i32, i32
  }
  func.func @transform_4(%arg0: i32, %arg1: i32) -> (i32, i32) {
    %c0_i32 = arith.constant 0 : i32
    %c0_i32_0 = arith.constant 0 : i32
    %c0_i32_1 = arith.constant 0 : i32
    return %c0_i32, %c0_i32_0 : i32, i32
  }
  func.func @transform_5(%arg0: i32, %arg1: i32) -> (i32, i32) {
    %c0_i32 = arith.constant 0 : i32
    %c0_i32_0 = arith.constant 0 : i32
    %c0_i32_1 = arith.constant 0 : i32
    return %c0_i32, %c0_i32_0 : i32, i32
  }
  func.func @transform_6(%arg0: i32, %arg1: i32) -> (i32, i32) {
    %c0_i32 = arith.constant 0 : i32
    %c0_i32_0 = arith.constant 0 : i32
    %c0_i32_1 = arith.constant 0 : i32
    return %c0_i32, %c0_i32_0 : i32, i32
  }
  func.func @transform_7(%arg0: i32, %arg1: i32) -> (i32, i32) {
    %c0_i32 = arith.constant 0 : i32
    %c0_i32_0 = arith.constant 0 : i32
    %c0_i32_1 = arith.constant 0 : i32
    return %c0_i32, %c0_i32_0 : i32, i32
  }
  func.func @transform_8(%arg0: i32, %arg1: i32) -> (i32, i32) {
    %c0_i32 = arith.constant 0 : i32
    %c0_i32_0 = arith.constant 0 : i32
    %c0_i32_1 = arith.constant 0 : i32
    return %c0_i32, %c0_i32_0 : i32, i32
  }
  func.func @transform_9(%arg0: i32, %arg1: i32) -> (i32, i32) {
    %c0_i32 = arith.constant 0 : i32
    %c0_i32_0 = arith.constant 0 : i32
    %c0_i32_1 = arith.constant 0 : i32
    return %c0_i32, %c0_i32_0 : i32, i32
  }
  func.func @transform_10(%arg0: i32, %arg1: i32) -> (i32, i32) {
    %c0_i32 = arith.constant 0 : i32
    %c0_i32_0 = arith.constant 0 : i32
    %c0_i32_1 = arith.constant 0 : i32
    return %c0_i32, %c0_i32_0 : i32, i32
  }
  func.func @transform_11(%arg0: i32, %arg1: i32) -> (i32, i32) {
    %c0_i32 = arith.constant 0 : i32
    %c0_i32_0 = arith.constant 0 : i32
    %c0_i32_1 = arith.constant 0 : i32
    return %c0_i32, %c0_i32_0 : i32, i32
  }
  func.func @transform_12(%arg0: i32, %arg1: i32) -> (i32, i32) {
    %c0_i32 = arith.constant 0 : i32
    %c0_i32_0 = arith.constant 0 : i32
    %c0_i32_1 = arith.constant 0 : i32
    return %c0_i32, %c0_i32_0 : i32, i32
  }
  func.func @transform_13(%arg0: i32, %arg1: i32) -> (i32, i32) {
    %c0_i32 = arith.constant 0 : i32
    %c0_i32_0 = arith.constant 0 : i32
    %c0_i32_1 = arith.constant 0 : i32
    return %c0_i32, %c0_i32_0 : i32, i32
  }
  func.func @transform_14(%arg0: i32, %arg1: i32) -> (i32, i32) {
    %c0_i32 = arith.constant 0 : i32
    %c0_i32_0 = arith.constant 0 : i32
    %c0_i32_1 = arith.constant 0 : i32
    return %c0_i32, %c0_i32_0 : i32, i32
  }
  func.func @transform_15(%arg0: i32, %arg1: i32) -> (i32, i32) {
    %c0_i32 = arith.constant 0 : i32
    %c0_i32_0 = arith.constant 0 : i32
    %c0_i32_1 = arith.constant 0 : i32
    return %c0_i32, %c0_i32_0 : i32, i32
  }
  func.func @transform_16(%arg0: i32, %arg1: i32) -> (i32, i32) {
    %c0_i32 = arith.constant 0 : i32
    %c0_i32_0 = arith.constant 0 : i32
    %c0_i32_1 = arith.constant 0 : i32
    return %c0_i32, %c0_i32_0 : i32, i32
  }
  func.func @transform_17(%arg0: i32, %arg1: i32) -> i32 {
    %c0_i32 = arith.constant 0 : i32
    %c0_i32_0 = arith.constant 0 : i32
    return %c0_i32 : i32
  }
  func.func @transform_18(%arg0: i32, %arg1: i32) -> (i32, i32, i32) {
    %c0_i32 = arith.constant 0 : i32
    %c0_i32_0 = arith.constant 0 : i32
    return %arg0, %arg1, %c0_i32 : i32, i32, i32
  }
}

</mosaic_0001>

<bundles_post_ra>
// kernel: tpu_custom_call.1
= control target key start
LH: loop header
LB: loop body
LE: loop exit
PB: predicated region body
PF: predicated region fallthrough
CT: control target
= control target key end

     0   :  { %s6219_s0 = inlined_call_operand.hbm [shape: f32[2,16,128], index: 0, kind: input, shape index: {}]   ;;  %s6220_s1 = inlined_call_operand.hbm [shape: f32[2,16,128], index: 1, kind: input, shape index: {}]   ;;  %s6221_s2 = inlined_call_operand.hbm [shape: f32[1,16,16], index: 2, kind: input, shape index: {}]   ;;  %s6222_s3 = inlined_call_operand.hbm [shape: f32[2,128], index: 3, kind: input, shape index: {}]   ;;  %s6223_s4 = inlined_call_operand.hbm [shape: f32[128,128], index: 4, kind: input, shape index: {}]   ;;  %s6224_s5 = inlined_call_operand.hbm [shape: bf16[128,384], index: 5, kind: input, shape index: {}]   ;;  %s6225_s6 = inlined_call_operand.hbm [shape: bf16[128,128], index: 6, kind: input, shape index: {}]   ;;  %s6226_s7 = inlined_call_operand.hbm [shape: bf16[128,512], index: 7, kind: input, shape index: {}]   ;;  %s6227_s8 = inlined_call_operand.hbm [shape: bf16[256,128], index: 8, kind: input, shape index: {}]   ;;  %s6228_s9 = inlined_call_operand.hbm [shape: f32[1,384], index: 9, kind: input, shape index: {}]   ;;  %s6229_s10 = inlined_call_operand.hbm [shape: f32[1,384], index: 10, kind: input, shape index: {}]   ;;  %s6230_s11 = inlined_call_operand.hbm [shape: f32[1,512], index: 11, kind: input, shape index: {}]   ;;  %s6231_s12 = inlined_call_operand.hbm [shape: f32[1,512], index: 12, kind: input, shape index: {}]   ;;  %s6232_s13 = inlined_call_operand.hbm [shape: f32[1,128], index: 13, kind: input, shape index: {}]   ;;  %s6233_s14 = inlined_call_operand.hbm [shape: f32[1,128], index: 14, kind: input, shape index: {}]   ;;  %s6234_s15 = inlined_call_operand.hbm [shape: f32[16,32], index: 15, kind: input, shape index: {}]   ;;  %s6235_s16 = inlined_call_operand.hbm [shape: f32[16,32], index: 16, kind: input, shape index: {}]   ;;  %s6236_s17 = inlined_call_operand.hbm [shape: f32[2], index: 17, kind: input, shape index: {}]   ;;  %s6237_s18 = inlined_call_operand.hbm [shape: f32[2,16,128], index: 18, kind: output, shape index: {}]  }
   0x1   :  { %6280 = sst [smem:[#allocation61_spill]] %s6219_s0 }
   0x2   :  { %6281 = sst [smem:[#allocation62_spill]] %s6220_s1 }
   0x3   :  { %6282 = sst [smem:[#allocation63_spill]] %s6221_s2 }
   0x4   :  { %6283 = sst [smem:[#allocation64_spill]] %s6222_s3 }
   0x5   :  { %6284 = sst [smem:[#allocation65_spill]] %s6223_s4 }
   0x6   :  { %6285 = sst [smem:[#allocation66_spill]] %s6224_s5 }
   0x7   :  { %6286 = sst [smem:[#allocation67_spill]] %s6225_s6 }
   0x8   :  { %6287 = sst [smem:[#allocation68_spill]] %s6226_s7 }
   0x9   :  { %6288 = sst [smem:[#allocation69_spill]] %s6227_s8 }
   0xa   :  { %6289 = sst [smem:[#allocation70_spill]] %s6228_s9 }
   0xb   :  { %6290 = sst [smem:[#allocation71_spill]] %s6229_s10 }
   0xc   :  { %6291 = sst [smem:[#allocation72_spill]] %s6230_s11 }
   0xd   :  { %6292 = sst [smem:[#allocation73_spill]] %s6231_s12 }
   0xe   :  { %6293 = sst [smem:[#allocation74_spill]] %s6232_s13 }
   0xf   :  { %6294 = sst [smem:[#allocation75_spill]] %s6233_s14 }
  0x10   :  { %6295 = sst [smem:[#allocation76_spill]] %s6234_s15 }
  0x11   :  { %6296 = sst [smem:[#allocation77_spill]] %s6235_s16 }
  0x12   :  { %6297 = sst [smem:[#allocation78_spill]] %s6236_s17 }
  0x13   :  { %6298 = sst [smem:[#allocation79_spill]] %s6237_s18 }
  0x14   :  { %23 = vsyncpa [#allocation6], 0 }
  0x15   :  { %25 = vsyncpa [#allocation6 + $0x1], 0 }
  0x16   :  { %26 = vsyncpa [#allocation10], 0 }
  0x17   :  { %28 = vsyncpa [#allocation10 + $0x1], 0 }
  0x18   :  { %29 = vsyncpa [#allocation13], 0 }
  0x19   :  { %30 = vsyncpa [#allocation16], 0 }
  0x1a   :  { %31 = vsyncpa [#allocation19], 0 }
  0x1b   :  { %32 = vsyncpa [#allocation22], 0 }
  0x1c   :  { %33 = vsyncpa [#allocation25], 0 }
  0x1d   :  { %34 = vsyncpa [#allocation28], 0 }
  0x1e   :  { %35 = vsyncpa [#allocation31], 0 }
  0x1f   :  { %36 = vsyncpa [#allocation8], 0 }
  0x20   :  { %37 = vsyncpa [#allocation7], 0 }
  0x21   :  { %39 = vsyncpa [#allocation7 + $0x1], 0  ;;  %s5126_s27 = smov 0   ;;  %s5128_s28 = smov 0  }
  0x22   :  { %s5130_s29 = smov 0   ;;  %s5132_s30 = smov 0  }
  0x23   :  { %s5134_s0 = smov 0   ;;  %s5136_s19 = smov 0  }
  0x24   :  { %s5138_s1 = smov 0   ;;  %s5140_s20 = smov 0  }
  0x25   :  { %s5142_s21 = smov 0   ;;  %s5144_s22 = smov 0  }
  0x26   :  { %s5146_s2 = smov 0   ;;  %s5148_s23 = smov 0  }
  0x27   :  { %s5150_s24 = smov 0   ;;  %s5152_s25 = smov 0  }
  0x28 LB: > { %6299 = sst [smem:[#allocation47_spill]] %s4935_s27  ;;  %s5197_s26 = sadd.s32 4294967295, %s4987_s25   ;;  %s4987_s25 = sphi %s5152_s25, %s45_s25   ;;  %s4983_s24 = sphi %s5150_s24, %s6412_s24   ;;  %s4979_s23 = sphi %s5148_s23, %s6411_s23   ;;  %s4975_s2 = sphi %s5146_s2, %s6410_s2   ;;  %s4971_s22 = sphi %s5144_s22, %s6409_s22   ;;  %s4967_s21 = sphi %s5142_s21, %s6408_s21   ;;  %s4963_s20 = sphi %s5140_s20, %s6401_s20   ;;  %s4959_s1 = sphi %s5138_s1, %s6400_s1   ;;  %s4955_s19 = sphi %s5136_s19, %s6399_s19   ;;  %s4951_s0 = sphi %s5134_s0, %s6407_s0   ;;  %s4947_s30 = sphi %s5132_s30, %s6406_s30   ;;  %s4943_s29 = sphi %s5130_s29, %s6405_s29   ;;  %s4939_s28 = sphi %s5128_s28, %s6397_s28   ;;  %s4935_s27 = sphi %s5126_s27, %s6396_s27  }
  0x29   : > { %6300 = sst [smem:[#allocation48_spill]] %s4939_s28  ;;  %p3351_p0 = scmp.ge.s32.totalorder %s4987_s25, 1 }
  0x2a   : > { %6301 = sst [smem:[#allocation49_spill]] %s4943_s29  ;;  %p6251_p1 = scmp.eq.s32.totalorder %s5197_s26, 0 }
  0x2b   : > { %6302 = sst [smem:[#allocation50_spill]] %s4955_s19  ;;  %p485_p2 = scmp.lt.s32.totalorder %s4987_s25, 5 }
  0x2c   : > { %6303 = sst [smem:[#allocation51_spill]] %s4959_s1  ;;  %s4990_s27 = smov [#allocation15]  }
  0x2d   : > { %6304 = sst [smem:[#allocation52_spill]] %s4963_s20  ;;  %p5202_p3 = pnand %p3351_p0, %p485_p2 }
  0x2e   : > { %6305 = sst [smem:[#allocation53_spill]] %s4967_s21  ;;  %s521_s28 = sshll.u32 %s4990_s27, 4  ;;  %s5214_s28 = int_to_ptr.vmem [resolvable:$true] %s521_s28 }
  0x2f   : > { %6306 = sst [smem:[#allocation54_spill]] %s4971_s22  ;;  %p3930_p4 = pneg %p5202_p3 }
  0x30   : > { %6307 = sst [smem:[#allocation55_spill]] %s4975_s2  ;;  %s4989_s2 = smov [#allocation12]  }
  0x31   : > { %s6308_s18 = scalar_select %p5202_p3, 1, 0 }
  0x32   : > { %s498_s22 = sshll.u32 %s4989_s2, 4  ;;  %p5210_p5 = pnand %p3930_p4, %p6251_p1  ;;  %s499_s22 = int_to_ptr.vmem [resolvable:$true] %s498_s22 }
  0x33   : > { %6309 = sst [smem:[#allocation56_spill]] %s6308_s18  ;;  %s4991_s1 = smov [#allocation18]  }
  0x34   : > { %s6310_s29 = scalar_select %p5210_p5, 1, 0 }
  0x35   : > { %s5216_s20 = sshll.u32 %s4991_s1, 4  ;;  %s6311_s3 = sld [smem:[#allocation64_spill]]  ;;  %s548_s20 = int_to_ptr.vmem [resolvable:$true] %s5216_s20 }
  0x36   : > { %p5226_p7 = pneg %p5210_p5 }
  0x3b   : > { %s4306_s2 = scalar_lea.hbm %s6311_s3, 32 }
  0x3c   : > { %p4307_p6 = scmp.ne.s32.totalorder %s6311_s3, %s4306_s2  ;;  %p4313_p10 = scmp.lt.u32.totalorder %s4306_s2, %s6311_s3 }
  0x3e   : > { %p4309_p8 = pnand %p5226_p7, %p4307_p6 }
  0x40   : > { %p4310_p9 = pneg %p4309_p8 }
  0x42   : > { %p4315_p11 = pnand %p4313_p10, %p4310_p9 }
  0x44   : > { %4318 = shalt.err (!%p4315_p11)
}
  0x45   : > { %s4319_s17 = scalar_lea.vmem %s499_s22, 32  ;;  %p4327_p2 = scmp.lt.s32.totalorder %s499_s22, %s499_s22 }
  0x46   : > { %p4320_p12 = scmp.ne.s32.totalorder %s499_s22, %s4319_s17  ;;  %p4328_p4 = scmp.lt.s32.totalorder %s4319_s17, %s4319_s17 }
  0x48   : > { %p4322_p13 = pnand %p4320_p12, %p5226_p7  ;;  %p4329_p1 = por %p4328_p4, %p4327_p2 }
  0x4a   : > { %p4323_p0 = pneg %p4322_p13 }
  0x4c   : > { %p4330_p3 = pnand %p4329_p1, %p4323_p0 }
  0x4e   : > { %4333 = shalt.err (!%p4330_p3)
}
  0x4f   : > { %3933 = dma.hbm_to_vmem [thread:$0]  (!%p5210_p5), %s6311_s3, 32, %s499_s22, [#allocation13]  }
  0x50   : > { %s6313_s5 = sld [smem:[#allocation66_spill]] }
  0x56   : > { %s4334_s2 = scalar_lea.hbm %s6313_s5, 3072 }
  0x57   : > { %p4335_p6 = scmp.ne.s32.totalorder %s6313_s5, %s4334_s2  ;;  %p4341_p1 = scmp.lt.u32.totalorder %s4334_s2, %s6313_s5 }
  0x59   : > { %p4337_p8 = pnand %p4335_p6, %p5226_p7 }
  0x5b   : > { %p4338_p9 = pneg %p4337_p8 }
  0x5d   : > { %p4343_p3 = pnand %p4341_p1, %p4338_p9 }
  0x5f   : > { %4346 = shalt.err (!%p4343_p3)
}
  0x60   : > { %s4347_s22 = scalar_lea.vmem %s5214_s28, 3072  ;;  %p4355_p13 = scmp.lt.s32.totalorder %s5214_s28, %s5214_s28 }
  0x61   : > { %p4348_p10 = scmp.ne.s32.totalorder %s5214_s28, %s4347_s22  ;;  %p4356_p0 = scmp.lt.s32.totalorder %s4347_s22, %s4347_s22 }
  0x63   : > { %p4350_p11 = pnand %p4348_p10, %p5226_p7  ;;  %p4357_p2 = por %p4356_p0, %p4355_p13 }
  0x65   : > { %p4351_p12 = pneg %p4350_p11 }
  0x67   : > { %p4358_p4 = pnand %p4357_p2, %p4351_p12 }
  0x69   : > { %4361 = shalt.err (!%p4358_p4)
}
  0x6a   : > { %s4992_s12 = smov 192   ;;  %s4993_s10 = smov 12  }
  0x6b   : > { %3939 = dma.hbm_to_vmem [thread:$0]  (!%p5210_p5), %s6313_s5, 3072, %s5214_s28, [#allocation16], %s4992_s12, %s4992_s12, %s4993_s10  }
  0x6c   : > { %s6314_s7 = sld [smem:[#allocation68_spill]] }
  0x72   : > { %s4362_s2 = scalar_lea.hbm %s6314_s7, 4096 }
  0x73   : > { %p4363_p6 = scmp.ne.s32.totalorder %s6314_s7, %s4362_s2  ;;  %p4369_p1 = scmp.lt.u32.totalorder %s4362_s2, %s6314_s7 }
  0x75   : > { %p4365_p8 = pnand %p4363_p6, %p5226_p7 }
  0x77   : > { %p4366_p9 = pneg %p4365_p8 }
  0x79   : > { %p4371_p3 = pnand %p4369_p1, %p4366_p9 }
  0x7b   : > { %4374 = shalt.err (!%p4371_p3)
}
  0x7c   : > { %s4375_s16 = scalar_lea.vmem %s548_s20, 4096  ;;  %p4383_p13 = scmp.lt.s32.totalorder %s548_s20, %s548_s20 }
  0x7d   : > { %p4376_p10 = scmp.ne.s32.totalorder %s548_s20, %s4375_s16  ;;  %p4384_p0 = scmp.lt.s32.totalorder %s4375_s16, %s4375_s16 }
  0x7f   : > { %p4378_p11 = pnand %p4376_p10, %p5226_p7  ;;  %p4385_p2 = por %p4384_p0, %p4383_p13 }
  0x81   : > { %p4379_p12 = pneg %p4378_p11 }
  0x83   : > { %p4386_p4 = pnand %p4385_p2, %p4379_p12 }
  0x85   : > { %4389 = shalt.err (!%p4386_p4)
}
  0x86   : > { %s4994_s28 = smov 256   ;;  %s4995_s12 = smov 16  }
  0x87   : > { %3945 = dma.hbm_to_vmem [thread:$0]  (!%p5210_p5), %s6314_s7, 4096, %s548_s20, [#allocation19], %s4994_s28, %s4994_s28, %s4995_s12  }
  0x88   : > { %s4996_s18 = smov [#allocation21]   ;;  %s4997_s21 = smov [#allocation24]  }
  0x89   : > { %s574_s14 = sshll.u32 %s4996_s18, 4  ;;  %s596_s2 = sshll.u32 %s4997_s21, 4  ;;  %s575_s14 = int_to_ptr.vmem [resolvable:$true] %s574_s14  ;;  %s597_s2 = int_to_ptr.vmem [resolvable:$true] %s596_s2 }
  0x8a   : > { %s6315_s9 = sld [smem:[#allocation70_spill]] }
  0x90   : > { %s4390_s22 = scalar_lea.hbm %s6315_s9, 48 }
  0x91   : > { %p4391_p6 = scmp.ne.s32.totalorder %s6315_s9, %s4390_s22  ;;  %p4397_p1 = scmp.lt.u32.totalorder %s4390_s22, %s6315_s9 }
  0x93   : > { %p4393_p8 = pnand %p4391_p6, %p5226_p7 }
  0x95   : > { %p4394_p9 = pneg %p4393_p8 }
  0x97   : > { %p4399_p3 = pnand %p4397_p1, %p4394_p9 }
  0x99   : > { %4402 = shalt.err (!%p4399_p3)
}
  0x9a   : > { %s4403_s20 = scalar_lea.vmem %s575_s14, 48  ;;  %s4410_s28 = scalar_lea.vmem %s575_s14, 64 }
  0x9b   : > { %p4404_p10 = scmp.ne.s32.totalorder %s575_s14, %s4403_s20  ;;  %p4411_p13 = scmp.lt.s32.totalorder %s575_s14, %s575_s14 }
  0x9c   : > { %p4412_p0 = scmp.lt.s32.totalorder %s4410_s28, %s4403_s20 }
  0x9d   : > { %p4406_p11 = pnand %p4404_p10, %p5226_p7 }
  0x9e   : > { %p4413_p2 = por %p4412_p0, %p4411_p13 }
  0x9f   : > { %p4407_p12 = pneg %p4406_p11 }
  0xa1   : > { %p4414_p4 = pnand %p4413_p2, %p4407_p12 }
  0xa3   : > { %4417 = shalt.err (!%p4414_p4)
}
  0xa4   : > { %3951 = dma.hbm_to_vmem [thread:$0]  (!%p5210_p5), %s6315_s9, 48, %s575_s14, [#allocation22]  }
  0xa5   : > { %s6316_s11 = sld [smem:[#allocation72_spill]] }
  0xab   : > { %s4418_s3 = scalar_lea.hbm %s6316_s11, 64 }
  0xac   : > { %p4419_p6 = scmp.ne.s32.totalorder %s6316_s11, %s4418_s3  ;;  %p4425_p1 = scmp.lt.u32.totalorder %s4418_s3, %s6316_s11 }
  0xae   : > { %p4421_p8 = pnand %p4419_p6, %p5226_p7 }
  0xb0   : > { %p4422_p9 = pneg %p4421_p8 }
  0xb2   : > { %p4427_p3 = pnand %p4425_p1, %p4422_p9 }
  0xb4   : > { %4430 = shalt.err (!%p4427_p3)
}
  0xb5   : > { %s4431_s17 = scalar_lea.vmem %s597_s2, 64  ;;  %p4439_p13 = scmp.lt.s32.totalorder %s597_s2, %s597_s2 }
  0xb6   : > { %p4432_p10 = scmp.ne.s32.totalorder %s597_s2, %s4431_s17  ;;  %p4440_p0 = scmp.lt.s32.totalorder %s4431_s17, %s4431_s17 }
  0xb8   : > { %p4434_p11 = pnand %p4432_p10, %p5226_p7  ;;  %p4441_p2 = por %p4440_p0, %p4439_p13 }
  0xba   : > { %p4435_p12 = pneg %p4434_p11 }
  0xbc   : > { %p4442_p4 = pnand %p4441_p2, %p4435_p12 }
  0xbe   : > { %4445 = shalt.err (!%p4442_p4)
}
  0xbf   : > { %3957 = dma.hbm_to_vmem [thread:$0]  (!%p5210_p5), %s6316_s11, 64, %s597_s2, [#allocation25]  }
  0xc0   : > { %s4998_s16 = smov [#allocation27]   ;;  %s6317_s13 = sld [smem:[#allocation74_spill]] }
  0xc1   : > { %s618_s20 = sshll.u32 %s4998_s16, 4  ;;  %s619_s20 = int_to_ptr.vmem [resolvable:$true] %s618_s20 }
  0xc6   : > { %s4446_s12 = scalar_lea.hbm %s6317_s13, 16 }
  0xc7   : > { %p4447_p6 = scmp.ne.s32.totalorder %s6317_s13, %s4446_s12  ;;  %p4453_p1 = scmp.lt.u32.totalorder %s4446_s12, %s6317_s13 }
  0xc9   : > { %p4449_p8 = pnand %p4447_p6, %p5226_p7 }
  0xcb   : > { %p4450_p9 = pneg %p4449_p8 }
  0xcd   : > { %p4455_p3 = pnand %p4453_p1, %p4450_p9 }
  0xcf   : > { %4458 = shalt.err (!%p4455_p3)
}
  0xd0   : > { %s4459_s2 = scalar_lea.vmem %s619_s20, 16  ;;  %s4466_s18 = scalar_lea.vmem %s619_s20, 32 }
  0xd1   : > { %p4460_p10 = scmp.ne.s32.totalorder %s619_s20, %s4459_s2  ;;  %p4467_p13 = scmp.lt.s32.totalorder %s619_s20, %s619_s20 }
  0xd2   : > { %p4468_p0 = scmp.lt.s32.totalorder %s4466_s18, %s4459_s2 }
  0xd3   : > { %p4462_p11 = pnand %p4460_p10, %p5226_p7 }
  0xd4   : > { %p4469_p2 = por %p4468_p0, %p4467_p13 }
  0xd5   : > { %p4463_p12 = pneg %p4462_p11 }
  0xd7   : > { %p4470_p4 = pnand %p4469_p2, %p4463_p12 }
  0xd9   : > { %4473 = shalt.err (!%p4470_p4)
}
  0xda   : > { %3963 = dma.hbm_to_vmem [thread:$0]  (!%p5210_p5), %s6317_s13, 16, %s619_s20, [#allocation28]  }
  0xdb   : > { %s4999_s17 = smov [#allocation30]   ;;  %s6318_s15 = sld [smem:[#allocation76_spill]] }
  0xdc   : > { %s639_s14 = sshll.u32 %s4999_s17, 4  ;;  %s640_s14 = int_to_ptr.vmem [resolvable:$true] %s639_s14 }
  0xe1   : > { %s4474_s28 = scalar_lea.hbm %s6318_s15, 256 }
  0xe2   : > { %p4475_p6 = scmp.ne.s32.totalorder %s6318_s15, %s4474_s28  ;;  %p4481_p1 = scmp.lt.u32.totalorder %s4474_s28, %s6318_s15 }
  0xe4   : > { %p4477_p8 = pnand %p4475_p6, %p5226_p7 }
  0xe6   : > { %p4478_p9 = pneg %p4477_p8 }
  0xe8   : > { %p4483_p3 = pnand %p4481_p1, %p4478_p9 }
  0xea   : > { %4486 = shalt.err (!%p4483_p3)
}
  0xeb   : > { %s4487_s20 = scalar_lea.vmem %s640_s14, 256  ;;  %p4495_p13 = scmp.lt.s32.totalorder %s640_s14, %s640_s14 }
  0xec   : > { %p4488_p10 = scmp.ne.s32.totalorder %s640_s14, %s4487_s20  ;;  %p4496_p0 = scmp.lt.s32.totalorder %s4487_s20, %s4487_s20 }
  0xee   : > { %p4490_p11 = pnand %p4488_p10, %p5226_p7  ;;  %p4497_p2 = por %p4496_p0, %p4495_p13 }
  0xf0   : > { %p4491_p12 = pneg %p4490_p11 }
  0xf2   : > { %p4498_p4 = pnand %p4497_p2, %p4491_p12 }
  0xf4   : > { %4501 = shalt.err (!%p4498_p4)
}
  0xf5   : > { %s6257_s3 = smov 128   ;;  %s6259_s10 = smov 8  }
  0xf6   : > { %3969 = dma.hbm_to_vmem [thread:$0]  (!%p5210_p5), %s6318_s15, 256, %s640_s14, [#allocation31], %s6257_s3, %s6257_s3, %s6259_s10  }
  0xf7   : > { %s3350_s21 = sadd.s32 4294967294, %s4987_s25   ;;  %s54_s1 = sadd.s32 1, %s4979_s23 }
  0xf8   : > { %s57_s17 = sadd.s32 1, %s4983_s24  ;;  %p55_p6 = scmp.ge.s32.totalorder %s54_s1, 2 }
  0xf9   : > { %p6264_p8 = scmp.eq.s32.totalorder %s4987_s25, 0  ;;  %s92_s22 = sadd.s32 1, %s4955_s19 }
  0xfa   : > { %p99_p9 = scmp.ne.s32.totalorder %s4955_s19, %s4951_s0  ;;  %s6414_s1 = smov (%p55_p6, %s54_s1), 0 }
  0xfb   : > { %6319 = sst [smem:[#allocation57_spill]] %s6414_s1  ;;  %s6416_s17 = smov (!%p55_p6, %s57_s17), %s4983_s24 }
  0xfc   : > { %s5371_s16 = ssub.s32 %s4979_s23, %s6414_s1  ;;  %p5375_p1 = por %p99_p9, %p6264_p8 }
  0xfd   : > { %p59_p3 = scmp.ge.s32.totalorder %s6416_s17, 2  ;;  %p105_p10 = scmp.ne.s32.totalorder %s4951_s0, %s4947_s30 }
  0xfe   : > { %p472_p12 = scmp.eq.s32.totalorder %s5197_s26, 3  ;;  %p6322_p13 = scmp.eq.s32.totalorder %s5197_s26, 0 }
  0xff   : > { %s6418_s17 = smov (%p59_p3, %s6416_s17), 0  ;;  %p478_p4 = scmp.eq.s32.totalorder %s3350_s21, 3 }
 0x100   : > { %6321 = sst [smem:[#allocation58_spill]] %s6418_s17  ;;  %p5387_p0 = por %p105_p10, %p6322_p13 }
 0x101   : > { %p5391_p2 = por %p472_p12, %p99_p9  ;;  %s5397_s12 = ssub.s32 %s4983_s24, %s6418_s17 }
 0x102   : > { %s6323_s28 = scalar_select %p5387_p0, 1, 0 }
 0x103   : > { %s6324_s5 = scalar_select %p5391_p2, 1, 0 }
 0x104   : > { %s89_s6 = sor.u32 %s5371_s16, %s5397_s12  ;;  %p5402_p11 = por %p478_p4, %p105_p10 }
 0x105   : > { %p90_p3 = scmp.eq.s32.totalorder %s89_s6, 0  ;;  %p6263_p13 = scmp.lt.s32.totalorder %s4987_s25, 4 }
 0x106   : > { %s6325_s8 = scalar_select %p5402_p11, 1, 0 }
 0x107   : > { %s696_s20 = sand.u32 1, %s4987_s25   ;;  %s698_s18 = sand.u32 1, %s4955_s19  }
 0x108   : > { %6326 = sst [smem:[#allocation59_spill]] %s6325_s8  ;;  %s3371_s3 = sshll.u32 %s698_s18, 3 }
 0x109   : > { %s5409_s2 = scalar_select %p90_p3, %s4955_s19, %s92_s22  }
 0x10a   : > { %s3372_s10 = sshll.u32 %s4983_s24, 1  ;;  %s700_s11 = scalar_lea.vmem [#allocation9], %s3371_s3 }
 0x10b   : > { %6327 = sst [smem:[#allocation60_spill]] %s5409_s2  ;;  %s705_s7 = sadd.s32 %s4979_s23, %s3372_s10 }
 0x10c   : > { %s3373_s9 = sshll.u32 %s705_s7, 7  ;;  %s709_s21 = sshll.u32 %s700_s11, 4  ;;  %s5419_s21 = int_to_ptr.vmem [resolvable:$true] %s709_s21 }
 0x10d   : > { %s6328_s17 = sld [smem:[#allocation62_spill]]  ;;  %p5425_p9 = pnand %p6263_p13, %p5375_p1 }
 0x10e   : > { %s5002_s7 = smov [#allocation14]  }
 0x10f   : > { %s508_s11 = sshll.u32 %s5002_s7, 4  ;;  %p4504_p12 = pneg %p5425_p9  ;;  %s5429_s11 = int_to_ptr.vmem [resolvable:$true] %s508_s11 }
 0x113   : > { %s5417_s1 = scalar_lea.hbm %s6328_s17, %s3373_s9  ;;  %s5431_s9 = scalar_lea.sflag [#allocation10], %s696_s20 }
 0x114   : > { %s4502_s13 = scalar_lea.hbm %s5417_s1, 128  ;;  %s4507_s10 = scalar_lea.hbm %s6328_s17, 512 }
 0x115   : > { %p4503_p10 = scmp.ne.s32.totalorder %s5417_s1, %s4502_s13  ;;  %p4508_p1 = scmp.lt.u32.totalorder %s5417_s1, %s6328_s17 }
 0x116   : > { %p4509_p13 = scmp.lt.u32.totalorder %s4507_s10, %s4502_s13  ;;  %p4511_p6 = scmp.lt.u32.totalorder %s4502_s13, %s5417_s1 }
 0x117   : > { %p4505_p4 = pnand %p4504_p12, %p4503_p10 }
 0x118   : > { %p4510_p8 = por %p4509_p13, %p4508_p1 }
 0x119   : > { %p4506_p3 = pneg %p4505_p4 }
 0x11a   : > { %p4512_p11 = por %p4511_p6, %p4510_p8 }
 0x11c   : > { %p4513_p2 = pnand %p4512_p11, %p4506_p3 }
 0x11e   : > { %4516 = shalt.err (!%p4513_p2)
}
 0x11f   : > { %s4517_s20 = scalar_lea.vmem %s5419_s21, 128  ;;  %s5003_s18 = smov [#allocation9]  }
 0x120   : > { %p4518_p10 = scmp.ne.s32.totalorder %s5419_s21, %s4517_s20  ;;  %s4522_s7 = sshll.u32 %s5003_s18, 4  ;;  %s4523_s7 = int_to_ptr.vmem [resolvable:$false] %s4522_s7 }
 0x121   : > { %s4524_s15 = scalar_lea.vmem %s4523_s7, 256  ;;  %p4525_p5 = scmp.lt.s32.totalorder %s5419_s21, %s4523_s7 }
 0x122   : > { %p4520_p4 = pnand %p4518_p10, %p4504_p12  ;;  %p4526_p13 = scmp.lt.s32.totalorder %s4524_s15, %s4517_s20 }
 0x124   : > { %p4521_p0 = pneg %p4520_p4  ;;  %p4527_p1 = por %p4526_p13, %p4525_p5 }
 0x126   : > { %p4528_p8 = pnand %p4527_p1, %p4521_p0 }
 0x128   : > { %4531 = shalt.err (!%p4528_p8)
}
 0x129   : > { %3982 = dma.hbm_to_vmem [thread:$0]  (!%p5425_p9), %s5417_s1, 128, %s5419_s21, %s5431_s9  }
 0x12a   : > { %s6330_s4 = sld [smem:[#allocation65_spill]] }
 0x130   : > { %s4532_s10 = scalar_lea.hbm %s6330_s4, 2048 }
 0x131   : > { %p4533_p11 = scmp.ne.s32.totalorder %s6330_s4, %s4532_s10  ;;  %p4539_p0 = scmp.lt.u32.totalorder %s4532_s10, %s6330_s4 }
 0x133   : > { %p4535_p2 = pnand %p4533_p11, %p5226_p7 }
 0x135   : > { %p4536_p5 = pneg %p4535_p2 }
 0x137   : > { %p4541_p6 = pnand %p4539_p0, %p4536_p5 }
 0x139   : > { %4544 = shalt.err (!%p4541_p6)
}
 0x13a   : > { %s4545_s1 = scalar_lea.vmem %s5429_s11, 2048  ;;  %p4553_p10 = scmp.lt.s32.totalorder %s5429_s11, %s5429_s11 }
 0x13b   : > { %p4546_p9 = scmp.ne.s32.totalorder %s5429_s11, %s4545_s1  ;;  %p4554_p4 = scmp.lt.s32.totalorder %s4545_s1, %s4545_s1 }
 0x13d   : > { %p4548_p12 = pnand %p4546_p9, %p5226_p7  ;;  %p4555_p13 = por %p4554_p4, %p4553_p10 }
 0x13f   : > { %p4549_p3 = pneg %p4548_p12 }
 0x141   : > { %p4556_p1 = pnand %p4555_p13, %p4549_p3 }
 0x143   : > { %4559 = shalt.err (!%p4556_p1)
}
 0x144   : > { %p6331_p8 = scmp.ne.s32.totalorder %s6310_s29, 0  ;;  %s6332_s21 = smov 8  }
 0x145   : > { %s6333_s22 = smov 128   ;;  %s5004_s13 = smov [#allocation17]  }
 0x146   : > { %3936 = dma.hbm_to_vmem [thread:$0]  (!%p6331_p8), %s6330_s4, 2048, %s5429_s11, [#allocation13], %s6333_s22, %s6333_s22, %s6332_s21  }
 0x147   : > { %s534_s3 = sshll.u32 %s5004_s13, 4  ;;  %s6334_s6 = sld [smem:[#allocation67_spill]]  ;;  %s535_s3 = int_to_ptr.vmem [resolvable:$true] %s534_s3 }
 0x14d   : > { %s4560_s20 = scalar_lea.hbm %s6334_s6, 1024 }
 0x14e   : > { %p4561_p11 = scmp.ne.s32.totalorder %s6334_s6, %s4560_s20  ;;  %p4567_p0 = scmp.lt.u32.totalorder %s4560_s20, %s6334_s6 }
 0x150   : > { %p4563_p2 = pnand %p4561_p11, %p5226_p7 }
 0x152   : > { %p4564_p5 = pneg %p4563_p2 }
 0x154   : > { %p4569_p6 = pnand %p4567_p0, %p4564_p5 }
 0x156   : > { %4572 = shalt.err (!%p4569_p6)
}
 0x157   : > { %s4573_s11 = scalar_lea.vmem %s535_s3, 1024  ;;  %p4581_p10 = scmp.lt.s32.totalorder %s535_s3, %s535_s3 }
 0x158   : > { %p4574_p9 = scmp.ne.s32.totalorder %s535_s3, %s4573_s11  ;;  %p4582_p4 = scmp.lt.s32.totalorder %s4573_s11, %s4573_s11 }
 0x15a   : > { %p4576_p12 = pnand %p4574_p9, %p5226_p7  ;;  %p4583_p13 = por %p4582_p4, %p4581_p10 }
 0x15c   : > { %p4577_p3 = pneg %p4576_p12 }
 0x15e   : > { %p4584_p1 = pnand %p4583_p13, %p4577_p3 }
 0x160   : > { %4587 = shalt.err (!%p4584_p1)
}
 0x161   : > { %s5005_s7 = smov 64   ;;  %s5006_s15 = smov 4  }
 0x162   : > { %3942 = dma.hbm_to_vmem [thread:$0]  (!%p6331_p8), %s6334_s6, 1024, %s535_s3, [#allocation16], %s5005_s7, %s5005_s7, %s5006_s15  }
 0x163   : > { %s5007_s13 = smov [#allocation20]   ;;  %s5008_s14 = smov [#allocation23]  }
 0x164   : > { %s560_s10 = sshll.u32 %s5007_s13, 4  ;;  %s585_s20 = sshll.u32 %s5008_s14, 4  ;;  %s561_s10 = int_to_ptr.vmem [resolvable:$true] %s560_s10  ;;  %s5503_s20 = int_to_ptr.vmem [resolvable:$true] %s585_s20 }
 0x165   : > { %s6335_s11 = sld [smem:[#allocation69_spill]] }
 0x16b   : > { %s4588_s4 = scalar_lea.hbm %s6335_s11, 2048 }
 0x16c   : > { %p4589_p11 = scmp.ne.s32.totalorder %s6335_s11, %s4588_s4  ;;  %p4595_p0 = scmp.lt.u32.totalorder %s4588_s4, %s6335_s11 }
 0x16e   : > { %p4591_p2 = pnand %p4589_p11, %p5226_p7 }
 0x170   : > { %p4592_p5 = pneg %p4591_p2 }
 0x172   : > { %p4597_p6 = pnand %p4595_p0, %p4592_p5 }
 0x174   : > { %4600 = shalt.err (!%p4597_p6)
}
 0x175   : > { %s4601_s2 = scalar_lea.vmem %s561_s10, 2048  ;;  %p4609_p10 = scmp.lt.s32.totalorder %s561_s10, %s561_s10 }
 0x176   : > { %p4602_p9 = scmp.ne.s32.totalorder %s561_s10, %s4601_s2  ;;  %p4610_p4 = scmp.lt.s32.totalorder %s4601_s2, %s4601_s2 }
 0x178   : > { %p4604_p12 = pnand %p4602_p9, %p5226_p7  ;;  %p4611_p13 = por %p4610_p4, %p4609_p10 }
 0x17a   : > { %p4605_p3 = pneg %p4604_p12 }
 0x17c   : > { %p4612_p1 = pnand %p4611_p13, %p4605_p3 }
 0x17e   : > { %4615 = shalt.err (!%p4612_p1)
}
 0x17f   : > { %3948 = dma.hbm_to_vmem [thread:$0]  (!%p6331_p8), %s6335_s11, 2048, %s561_s10, [#allocation19], %s5005_s7, %s5005_s7, %s5006_s15  }
 0x180   : > { %s6336_s14 = sld [smem:[#allocation71_spill]] }
 0x186   : > { %s4616_s18 = scalar_lea.hbm %s6336_s14, 48 }
 0x187   : > { %p4617_p11 = scmp.ne.s32.totalorder %s6336_s14, %s4616_s18  ;;  %p4623_p0 = scmp.lt.u32.totalorder %s4616_s18, %s6336_s14 }
 0x189   : > { %p4619_p2 = pnand %p4617_p11, %p5226_p7 }
 0x18b   : > { %p4620_p5 = pneg %p4619_p2 }
 0x18d   : > { %p4625_p6 = pnand %p4623_p0, %p4620_p5 }
 0x18f   : > { %4628 = shalt.err (!%p4625_p6)
}
 0x190   : > { %s4629_s7 = scalar_lea.vmem %s5503_s20, 48  ;;  %s4636_s15 = scalar_lea.vmem %s5503_s20, 64 }
 0x191   : > { %p4630_p9 = scmp.ne.s32.totalorder %s5503_s20, %s4629_s7  ;;  %p4637_p10 = scmp.lt.s32.totalorder %s5503_s20, %s5503_s20 }
 0x192   : > { %p4638_p4 = scmp.lt.s32.totalorder %s4636_s15, %s4629_s7 }
 0x193   : > { %p4632_p12 = pnand %p4630_p9, %p5226_p7 }
 0x194   : > { %p4639_p13 = por %p4638_p4, %p4637_p10 }
 0x195   : > { %p4633_p3 = pneg %p4632_p12 }
 0x197   : > { %p4640_p1 = pnand %p4639_p13, %p4633_p3 }
 0x199   : > { %4643 = shalt.err (!%p4640_p1)
}
 0x19a   : > { %3954 = dma.hbm_to_vmem [thread:$0]  (!%p6331_p8), %s6336_s14, 48, %s5503_s20, [#allocation22]  }
 0x19b   : > { %s5009_s8 = smov [#allocation26]   ;;  %s5010_s13 = smov [#allocation29]  }
 0x19c   : > { %s607_s4 = sshll.u32 %s5009_s8, 4  ;;  %s629_s18 = sshll.u32 %s5010_s13, 4  ;;  %s608_s4 = int_to_ptr.vmem [resolvable:$true] %s607_s4  ;;  %s5547_s18 = int_to_ptr.vmem [resolvable:$true] %s629_s18 }
 0x19d   : > { %s6337_s3 = sld [smem:[#allocation73_spill]] }
 0x1a3   : > { %s4644_s2 = scalar_lea.hbm %s6337_s3, 64 }
 0x1a4   : > { %p4645_p11 = scmp.ne.s32.totalorder %s6337_s3, %s4644_s2  ;;  %p4651_p0 = scmp.lt.u32.totalorder %s4644_s2, %s6337_s3 }
 0x1a6   : > { %p4647_p2 = pnand %p4645_p11, %p5226_p7 }
 0x1a8   : > { %p4648_p5 = pneg %p4647_p2 }
 0x1aa   : > { %p4653_p6 = pnand %p4651_p0, %p4648_p5 }
 0x1ac   : > { %4656 = shalt.err (!%p4653_p6)
}
 0x1ad   : > { %s4657_s19 = scalar_lea.vmem %s608_s4, 64  ;;  %p4665_p10 = scmp.lt.s32.totalorder %s608_s4, %s608_s4 }
 0x1ae   : > { %p4658_p9 = scmp.ne.s32.totalorder %s608_s4, %s4657_s19  ;;  %p4666_p4 = scmp.lt.s32.totalorder %s4657_s19, %s4657_s19 }
 0x1b0   : > { %p4660_p12 = pnand %p4658_p9, %p5226_p7  ;;  %p4667_p13 = por %p4666_p4, %p4665_p10 }
 0x1b2   : > { %p4661_p3 = pneg %p4660_p12 }
 0x1b4   : > { %p4668_p1 = pnand %p4667_p13, %p4661_p3 }
 0x1b6   : > { %4671 = shalt.err (!%p4668_p1)
}
 0x1b7   : > { %3960 = dma.hbm_to_vmem [thread:$0]  (!%p6331_p8), %s6337_s3, 64, %s608_s4, [#allocation25]  }
 0x1b8   : > { %s6338_s2 = sld [smem:[#allocation75_spill]] }
 0x1be   : > { %s6339_s7 = smov %s6338_s2  ;;  %s4672_s15 = scalar_lea.hbm %s6338_s2, 16 }
 0x1bf   : > { %p4673_p11 = scmp.ne.s32.totalorder %s6339_s7, %s4672_s15  ;;  %p4679_p0 = scmp.lt.u32.totalorder %s4672_s15, %s6339_s7 }
 0x1c1   : > { %p4675_p2 = pnand %p4673_p11, %p5226_p7 }
 0x1c3   : > { %p4676_p5 = pneg %p4675_p2 }
 0x1c5   : > { %p4681_p6 = pnand %p4679_p0, %p4676_p5 }
 0x1c7   : > { %4684 = shalt.err (!%p4681_p6)
}
 0x1c8   : > { %s4685_s4 = scalar_lea.vmem %s5547_s18, 16  ;;  %s4692_s8 = scalar_lea.vmem %s5547_s18, 32 }
 0x1c9   : > { %p4686_p9 = scmp.ne.s32.totalorder %s5547_s18, %s4685_s4  ;;  %p4693_p10 = scmp.lt.s32.totalorder %s5547_s18, %s5547_s18 }
 0x1ca   : > { %p4694_p4 = scmp.lt.s32.totalorder %s4692_s8, %s4685_s4 }
 0x1cb   : > { %p4688_p12 = pnand %p4686_p9, %p5226_p7 }
 0x1cc   : > { %p4695_p13 = por %p4694_p4, %p4693_p10 }
 0x1cd   : > { %p4689_p3 = pneg %p4688_p12 }
 0x1cf   : > { %p4696_p1 = pnand %p4695_p13, %p4689_p3 }
 0x1d1   : > { %4699 = shalt.err (!%p4696_p1)
}
 0x1d2   : > { %3966 = dma.hbm_to_vmem [thread:$0]  (!%p6331_p8), %s6339_s7, 16, %s5547_s18, [#allocation28]  }
 0x1d3   : > { %s5011_s1 = smov [#allocation32]   ;;  %s6340_s10 = sld [smem:[#allocation77_spill]] }
 0x1d4   : > { %s652_s17 = sshll.u32 %s5011_s1, 4  ;;  %s653_s17 = int_to_ptr.vmem [resolvable:$true] %s652_s17 }
 0x1d9   : > { %s4700_s20 = scalar_lea.hbm %s6340_s10, 256 }
 0x1da   : > { %p4701_p11 = scmp.ne.s32.totalorder %s6340_s10, %s4700_s20  ;;  %p4707_p0 = scmp.lt.u32.totalorder %s4700_s20, %s6340_s10 }
 0x1dc   : > { %p4703_p2 = pnand %p4701_p11, %p5226_p7 }
 0x1de   : > { %p4704_p5 = pneg %p4703_p2 }
 0x1e0   : > { %p4709_p6 = pnand %p4707_p0, %p4704_p5 }
 0x1e2   : > { %4712 = shalt.err (!%p4709_p6)
}
 0x1e3   : > { %s4713_s18 = scalar_lea.vmem %s653_s17, 256  ;;  %p4721_p10 = scmp.lt.s32.totalorder %s653_s17, %s653_s17 }
 0x1e4   : > { %p4714_p9 = scmp.ne.s32.totalorder %s653_s17, %s4713_s18  ;;  %p4722_p4 = scmp.lt.s32.totalorder %s4713_s18, %s4713_s18 }
 0x1e6   : > { %p4716_p12 = pnand %p4714_p9, %p5226_p7  ;;  %p4723_p13 = por %p4722_p4, %p4721_p10 }
 0x1e8   : > { %p4717_p3 = pneg %p4716_p12 }
 0x1ea   : > { %p4724_p1 = pnand %p4723_p13, %p4717_p3 }
 0x1ec   : > { %4727 = shalt.err (!%p4724_p1)
}
 0x1ed   : > { %3972 = dma.hbm_to_vmem [thread:$0]  (!%p6331_p8), %s6340_s10, 256, %s653_s17, [#allocation31], %s6333_s22, %s6333_s22, %s6332_s21  }
 0x1ee   : > { %s6341_s2 = sld [smem:[#allocation78_spill]] }
 0x1f4   : > { %s6342_s15 = smov %s6341_s2  ;;  %s4728_s20 = scalar_lea.hbm %s6341_s2, 16 }
 0x1f5   : > { %p4729_p11 = scmp.ne.s32.totalorder %s6342_s15, %s4728_s20  ;;  %p4735_p0 = scmp.lt.u32.totalorder %s4728_s20, %s6342_s15 }
 0x1f7   : > { %p4731_p2 = pnand %p4729_p11, %p5226_p7 }
 0x1f9   : > { %p4732_p5 = pneg %p4731_p2 }
 0x1fb   : > { %p4737_p6 = pnand %p4735_p0, %p4732_p5 }
 0x1fd   : > { %4740 = shalt.err (!%p4737_p6)
}
 0x1fe   : > { %s5012_s3 = smov [#allocation33]   ;;  %s6343_s13 = sld [smem:[#allocation53_spill]] }
 0x1ff   : > { %s6344_s1 = sld [smem:[#allocation52_spill]]  ;;  %s6345_s27 = sld [smem:[#allocation51_spill]] }
 0x200   : > { %3975 = dma.hbm_to_smem (!%p6331_p8), %s6342_s15, 16, %s5012_s3, [#allocation8]  }
 0x201   : > { %p6346_p9 = scmp.eq.s32.totalorder %s5397_s12, 0  ;;  %p6347_p12 = scmp.eq.s32.totalorder %s4987_s25, 0 }
 0x202   : > { %s3506_s19 = sshll.u32 %s4983_s24, 8  ;;  %p6348_p4 = scmp.eq.s32.totalorder %s5197_s26, 0 }
 0x203   : > { %s6350_s6 = sld [smem:[#allocation61_spill]]  ;;  %p6351_p8 = scmp.lt.s32.totalorder %s4987_s25, 4 }
 0x204   : > { %s64_s2 = sadd.s32 1, %s6343_s13  ;;  %s675_s20 = sand.u32 1, %s6343_s13  }
 0x205   : > { %p71_p7 = scmp.ne.s32.totalorder %s6343_s13, %s6344_s1  ;;  %p77_p10 = scmp.ne.s32.totalorder %s6344_s1, %s6345_s27 }
 0x206   : > { %s5634_s29 = scalar_select %p6346_p9, %s6343_s13, %s64_s2  }
 0x207   : > { %p73_p3 = por %p6347_p12, %p71_p7  ;;  %p5644_p13 = por %p6348_p4, %p77_p10 }
 0x208   : > { %s3368_s8 = sshll.u32 %s675_s20, 4  ;;  %s5661_s27 = scalar_lea.sflag [#allocation6], %s675_s20 }
 0x209   : > { %s6349_s4 = scalar_select %p5644_p13, 1, 0 }
 0x20a   : > { %s5651_s3 = scalar_lea.hbm %s6350_s6, %s3506_s19  ;;  %p5655_p1 = pnand %p6351_p8, %p73_p3 }
 0x20b   : > { %s679_s13 = scalar_lea.vmem [#allocation5], %s3368_s8  ;;  %s4741_s2 = scalar_lea.hbm %s5651_s3, 256 }
 0x20c   : > { %s686_s1 = sshll.u32 %s679_s13, 4  ;;  %p4742_p11 = scmp.ne.s32.totalorder %s5651_s3, %s4741_s2  ;;  %s5659_s1 = int_to_ptr.vmem [resolvable:$true] %s686_s1 }
 0x20d   : > { %p4743_p2 = pneg %p5655_p1  ;;  %s4746_s17 = scalar_lea.hbm %s6350_s6, 512 }
 0x20e   : > { %p4747_p6 = scmp.lt.u32.totalorder %s5651_s3, %s6350_s6  ;;  %p4748_p7 = scmp.lt.u32.totalorder %s4746_s17, %s4741_s2 }
 0x20f   : > { %p4744_p5 = pnand %p4743_p2, %p4742_p11  ;;  %p4750_p12 = scmp.lt.u32.totalorder %s4741_s2, %s5651_s3 }
 0x210   : > { %p4749_p9 = por %p4748_p7, %p4747_p6 }
 0x211   : > { %p4745_p0 = pneg %p4744_p5 }
 0x212   : > { %p4751_p3 = por %p4750_p12, %p4749_p9 }
 0x214   : > { %p4752_p10 = pnand %p4751_p3, %p4745_p0 }
 0x216   : > { %4755 = shalt.err (!%p4752_p10)
}
 0x217   : > { %s4756_s20 = scalar_lea.vmem %s5659_s1, 256  ;;  %s5013_s8 = smov [#allocation5]  }
 0x218   : > { %p4757_p4 = scmp.ne.s32.totalorder %s5659_s1, %s4756_s20  ;;  %s4761_s13 = sshll.u32 %s5013_s8, 4  ;;  %s4762_s13 = int_to_ptr.vmem [resolvable:$false] %s4761_s13 }
 0x219   : > { %s4763_s7 = scalar_lea.vmem %s4762_s13, 512  ;;  %p4764_p5 = scmp.lt.s32.totalorder %s5659_s1, %s4762_s13 }
 0x21a   : > { %p4759_p8 = pnand %p4757_p4, %p4743_p2  ;;  %p4765_p6 = scmp.lt.s32.totalorder %s4763_s7, %s4756_s20 }
 0x21c   : > { %p4760_p11 = pneg %p4759_p8  ;;  %p4766_p7 = por %p4765_p6, %p4764_p5 }
 0x21e   : > { %p4767_p9 = pnand %p4766_p7, %p4760_p11 }
 0x220   : > { %4770 = shalt.err (!%p4767_p9)
}
 0x221   : > { %s6353_s10 = sld [smem:[#allocation49_spill]]  ;;  %s6354_s2 = sld [smem:[#allocation48_spill]] }
 0x222   : > { %s6355_s19 = sld [smem:[#allocation47_spill]]  ;;  %p6356_p2 = scmp.eq.s32.totalorder %s5371_s16, 0 }
 0x223   : > { %3979 = dma.hbm_to_vmem [thread:$0]  (!%p5655_p1), %s5651_s3, 256, %s5659_s1, %s5661_s27, %s6333_s22, %s6333_s22, %s6332_s21  }
 0x224   : > { %s3375_s20 = sshll.u32 %s4979_s23, 7  ;;  %p6357_p3 = scmp.eq.s32.totalorder %s4987_s25, 0 }
 0x225   : > { %p6358_p4 = scmp.eq.s32.totalorder %s5197_s26, 0  ;;  %s6360_s11 = sld [smem:[#allocation63_spill]] }
 0x226   : > { %p6361_p1 = scmp.lt.s32.totalorder %s4987_s25, 4 }
 0x227   : > { %s118_s12 = sadd.s32 1, %s6353_s10  ;;  %p125_p0 = scmp.ne.s32.totalorder %s6353_s10, %s6354_s2 }
 0x228   : > { %s5696_s18 = scalar_select %p6356_p2, %s6353_s10, %s118_s12  }
 0x229   : > { %p131_p12 = scmp.ne.s32.totalorder %s6354_s2, %s6355_s19  ;;  %s718_s17 = sand.u32 1, %s6353_s10  }
 0x22a   : > { %p127_p10 = por %p125_p0, %p6357_p3  ;;  %s3374_s13 = sshll.u32 %s718_s17, 3 }
 0x22b   : > { %p5708_p8 = por %p131_p12, %p6358_p4  ;;  %s5715_s21 = scalar_lea.hbm %s6360_s11, %s3375_s20 }
 0x22c   : > { %p5719_p11 = pnand %p6361_p1, %p127_p10  ;;  %s720_s22 = scalar_lea.vmem [#allocation11], %s3374_s13 }
 0x22d   : > { %s6359_s8 = scalar_select %p5708_p8, 1, 0 }
 0x22e   : > { %s727_s3 = sshll.u32 %s720_s22, 4  ;;  %s4771_s1 = scalar_lea.hbm %s5715_s21, 128  ;;  %s728_s3 = int_to_ptr.vmem [resolvable:$true] %s727_s3 }
 0x22f   : > { %p4772_p5 = scmp.ne.s32.totalorder %s5715_s21, %s4771_s1  ;;  %p4773_p6 = pneg %p5719_p11 }
 0x230   : > { %s4776_s10 = scalar_lea.hbm %s6360_s11, 256  ;;  %p4777_p2 = scmp.lt.u32.totalorder %s5715_s21, %s6360_s11 }
 0x231   : > { %p4774_p7 = pnand %p4773_p6, %p4772_p5  ;;  %p4778_p0 = scmp.lt.u32.totalorder %s4776_s10, %s4771_s1 }
 0x232   : > { %p4780_p3 = scmp.lt.u32.totalorder %s4771_s1, %s5715_s21 }
 0x233   : > { %p4775_p9 = pneg %p4774_p7  ;;  %p4779_p12 = por %p4778_p0, %p4777_p2 }
 0x235   : > { %p4781_p10 = por %p4780_p3, %p4779_p12 }
 0x237   : > { %p4782_p4 = pnand %p4781_p10, %p4775_p9 }
 0x239   : > { %4785 = shalt.err (!%p4782_p4)
}
 0x23a   : > { %s4786_s12 = scalar_lea.vmem %s728_s3, 128  ;;  %s5014_s17 = smov [#allocation11]  }
 0x23b   : > { %p4787_p1 = scmp.ne.s32.totalorder %s728_s3, %s4786_s12  ;;  %s4791_s20 = sshll.u32 %s5014_s17, 4  ;;  %s4792_s20 = int_to_ptr.vmem [resolvable:$false] %s4791_s20 }
 0x23c   : > { %s4793_s13 = scalar_lea.vmem %s4792_s20, 256  ;;  %p4794_p8 = scmp.lt.s32.totalorder %s728_s3, %s4792_s20 }
 0x23d   : > { %p4789_p5 = pnand %p4787_p1, %p4773_p6  ;;  %p4795_p13 = scmp.lt.s32.totalorder %s4793_s13, %s4786_s12 }
 0x23f   : > { %p4790_p7 = pneg %p4789_p5  ;;  %p4796_p0 = por %p4795_p13, %p4794_p8 }
 0x241   : > { %p4797_p2 = pnand %p4796_p0, %p4790_p7 }
 0x243   : > { %4800 = shalt.err (!%p4797_p2)
}
 0x244   : > { %3985 = dma.hbm_to_vmem [thread:$0]  (!%p5719_p11), %s5715_s21, 128, %s728_s3, %s5431_s9  }
 0x245   : > { %s6363_s7 = sld [smem:[#allocation56_spill]] }
 0x24b   : > { %p6364_p9 = scmp.ne.s32.totalorder %s6363_s7, 0 }
 0x24c   : > { %s6365_s22 = sld [smem:[#allocation52_spill]] (!%p6364_p9)  ;;  %p6366_p6 = scmp.ne.s32.totalorder (!%p6364_p9), %s6349_s4, 0 }
 0x24d   : > { %736 = sbr.rel (%p6364_p9) target bundleno = 3559 (0xde7), region = 92 }
 0x252   : > { %s738_s1 = sand.u32 (!%p6364_p9), 1, %s6365_s22  }
 0x253   : > { %s5748_s6 = sshll.u32 (!%p6364_p9), %s738_s1, 4  ;;  %s739_s27 = scalar_lea.sflag (!%p6364_p9), [#allocation6], %s738_s1 }
 0x254   : > { %s742_s10 = scalar_lea.vmem [#allocation5], %s5748_s6 }
 0x255   : > { %4886 = dma.done.wait (%p6366_p6), %s739_s27, 256  }
 0x256   : > { %4888 = vsyncadd (%p6366_p6), %s739_s27, 4294967040  ;;  %s747_s9 = sand.u32 1, %s5197_s26   ;;  %s749_s21 = sand.u32 1, %s4951_s0  }
 0x257   : > { %s5759_s16 = sshll.u32 %s749_s21, 3  ;;  %s748_s3 = scalar_lea.sflag [#allocation10], %s747_s9 }
 0x258   : > { %s751_s2 = scalar_lea.vmem [#allocation9], %s5759_s16  ;;  %p6367_p13 = scmp.ne.s32.totalorder %s6323_s28, 0 }
 0x25a   : > { %4890 = dma.done.wait (%p6367_p13), %s748_s3, 128  }
 0x25b   : > { %4892 = vsyncadd (%p6367_p13), %s748_s3, 4294967168  ;;  %s6368_s19 = sld [smem:[#allocation48_spill]]  ;;  %p6369_p8 = scmp.ne.s32.totalorder %s6359_s8, 0 }
 0x261   : > { %s758_s4 = sand.u32 1, %s6368_s19  }
 0x262   : > { %s5767_s12 = sshll.u32 %s758_s4, 3 }
 0x263   : > { %s760_s17 = scalar_lea.vmem [#allocation11], %s5767_s12 }
 0x264   : > { %4894 = dma.done.wait (%p6369_p8), %s748_s3, 128  }
 0x265   : > { %4896 = vsyncadd (%p6369_p8), %s748_s3, 4294967168  ;;  %p6370_p11 = scmp.eq.s32.totalorder %s5197_s26, 0 }
 0x267   : > { %4898 = dma.done.wait (%p6370_p11), [#allocation13], 2080   ;;  %p6371_p12 = pmov %p6370_p11 }
 0x268   : > { %p6372_p3 = pmov %p6370_p11 }
 0x269   : > { %4900 = vsyncadd (%p6371_p12), [#allocation13], 4294965216 }
 0x26a   : > { %4902 = dma.done.wait (%p6372_p3), [#allocation16], 4096   ;;  %p6373_p10 = pmov %p6372_p3 }
 0x26b   : > { %p6374_p4 = pmov %p6372_p3 }
 0x26c   : > { %4904 = vsyncadd (%p6373_p10), [#allocation16], 4294963200 }
 0x26d   : > { %4906 = dma.done.wait (%p6374_p4), [#allocation19], 6144   ;;  %p6375_p1 = pmov %p6372_p3 }
 0x26f   : > { %4908 = vsyncadd (%p6375_p1), [#allocation19], 4294961152  ;;  %p6376_p5 = pmov %p6375_p1 }
 0x270   : > { %p6377_p7 = pmov %p6375_p1 }
 0x271   : > { %4910 = dma.done.wait (%p6376_p5), [#allocation22], 96  }
 0x272   : > { %4912 = vsyncadd (%p6377_p7), [#allocation22], 4294967200  ;;  %p6378_p0 = pmov %p6375_p1 }
 0x274   : > { %4914 = dma.done.wait (%p6378_p0), [#allocation25], 128   ;;  %p6379_p2 = pmov %p6378_p0 }
 0x275   : > { %p6380_p9 = pmov %p6378_p0 }
 0x276   : > { %4916 = vsyncadd (%p6379_p2), [#allocation25], 4294967168 }
 0x277   : > { %4918 = dma.done.wait (%p6380_p9), [#allocation28], 32   ;;  %p6381_p6 = pmov %p6378_p0 }
 0x278   : > { %p6382_p13 = pmov %p6378_p0 }
 0x279   : > { %4920 = vsyncadd (%p6381_p6), [#allocation28], 4294967264 }
 0x27a   : > { %4922 = dma.done.wait (%p6382_p13), [#allocation31], 512   ;;  %p6383_p8 = pmov %p6378_p0 }
 0x27b   : > { %p6384_p11 = pmov %p6378_p0 }
 0x27c   : > { %4924 = vsyncadd (%p6383_p8), [#allocation31], 4294966784 }
 0x27d   : > { %4926 = dma.done.wait (%p6384_p11), [#allocation8], 16   ;;  %p6385_p12 = pmov %p6378_p0 }
 0x27f   : > { %4928 = vsyncadd (%p6385_p12), [#allocation8], 4294967280 }
 0x280   : > { %825 = sfence }
 0x281   : > { %s883_s28 = scalar_lea.vmem [#allocation34], %s5759_s16  ;;  %s6386_s8 = sld [smem:[#allocation54_spill]] }
 0x287   : > { %p3396_p3 = scmp.ne.s32.totalorder %s6386_s8, 0 }
 0x288   : > { %v5810_v0 = vld [vmem:[%s742_s10] sm:$0xff] (!%p3396_p3)  ;;  %v5814_v1 = vld [vmem:[%s742_s10 + $0x8] sm:$0xff] (!%p3396_p3)  ;;  %v5015_v30 = vmov (!%p3396_p3), 0.0   ;;  %vm5017_vm0 = vmmov (!%p3396_p3), 0   ;;  %vm1301_vm1 = vcmask (!%p3396_p3), 261120   ;;  %s5018_s26 = smov (!%p3396_p3), 96  }
 0x289   : > { %888 = sbr.rel (%p3396_p3) target bundleno = 1569 (0x621), region = 168  ;;  %v913_v2 = vld [vmem:[#allocation14] sm:$0xff] (!%p3396_p3)  ;;  %v892_v3 = vmul.f32 (!%p3396_p3), %v5810_v0, %v5810_v0  ;;  %v914_v4 = vld [vmem:[#allocation14 + $0x8] sm:$0xff] (!%p3396_p3)  ;;  %v915_v5 = vld [vmem:[#allocation14 + $0x10] sm:$0xff] (!%p3396_p3)  ;;  %v893_v11 = vmul.f32 (!%p3396_p3), %v5814_v1, %v5814_v1  ;;  %s5019_s20 = smov (!%p3396_p3), 64   ;;  %vm1471_vm2 = vcmask (!%p3396_p3), 130048  }
 0x28a   : > { %v916_v6 = vld [vmem:[#allocation14 + $0x18] sm:$0xff] (!%p3396_p3)  ;;  %v3772_v7 = vpack.c.bf16 (!%p3396_p3), %v914_v4, %v913_v2  ;;  %v917_v9 = vld [vmem:[#allocation14 + $0x20] sm:$0xff] (!%p3396_p3)  ;;  %v918_v10 = vld [vmem:[#allocation14 + $0x28] sm:$0xff] (!%p3396_p3)  ;;  %v5016_v2 = vmov (!%p3396_p3), 0   ;;  %s5020_s13 = smov (!%p3396_p3), 32   ;;  %s5021_s7 = smov (!%p3396_p3), 112  }
 0x28b   : > { %v3776_v8 = vpack.c.bf16 (!%p3396_p3), %v916_v6, %v915_v5  ;;  %894 = vadd.xlane.f32.xlu0 (!%p3396_p3), %v892_v3  ;;  %v3780_v12 = vpack.c.bf16 (!%p3396_p3), %v918_v10, %v917_v9  ;;  %v919_v13 = vld [vmem:[#allocation14 + $0x30] sm:$0xff] (!%p3396_p3)  ;;  %v920_v14 = vld [vmem:[#allocation14 + $0x38] sm:$0xff] (!%p3396_p3)  ;;  %v921_v16 = vld [vmem:[#allocation14 + $0x40] sm:$0xff] (!%p3396_p3)  ;;  %1203 = vmatprep.mubr.bf16.mxu1 (!%p3396_p3), %v5016_v2  ;;  %s5022_s22 = smov (!%p3396_p3), 16  }
 0x28c   : > { %3773 = vmatprep.subr.bf16.mxu0 (!%p3396_p3), %v3772_v7  ;;  %v3784_v15 = vpack.c.bf16 (!%p3396_p3), %v920_v14, %v919_v13  ;;  %v922_v17 = vld [vmem:[#allocation14 + $0x48] sm:$0xff] (!%p3396_p3)  ;;  %v923_v19 = vld [vmem:[#allocation14 + $0x50] sm:$0xff] (!%p3396_p3)  ;;  %v924_v20 = vld [vmem:[#allocation14 + $0x58] sm:$0xff] (!%p3396_p3) }
 0x28d   : > { %3775 = vmatpush3.bf16.msra.mxu0 (!%p3396_p3), %v3772_v7  ;;  %v3788_v18 = vpack.c.bf16 (!%p3396_p3), %v922_v17, %v921_v16  ;;  %v925_v21 = vld [vmem:[#allocation14 + $0x60] sm:$0xff] (!%p3396_p3)  ;;  %v3792_v22 = vpack.c.bf16 (!%p3396_p3), %v924_v20, %v923_v19  ;;  %v926_v23 = vld [vmem:[#allocation14 + $0x68] sm:$0xff] (!%p3396_p3)  ;;  %v927_v25 = vld [vmem:[#allocation14 + $0x70] sm:$0xff] (!%p3396_p3) }
 0x28e   : > { %3777 = vmatprep.subr.bf16.mxu0 (!%p3396_p3), %v3776_v8  ;;  %v3796_v24 = vpack.c.bf16 (!%p3396_p3), %v926_v23, %v925_v21  ;;  %v928_v26 = vld [vmem:[#allocation14 + $0x78] sm:$0xff] (!%p3396_p3)  ;;  %v4172_v28 = vld [vmem:[#allocation15 + $0x4] ss:$12 sps:$4 sm:$0xff] (!%p3396_p3)   ;;  %v4174_v29 = vld [vmem:[#allocation15] ss:$12 sps:$4 sm:$0xff] (!%p3396_p3)  }
 0x28f   : > { %896 = vadd.xlane.f32.xlu0 (!%p3396_p3), %v893_v11  ;;  %v3800_v27 = vpack.c.bf16 (!%p3396_p3), %v928_v26, %v927_v25  ;;  %v4176_v31 = vld [vmem:[#allocation15 + $0x1c] ss:$12 sps:$4 sm:$0xff] (!%p3396_p3)   ;;  %1171 = vmatprep.subr.bf16.mxu1 (!%p3396_p3), %v4172_v28  ;;  %v4178_v32 = vld [vmem:[#allocation15 + $0x18] ss:$12 sps:$4 sm:$0xff] (!%p3396_p3)   ;;  %v4180_v33 = vld [vmem:[#allocation15 + $0x34] ss:$12 sps:$4 sm:$0xff] (!%p3396_p3)  }
 0x290   : > { %1172 = vmatpush1.bf16.msra.mxu1 %v4174_v29  ;;  %v4182_v34 = vld [vmem:[#allocation15 + $0x30] ss:$12 sps:$4 sm:$0xff]   ;;  %v4184_v35 = vld [vmem:[#allocation15 + $0x4c] ss:$12 sps:$4 sm:$0xff]   ;;  %v4186_v36 = vld [vmem:[#allocation15 + $0x48] ss:$12 sps:$4 sm:$0xff]  }
 0x291   : > { %3779 = vmatpush3.bf16.msra.mxu0 %v3776_v8  ;;  %1173 = vmatprep.subr.bf16.mxu1 %v4176_v31  ;;  %v4188_v37 = vld [vmem:[#allocation15 + $0x64] ss:$12 sps:$4 sm:$0xff]   ;;  %v4190_v38 = vld [vmem:[#allocation15 + $0x60] ss:$12 sps:$4 sm:$0xff]   ;;  %v4192_v39 = vld [vmem:[#allocation15 + $0x7c] ss:$12 sps:$4 sm:$0xff]  }
 0x292   : > { %3781 = vmatprep.subr.bf16.mxu0 %v3780_v12  ;;  %v4194_v40 = vld [vmem:[#allocation15 + $0x78] ss:$12 sps:$4 sm:$0xff]   ;;  %v3397_v48 = vld [vmem:[#allocation12] ss:$0 sm:$0xff]  ;;  %v4175_v53 = vld [vmem:[#allocation15 + $0x8] ss:$12 sps:$4 sm:$0xff]  }
 0x293   : > { %v4179_v55 = vld [vmem:[#allocation15 + $0x20] ss:$12 sps:$4 sm:$0xff]   ;;  %v4183_v56 = vld [vmem:[#allocation15 + $0x38] ss:$12 sps:$4 sm:$0xff]   ;;  %v4187_v57 = vld [vmem:[#allocation15 + $0x50] ss:$12 sps:$4 sm:$0xff]  }
 0x294   : > { %1174 = vmatpush1.bf16.msra.mxu1 %v4178_v32  ;;  %v4191_v58 = vld [vmem:[#allocation15 + $0x68] ss:$12 sps:$4 sm:$0xff]   ;;  %v4195_v59 = vld [vmem:[#allocation15 + $0x80] ss:$12 sps:$4 sm:$0xff]   ;;  %v4198_v61 = vld [vmem:[#allocation15 + $0x90] ss:$12 sps:$4 sm:$0xff]  }
 0x295   : > { %3783 = vmatpush3.bf16.msra.mxu0 %v3780_v12  ;;  %1175 = vmatprep.subr.bf16.mxu1 %v4180_v33  ;;  %v4196_v60 = vld [vmem:[#allocation15 + $0x94] ss:$12 sps:$4 sm:$0xff]   ;;  %v4199_v62 = vld [vmem:[#allocation15 + $0x98] ss:$12 sps:$4 sm:$0xff]   ;;  %v1257_v12 = vlaneseq }
 0x296   : > { %3785 = vmatprep.subr.bf16.mxu0 %v3784_v15  ;;  %v4200_v63 = vld [vmem:[#allocation15 + $0xac] ss:$12 sps:$4 sm:$0xff]   ;;  %v1255_v16 = vld [vmem:[#allocation21] sm:$0x7] }
 0x297   : > { %v1258_v13 = vshrl.u32 %v1257_v12, 7 }
 0x298   : > { %1176 = vmatpush1.bf16.msra.mxu1 %v4182_v34 }
 0x299   : > { %3787 = vmatpush3.bf16.msra.mxu0 %v3784_v15  ;;  %1177 = vmatprep.subr.bf16.mxu1 %v4184_v35  ;;  %v1259_v14 = vsub.s32 0, %v1258_v13  ;;  %v1267_v15 = vsub.s32 2, %v1258_v13  ;;  %v1263_v17 = vsub.s32 1, %v1258_v13 }
 0x29a   : > { %3789 = vmatprep.subr.bf16.mxu0 %v3788_v18 }
 0x29b   : > { %v1260_v19 = vrot.slane %v1255_v16, %v1259_v14  ;;  %v1268_v20 = vrot.slane %v1255_v16, %v1267_v15  ;;  %v1264_v21 = vrot.slane %v1255_v16, %v1263_v17 }
 0x29c   : > { %1178 = vmatpush1.bf16.msra.mxu1 %v4186_v36 }
 0x29d   : > { %3791 = vmatpush3.bf16.msra.mxu0 %v3788_v18  ;;  %1179 = vmatprep.subr.bf16.mxu1 %v4188_v37  ;;  %v1278_v18 = vld [vmem:[#allocation23] sm:$0x7] }
 0x29e   : > { %3793 = vmatprep.subr.bf16.mxu0 %v3792_v22  ;;  %v1291_v23 = vrot.slane %v1278_v18, %v1267_v15  ;;  %v1287_v26 = vrot.slane %v1278_v18, %v1263_v17 }
 0x2a0   : > { %1180 = vmatpush1.bf16.msra.mxu1 %v4190_v38 }
 0x2a1   : > { %3795 = vmatpush3.bf16.msra.mxu0 %v3792_v22  ;;  %1181 = vmatprep.subr.bf16.mxu1 %v4192_v39  ;;  %v1283_v22 = vrot.slane %v1278_v18, %v1259_v14 }
 0x2a2   : > { %3797 = vmatprep.subr.bf16.mxu0 %v3796_v24 }
 0x2a4   : > { %1182 = vmatpush1.bf16.msra.mxu1 %v4194_v40 }
 0x2a5   : > { %3799 = vmatpush3.bf16.msra.mxu0 %v3796_v24  ;;  %1183 = vmatprep.subr.bf16.mxu1 %v4196_v60 }
 0x2a6   : > { %3801 = vmatprep.subr.bf16.mxu0 %v3800_v27 }
 0x2a8   : > { %1184 = vmatpush1.bf16.msra.mxu1 %v4198_v61 }
 0x2a9   : > { %3803 = vmatpush3.bf16.msra.mxu0 %v3800_v27  ;;  %1185 = vmatprep.subr.bf16.mxu1 %v4200_v63 }
 0x2aa   : > { %3641 = vmatprep.subr.bf16.mxu0 %v5015_v30 }
 0x318   : > { %v895_v41 = vpop.xlane.xlu0 %894 }
 0x319   : > { %v899_v42 = vmul.f32 0.0078125, %v895_v41 }
 0x31b   : > { %v901_v43 = vadd.f32 1e-06, %v899_v42 }
 0x31c   : > { %v897_v44 = vpop.xlane.xlu0 %896 }
 0x31d   : > { %4204 = vrsqrt.f32 %v901_v43  ;;  %v900_v45 = vmul.f32 0.0078125, %v897_v44 }
 0x31f   : > { %v902_v46 = vadd.f32 1e-06, %v900_v45 }
 0x321   : > { %4206 = vrsqrt.f32 %v902_v46 }
 0x327   : > { %v4205_v47 = vpop.eup %4204 }
 0x328   : > { %v905_v49 = vmul.f32 %v4205_v47, %v5810_v0  ;;  %v4202_v0 = vld [vmem:[#allocation15 + $0xa8] ss:$12 sps:$4 sm:$0xff]  }
 0x329   : > { %1186 = vmatpush1.bf16.msra.mxu1 %v4202_v0 }
 0x32a   : > { %v911_v50 = vmul.f32 %v3397_v48, %v905_v49 }
 0x32b   : > { %v4207_v51 = vpop.eup %4206 }
 0x32c   : > { %v906_v52 = vmul.f32 %v4207_v51, %v5814_v1  ;;  %3638 = vmatprep.mubr.f32.mxu0 %v911_v50  ;;  %v4203_v1 = vld [vmem:[#allocation15 + $0xb0] ss:$12 sps:$4 sm:$0xff]  }
 0x32e   : > { %v912_v54 = vmul.f32 %v3397_v48, %v906_v52 }
 0x330   : > { %3639 = vmatmul.mubr.f32.vlgmr.msra.gmra.mrb[0].mxu0 %v912_v54 }
 0x331   : > { %3642 = vmatpush3.bf16.msra.mxu0 %v4175_v53  ;;  %3657 = vmatprep.mubr.msk.bf16.mxu0 %vm5017_vm0, %v5015_v30 }
 0x332   : > { %3643 = vmatprep.subr.bf16.mxu0 %v5015_v30 }
 0x335   : > { %3644 = vmatpush3.bf16.msra.mxu0 %v4179_v55 }
 0x336   : > { %3645 = vmatprep.subr.bf16.mxu0 %v5015_v30 }
 0x339   : > { %3646 = vmatpush3.bf16.msra.mxu0 %v4183_v56 }
 0x33a   : > { %3647 = vmatprep.subr.bf16.mxu0 %v5015_v30 }
 0x33d   : > { %3648 = vmatpush3.bf16.msra.mxu0 %v4187_v57 }
 0x33e   : > { %3649 = vmatprep.subr.bf16.mxu0 %v5015_v30 }
 0x341   : > { %3650 = vmatpush3.bf16.msra.mxu0 %v4191_v58 }
 0x342   : > { %3651 = vmatprep.subr.bf16.mxu0 %v5015_v30 }
 0x345   : > { %3652 = vmatpush3.bf16.msra.mxu0 %v4195_v59 }
 0x346   : > { %3653 = vmatprep.subr.bf16.mxu0 %v5015_v30 }
 0x349   : > { %3654 = vmatpush3.bf16.msra.mxu0 %v4199_v62 }
 0x34a   : > { %3655 = vmatprep.subr.bf16.mxu0 %v5015_v30 }
 0x34d   : > { %3656 = vmatpush3.bf16.msra.mxu0 %v4203_v1 }
 0x403   : > { %v3640_v3 = vpop.f32.mrb[0].mxu0 }
 0x404   : > { %v3857_v4 = vround.rtne.f32 %v3640_v3  ;;  %v995_v5 = vpop.f32.mrb[1].mxu0  ;;  %v5896_v3 = vld [vmem:[#allocation30 + $0x8] sm:$0xff] }
 0x405   : > { %v3856_v6 = vround.rtne.f32 %v995_v5 }
 0x406   : > { %v1007_v7 = vmax.f32 %v3857_v4, -128.0  ;;  %v5898_v4 = vld [vmem:[#allocation32 + $0x8] sm:$0xff] }
 0x407   : > { %v1006_v8 = vmax.f32 %v3856_v6, -128.0 }
 0x408   : > { %v1009_v9 = vmin.f32 %v1007_v7, 127.0 }
 0x409   : > { %v1008_v10 = vmin.f32 %v1006_v8, 127.0 }
 0x40b   : > { %v1010_v11 = vpack.c.bf16 %v1009_v9, %v1008_v10 }
 0x40d   : > { %1204 = vmatmul.mubr.bf16.vlgmr.msra.gmra.mrb[0].mxu1 %v1010_v11  ;;  %3658 = vmatmul.mubr.bf16.vlgmr.msra.gmra.mrb[4].mxu0 %v1010_v11 }
 0x4e0   : > { %v1205_v24 = vpop.f32.mrb[0].mxu1  ;;  %v1248_v25 = vpop.f32.mrb[4].mxu0 }
 0x4e1   : > { %v1272_v27 = vmul.f32 %v1260_v19, %v1205_v24  ;;  %v1274_v28 = vmul.f32 %v1268_v20, %v1248_v25  ;;  %v1207_v29 = vpop.f32.mrb[1].mxu1  ;;  %v3659_v30 = vpop.f32.mrb[5].mxu0 }
 0x4e2   : > { %v1273_v31 = vmul.f32 %v1264_v21, %v1207_v29  ;;  %v1209_v32 = vpop.f32.mrb[2].mxu1  ;;  %v1251_v33 = vpop.f32.mrb[6].mxu0 }
 0x4e3   : > { %v1295_v34 = vadd.f32 %v1283_v22, %v1272_v27  ;;  %v1297_v35 = vadd.f32 %v1291_v23, %v1274_v28  ;;  %v1275_v36 = vmul.f32 %v1260_v19, %v1209_v32  ;;  %v1277_v37 = vmul.f32 %v1268_v20, %v1251_v33  ;;  %v1211_v38 = vpop.f32.mrb[3].mxu1  ;;  %v3660_v39 = vpop.f32.mrb[7].mxu0  ;;  %v5947_v27 = vld [vmem:[#allocation30] sm:$0xff]  ;;  %v5949_v28 = vld [vmem:[#allocation32] sm:$0xff] }
 0x4e4   : > { %v1296_v40 = vadd.f32 %v1287_v26, %v1273_v31  ;;  %v1276_v41 = vmul.f32 %v1264_v21, %v1211_v38 }
 0x4e5   : > { %1302 = vst.msk [vmem:[#allocation2] sm:$0xff] %vm1301_vm1, %v1295_v34  ;;  %1306 = vst.msk [vmem:[#allocation4] sm:$0xff] %vm1301_vm1, %v1297_v35  ;;  %v1298_v42 = vadd.f32 %v1283_v22, %v1275_v36  ;;  %v1300_v43 = vadd.f32 %v1291_v23, %v1277_v37  ;;  %1310 = vrot.lane.b32.xlu1 %v1295_v34, %s5018_s26 }
 0x4e6   : > { %1304 = vst.msk [vmem:[#allocation3] sm:$0xff] %vm1301_vm1, %v1296_v40  ;;  %v1299_v44 = vadd.f32 %v1287_v26, %v1276_v41  ;;  %1321 = vrot.lane.b32.xlu0 %v1296_v40, %s5018_s26 }
 0x4e7   : > { %1303 = vst.msk [vmem:[#allocation2 + $0x8] sm:$0xff] %vm1301_vm1, %v1298_v42  ;;  %1307 = vst.msk [vmem:[#allocation4 + $0x8] sm:$0xff] %vm1301_vm1, %v1300_v43 }
 0x4e8   : > { %1305 = vst.msk [vmem:[#allocation3 + $0x8] sm:$0xff] %vm1301_vm1, %v1299_v44 }
 0x4e9   : > { %1341 = vrot.lane.b32.xlu1 %v1295_v34, %s5019_s20 }
 0x4ea   : > { %1370 = vrot.lane.b32.xlu0 %v1298_v42, %s5020_s13 }
 0x4ec   : > { %v5855_v47 = vld [vmem:[#allocation2] sm:$0xff] }
 0x4ed   : > { %1368 = vrot.lane.b32.xlu1 %v1295_v34, %s5020_s13  ;;  %v5861_v48 = vld [vmem:[#allocation3] sm:$0xff]  ;;  %v1407_v31 = vmul.f32 %v5855_v47, %v5947_v27 }
 0x4ee   : > { %1334 = vrot.lane.b32.xlu0 %v1300_v43, %s5018_s26  ;;  %v5841_v45 = vld [vmem:[#allocation2 + $0x8] sm:$0xff]  ;;  %v1512_v38 = vmul.f32 %v5861_v48, %v5947_v27 }
 0x4ef   : > { %v5848_v46 = vld [vmem:[#allocation3 + $0x8] sm:$0xff]  ;;  %v1408_v7 = vmul.f32 %v5841_v45, %v5896_v3 }
 0x4f0   : > { %v1513_v18 = vmul.f32 %v5848_v46, %v5896_v3 }
 0x4f1   : > { %1332 = vrot.lane.b32.xlu1 %v1297_v35, %s5018_s26 }
 0x4f2   : > { %1361 = vrot.lane.b32.xlu0 %v1300_v43, %s5019_s20 }
 0x4f5   : > { %1359 = vrot.lane.b32.xlu1 %v1297_v35, %s5019_s20 }
 0x4f6   : > { %1379 = vrot.lane.b32.xlu0 %v1299_v44, %s5020_s13 }
 0x4f9   : > { %1350 = vrot.lane.b32.xlu1 %v1296_v40, %s5019_s20 }
 0x4fa   : > { %1388 = vrot.lane.b32.xlu0 %v1300_v43, %s5020_s13 }
 0x4fd   : > { %1377 = vrot.lane.b32.xlu1 %v1296_v40, %s5020_s13 }
 0x4fe   : > { %1425 = vrot.lane.b32.xlu0 %v5841_v45, %s5021_s7 }
 0x501   : > { %1312 = vrot.lane.b32.xlu1 %v1298_v42, %s5018_s26 }
 0x502   : > { %1449 = vrot.lane.b32.xlu0 %v5841_v45, %s5022_s22 }
 0x505   : > { %1343 = vrot.lane.b32.xlu1 %v1298_v42, %s5019_s20 }
 0x506   : > { %1530 = vrot.lane.b32.xlu0 %v5848_v46, %s5021_s7 }
 0x509   : > { %1323 = vrot.lane.b32.xlu1 %v1299_v44, %s5018_s26 }
 0x50a   : > { %1554 = vrot.lane.b32.xlu0 %v5848_v46, %s5022_s22 }
 0x50d   : > { %1352 = vrot.lane.b32.xlu1 %v1299_v44, %s5019_s20 }
 0x511   : > { %1386 = vrot.lane.b32.xlu1 %v1297_v35, %s5020_s13 }
 0x515   : > { %1423 = vrot.lane.b32.xlu1 %v5855_v47, %s5021_s7 }
 0x519   : > { %1447 = vrot.lane.b32.xlu1 %v5855_v47, %s5022_s22 }
 0x51d   : > { %1528 = vrot.lane.b32.xlu1 %v5861_v48, %s5021_s7 }
 0x521   : > { %1552 = vrot.lane.b32.xlu1 %v5861_v48, %s5022_s22 }
 0x557   : > { %v1311_v49 = vpop.permute.xlu1 %1310 }
 0x558   : > { %1317 = vst.msk [vmem:[#allocation2 + $0x10] sm:$0xff] %vm1301_vm1, %v1311_v49  ;;  %v1322_v50 = vpop.permute.xlu0 %1321 }
 0x559   : > { %1328 = vst.msk [vmem:[#allocation3 + $0x10] sm:$0xff] %vm1301_vm1, %v1322_v50 }
 0x55b   : > { %v1342_v51 = vpop.permute.xlu1 %1341 }
 0x55c   : > { %1348 = vst.msk [vmem:[#allocation2 + $0x20] sm:$0xff] %vm1301_vm1, %v1342_v51  ;;  %v1371_v52 = vpop.permute.xlu0 %1370 }
 0x55d   : > { %1376 = vst.msk [vmem:[#allocation2 + $0x38] sm:$0xff] %vm1301_vm1, %v1371_v52 }
 0x55f   : > { %v1369_v53 = vpop.permute.xlu1 %1368  ;;  %v5871_v54 = vld [vmem:[#allocation2 + $0x10] sm:$0xff] }
 0x560   : > { %1375 = vst.msk [vmem:[#allocation2 + $0x30] sm:$0xff] %vm1301_vm1, %v1369_v53  ;;  %v1335_v55 = vpop.permute.xlu0 %1334  ;;  %1427 = vrot.lane.b32.xlu1 %v5871_v54, %s5021_s7  ;;  %v5907_v10 = vld [vmem:[#allocation3 + $0x10] sm:$0xff]  ;;  %v1409_v48 = vmul.f32 %v5871_v54, %v5947_v27 }
 0x561   : > { %1340 = vst.msk [vmem:[#allocation4 + $0x18] sm:$0xff] %vm1301_vm1, %v1335_v55 }
 0x563   : > { %v1333_v56 = vpop.permute.xlu1 %1332  ;;  %v5877_v57 = vld [vmem:[#allocation2 + $0x20] sm:$0xff] }
 0x564   : > { %1339 = vst.msk [vmem:[#allocation4 + $0x10] sm:$0xff] %vm1301_vm1, %v1333_v56  ;;  %v1362_v58 = vpop.permute.xlu0 %1361  ;;  %1431 = vrot.lane.b32.xlu1 %v5877_v57, %s5021_s7  ;;  %v5936_v25 = vld [vmem:[#allocation2 + $0x38] sm:$0xff]  ;;  %v1411_v53 = vmul.f32 %v5877_v57, %v5947_v27 }
 0x565   : > { %1367 = vst.msk [vmem:[#allocation4 + $0x28] sm:$0xff] %vm1301_vm1, %v1362_v58 }
 0x567   : > { %v1360_v59 = vpop.permute.xlu1 %1359  ;;  %v5883_v60 = vld [vmem:[#allocation2 + $0x30] sm:$0xff] }
 0x568   : > { %1366 = vst.msk [vmem:[#allocation4 + $0x20] sm:$0xff] %vm1301_vm1, %v1360_v59  ;;  %v1380_v61 = vpop.permute.xlu0 %1379  ;;  %1435 = vrot.lane.b32.xlu1 %v5883_v60, %s5021_s7 }
 0x569   : > { %1385 = vst.msk [vmem:[#allocation3 + $0x38] sm:$0xff] %vm1301_vm1, %v1380_v61 }
 0x56b   : > { %v1351_v62 = vpop.permute.xlu1 %1350 }
 0x56c   : > { %1357 = vst.msk [vmem:[#allocation3 + $0x20] sm:$0xff] %vm1301_vm1, %v1351_v62  ;;  %v1389_v63 = vpop.permute.xlu0 %1388  ;;  %1451 = vrot.lane.b32.xlu1 %v5871_v54, %s5022_s22  ;;  %v1413_v54 = vmul.f32 %v5883_v60, %v5947_v27 }
 0x56d   : > { %1394 = vst.msk [vmem:[#allocation4 + $0x38] sm:$0xff] %vm1301_vm1, %v1389_v63 }
 0x56f   : > { %v1378_v0 = vpop.permute.xlu1 %1377 }
 0x570   : > { %1384 = vst.msk [vmem:[#allocation3 + $0x30] sm:$0xff] %vm1301_vm1, %v1378_v0  ;;  %v1426_v1 = vpop.permute.xlu0 %1425  ;;  %1455 = vrot.lane.b32.xlu1 %v5877_v57, %s5022_s22  ;;  %v5975_v42 = vld [vmem:[#allocation3 + $0x38] sm:$0xff] }
 0x573   : > { %v1313_v2 = vpop.permute.xlu1 %1312  ;;  %v5913_v14 = vld [vmem:[#allocation3 + $0x20] sm:$0xff] }
 0x574   : > { %1318 = vst.msk [vmem:[#allocation2 + $0x18] sm:$0xff] %vm1301_vm1, %v1313_v2  ;;  %v1450_v5 = vpop.permute.xlu0 %1449  ;;  %1459 = vrot.lane.b32.xlu1 %v5883_v60, %s5022_s22 }
 0x575   : > { %v1473_v6 = vsel %vm1471_vm2, %v1426_v1, %v1450_v5 }
 0x576   : > { %v1481_v8 = vmul.f32 %v1473_v6, %v5898_v4 }
 0x577   : > { %v1344_v9 = vpop.permute.xlu1 %1343  ;;  %v5926_v21 = vld [vmem:[#allocation3 + $0x30] sm:$0xff] }
 0x578   : > { %v1489_v11 = vadd.f32 %v1481_v8, %v1408_v7  ;;  %1349 = vst.msk [vmem:[#allocation2 + $0x28] sm:$0xff] %vm1301_vm1, %v1344_v9  ;;  %1532 = vrot.lane.b32.xlu1 %v5907_v10, %s5021_s7  ;;  %v1531_v12 = vpop.permute.xlu0 %1530  ;;  %v1514_v8 = vmul.f32 %v5907_v10, %v5947_v27 }
 0x57a   : > { %1497 = vst.msk [vmem:[#allocation2 + $0x8] sm:$0xff] %vm1301_vm1, %v1489_v11 }
 0x57b   : > { %v1324_v13 = vpop.permute.xlu1 %1323  ;;  %v5915_v15 = vld [vmem:[#allocation2 + $0x18] sm:$0xff] }
 0x57c   : > { %1329 = vst.msk [vmem:[#allocation3 + $0x18] sm:$0xff] %vm1301_vm1, %v1324_v13  ;;  %1536 = vrot.lane.b32.xlu1 %v5913_v14, %s5021_s7  ;;  %1429 = vrot.lane.b32.xlu0 %v5915_v15, %s5021_s7  ;;  %v1555_v16 = vpop.permute.xlu0 %1554 }
 0x57d   : > { %v1577_v17 = vsel %vm1471_vm2, %v1531_v12, %v1555_v16 }
 0x57e   : > { %v1585_v19 = vmul.f32 %v1577_v17, %v5898_v4  ;;  %v1516_v17 = vmul.f32 %v5913_v14, %v5947_v27 }
 0x57f   : > { %v1353_v20 = vpop.permute.xlu1 %1352  ;;  %v5928_v22 = vld [vmem:[#allocation2 + $0x28] sm:$0xff] }
 0x580   : > { %v1593_v23 = vadd.f32 %v1585_v19, %v1513_v18  ;;  %1358 = vst.msk [vmem:[#allocation3 + $0x28] sm:$0xff] %vm1301_vm1, %v1353_v20  ;;  %1540 = vrot.lane.b32.xlu1 %v5926_v21, %s5021_s7  ;;  %1433 = vrot.lane.b32.xlu0 %v5928_v22, %s5021_s7  ;;  %v1410_v19 = vmul.f32 %v5915_v15, %v5896_v3 }
 0x582   : > { %1601 = vst.msk [vmem:[#allocation3 + $0x8] sm:$0xff] %vm1301_vm1, %v1593_v23 }
 0x583   : > { %v1387_v24 = vpop.permute.xlu1 %1386  ;;  %v5962_v36 = vld [vmem:[#allocation3 + $0x18] sm:$0xff] }
 0x584   : > { %1393 = vst.msk [vmem:[#allocation4 + $0x30] sm:$0xff] %vm1301_vm1, %v1387_v24  ;;  %1556 = vrot.lane.b32.xlu1 %v5907_v10, %s5022_s22  ;;  %1437 = vrot.lane.b32.xlu0 %v5936_v25, %s5021_s7 }
 0x587   : > { %v1424_v26 = vpop.permute.xlu1 %1423  ;;  %v5970_v41 = vld [vmem:[#allocation3 + $0x28] sm:$0xff] }
 0x588   : > { %1560 = vrot.lane.b32.xlu1 %v5913_v14, %s5022_s22  ;;  %1453 = vrot.lane.b32.xlu0 %v5915_v15, %s5022_s22  ;;  %v1518_v14 = vmul.f32 %v5926_v21, %v5947_v27  ;;  %v1412_v15 = vmul.f32 %v5928_v22, %v5896_v3 }
 0x58b   : > { %v1448_v29 = vpop.permute.xlu1 %1447 }
 0x58c   : > { %v1472_v30 = vsel %vm1471_vm2, %v1424_v26, %v1448_v29  ;;  %1564 = vrot.lane.b32.xlu1 %v5926_v21, %s5022_s22  ;;  %1457 = vrot.lane.b32.xlu0 %v5928_v22, %s5022_s22 }
 0x58d   : > { %v1480_v32 = vmul.f32 %v1472_v30, %v5949_v28 }
 0x58f   : > { %v1488_v33 = vadd.f32 %v1480_v32, %v1407_v31  ;;  %v1529_v34 = vpop.permute.xlu1 %1528 }
 0x590   : > { %1461 = vrot.lane.b32.xlu0 %v5936_v25, %s5022_s22 }
 0x591   : > { %1496 = vst.msk [vmem:[#allocation2] sm:$0xff] %vm1301_vm1, %v1488_v33 }
 0x593   : > { %v1553_v35 = vpop.permute.xlu1 %1552 }
 0x594   : > { %v1576_v37 = vsel %vm1471_vm2, %v1529_v34, %v1553_v35  ;;  %1534 = vrot.lane.b32.xlu0 %v5962_v36, %s5021_s7 }
 0x595   : > { %v1584_v39 = vmul.f32 %v1576_v37, %v5949_v28 }
 0x597   : > { %v1592_v40 = vadd.f32 %v1584_v39, %v1512_v38  ;;  %v1414_v38 = vmul.f32 %v5936_v25, %v5896_v3 }
 0x598   : > { %1538 = vrot.lane.b32.xlu0 %v5970_v41, %s5021_s7 }
 0x599   : > { %1600 = vst.msk [vmem:[#allocation3] sm:$0xff] %vm1301_vm1, %v1592_v40 }
 0x59c   : > { %1542 = vrot.lane.b32.xlu0 %v5975_v42, %s5021_s7 }
 0x5a0   : > { %1558 = vrot.lane.b32.xlu0 %v5962_v36, %s5022_s22 }
 0x5a4   : > { %1562 = vrot.lane.b32.xlu0 %v5970_v41, %s5022_s22 }
 0x5a8   : > { %1566 = vrot.lane.b32.xlu0 %v5975_v42, %s5022_s22 }
 0x5d2   : > { %v1428_v43 = vpop.permute.xlu1 %1427 }
 0x5d6   : > { %v1432_v44 = vpop.permute.xlu1 %1431 }
 0x5da   : > { %v1436_v45 = vpop.permute.xlu1 %1435 }
 0x5de   : > { %v1452_v46 = vpop.permute.xlu1 %1451 }
 0x5df   : > { %v1474_v47 = vsel %vm1471_vm2, %v1428_v43, %v1452_v46 }
 0x5e0   : > { %v1482_v49 = vmul.f32 %v1474_v47, %v5949_v28 }
 0x5e2   : > { %v1490_v50 = vadd.f32 %v1482_v49, %v1409_v48  ;;  %v1456_v51 = vpop.permute.xlu1 %1455  ;;  %v1517_v48 = vmul.f32 %v5970_v41, %v5896_v3 }
 0x5e3   : > { %v1476_v52 = vsel %vm1471_vm2, %v1432_v44, %v1456_v51  ;;  %v1515_v44 = vmul.f32 %v5962_v36, %v5896_v3  ;;  %v1519_v36 = vmul.f32 %v5975_v42, %v5896_v3 }
 0x5e4   : > { %1498 = vst.msk [vmem:[#allocation2 + $0x10] sm:$0xff] %vm1301_vm1, %v1490_v50  ;;  %v1484_v55 = vmul.f32 %v1476_v52, %v5949_v28 }
 0x5e6   : > { %v1492_v56 = vadd.f32 %v1484_v55, %v1411_v53  ;;  %v1460_v58 = vpop.permute.xlu1 %1459 }
 0x5e7   : > { %v1478_v59 = vsel %vm1471_vm2, %v1436_v45, %v1460_v58 }
 0x5e8   : > { %1500 = vst.msk [vmem:[#allocation2 + $0x20] sm:$0xff] %vm1301_vm1, %v1492_v56  ;;  %v1486_v61 = vmul.f32 %v1478_v59, %v5949_v28 }
 0x5ea   : > { %v1494_v62 = vadd.f32 %v1486_v61, %v1413_v54  ;;  %v1533_v63 = vpop.permute.xlu1 %1532 }
 0x5ec   : > { %1502 = vst.msk [vmem:[#allocation2 + $0x30] sm:$0xff] %vm1301_vm1, %v1494_v62 }
 0x5ee   : > { %v1537_v0 = vpop.permute.xlu1 %1536  ;;  %v1430_v1 = vpop.permute.xlu0 %1429 }
 0x5f2   : > { %v1541_v57 = vpop.permute.xlu1 %1540  ;;  %v1434_v2 = vpop.permute.xlu0 %1433 }
 0x5f6   : > { %v1557_v5 = vpop.permute.xlu1 %1556  ;;  %v1438_v6 = vpop.permute.xlu0 %1437 }
 0x5f7   : > { %v1578_v7 = vsel %vm1471_vm2, %v1533_v63, %v1557_v5 }
 0x5f8   : > { %v1586_v9 = vmul.f32 %v1578_v7, %v5949_v28 }
 0x5fa   : > { %v1594_v60 = vadd.f32 %v1586_v9, %v1514_v8  ;;  %v1561_v11 = vpop.permute.xlu1 %1560  ;;  %v1454_v12 = vpop.permute.xlu0 %1453 }
 0x5fb   : > { %v1580_v13 = vsel %vm1471_vm2, %v1537_v0, %v1561_v11  ;;  %v1475_v16 = vsel %vm1471_vm2, %v1430_v1, %v1454_v12 }
 0x5fc   : > { %1602 = vst.msk [vmem:[#allocation3 + $0x10] sm:$0xff] %vm1301_vm1, %v1594_v60  ;;  %v1588_v18 = vmul.f32 %v1580_v13, %v5949_v28  ;;  %v1483_v10 = vmul.f32 %v1475_v16, %v5898_v4 }
 0x5fe   : > { %v1596_v20 = vadd.f32 %v1588_v18, %v1516_v17  ;;  %v1491_v23 = vadd.f32 %v1483_v10, %v1410_v19  ;;  %v1565_v24 = vpop.permute.xlu1 %1564  ;;  %v1458_v26 = vpop.permute.xlu0 %1457 }
 0x5ff   : > { %v1582_v29 = vsel %vm1471_vm2, %v1541_v57, %v1565_v24  ;;  %v1477_v30 = vsel %vm1471_vm2, %v1434_v2, %v1458_v26 }
 0x600   : > { %1604 = vst.msk [vmem:[#allocation3 + $0x20] sm:$0xff] %vm1301_vm1, %v1596_v20  ;;  %1499 = vst.msk [vmem:[#allocation2 + $0x18] sm:$0xff] %vm1301_vm1, %v1491_v23  ;;  %v1590_v31 = vmul.f32 %v1582_v29, %v5949_v28  ;;  %v1485_v32 = vmul.f32 %v1477_v30, %v5898_v4 }
 0x602   : > { %v1598_v33 = vadd.f32 %v1590_v31, %v1518_v14  ;;  %v1493_v34 = vadd.f32 %v1485_v32, %v1412_v15  ;;  %v1462_v35 = vpop.permute.xlu0 %1461 }
 0x603   : > { %v1479_v37 = vsel %vm1471_vm2, %v1438_v6, %v1462_v35 }
 0x604   : > { %1606 = vst.msk [vmem:[#allocation3 + $0x30] sm:$0xff] %vm1301_vm1, %v1598_v33  ;;  %1501 = vst.msk [vmem:[#allocation2 + $0x28] sm:$0xff] %vm1301_vm1, %v1493_v34  ;;  %v1487_v21 = vmul.f32 %v1479_v37, %v5898_v4 }
 0x606   : > { %v1495_v27 = vadd.f32 %v1487_v21, %v1414_v38  ;;  %v1535_v28 = vpop.permute.xlu0 %1534 }
 0x608   : > { %1503 = vst.msk [vmem:[#allocation2 + $0x38] sm:$0xff] %vm1301_vm1, %v1495_v27 }
 0x60a   : > { %v1539_v22 = vpop.permute.xlu0 %1538 }
 0x60e   : > { %v1543_v39 = vpop.permute.xlu0 %1542 }
 0x612   : > { %v1559_v40 = vpop.permute.xlu0 %1558 }
 0x613   : > { %v1579_v43 = vsel %vm1471_vm2, %v1535_v28, %v1559_v40 }
 0x614   : > { %v1587_v45 = vmul.f32 %v1579_v43, %v5898_v4 }
 0x616   : > { %v1595_v46 = vadd.f32 %v1587_v45, %v1515_v44  ;;  %v1563_v47 = vpop.permute.xlu0 %1562 }
 0x617   : > { %v1581_v25 = vsel %vm1471_vm2, %v1539_v22, %v1563_v47 }
 0x618   : > { %1603 = vst.msk [vmem:[#allocation3 + $0x18] sm:$0xff] %vm1301_vm1, %v1595_v46  ;;  %v1589_v49 = vmul.f32 %v1581_v25, %v5898_v4 }
 0x61a   : > { %v1597_v50 = vadd.f32 %v1589_v49, %v1517_v48  ;;  %v1567_v51 = vpop.permute.xlu0 %1566 }
 0x61b   : > { %v1583_v52 = vsel %vm1471_vm2, %v1543_v39, %v1567_v51 }
 0x61c   : > { %1605 = vst.msk [vmem:[#allocation3 + $0x28] sm:$0xff] %vm1301_vm1, %v1597_v50  ;;  %v1591_v53 = vmul.f32 %v1583_v52, %v5898_v4 }
 0x61e   : > { %v1599_v55 = vadd.f32 %v1591_v53, %v1519_v36 }
 0x620   : > { %1607 = vst.msk [vmem:[#allocation3 + $0x38] sm:$0xff] %vm1301_vm1, %v1599_v55 }
 0x621 PF: > { %v1614_v56 = vld [vmem:[#allocation3] sm:$0xff]  ;;  %s6387_s1 = sld [smem:[#allocation54_spill]]  ;;  %v1615_v41 = vld [vmem:[#allocation3 + $0x8] sm:$0xff]  ;;  %vm1631_vm3 = vcmask 261120   ;;  %v5023_v58 = vmov 0.0|0.0   ;;  %vm5024_vm5 = vmmov 0  }
 0x622   : > { %3804 = vmatprep.subr.bf16.mxu1 %v5023_v58  ;;  %v3805_v59 = vpack.c.bf16 %v1615_v41, %v1614_v56  ;;  %vm6048_vm4 = vmpackc.low %vm1631_vm3, %vm1631_vm3  ;;  %v5025_v3 = vmov 0.0   ;;  %3820 = vmatprep.subr.bf16.mxu0 %v5023_v58  ;;  %v1616_v4 = vld [vmem:[#allocation3 + $0x10] sm:$0xff]  ;;  %v1617_v42 = vld [vmem:[#allocation3 + $0x18] sm:$0xff]  ;;  %vm1948_vm6 = vcmask 130048   ;;  %s5026_s10 = smov 32   ;;  %s5027_s9 = smov 64  }
 0x623   : > { %3665 = vmatprep.mubr.msk.f32.mxu1 %vm5024_vm5, %v5025_v3  ;;  %3693 = vmatprep.mubr.msk.f32.mxu0 %vm5024_vm5, %v5025_v3  ;;  %v3809_v62 = vpack.c.bf16 %v1617_v42, %v1616_v4  ;;  %v1618_v63 = vld [vmem:[#allocation3 + $0x20] sm:$0xff]  ;;  %v1619_v0 = vld [vmem:[#allocation3 + $0x28] sm:$0xff]  ;;  %v1620_v2 = vld [vmem:[#allocation3 + $0x30] sm:$0xff]  ;;  %s5028_s3 = smov 96   ;;  %vm2298_vm7 = vcmask 523264   ;;  %vm2300_vm8 = vcmask 785408  }
 0x624   : > { %3807 = vmatpush3.bf16.xpose.msk.msra.mxu1 %vm6048_vm4, %v3805_v59  ;;  %v3813_v57 = vpack.c.bf16 %v1619_v0, %v1618_v63  ;;  %v1630_v9 = vld [vmem:[%s760_s17] sm:$0xff]  ;;  %v1622_v47 = vld [vmem:[#allocation4] sm:$0xff]  ;;  %v1623_v25 = vld [vmem:[#allocation4 + $0x8] sm:$0xff]  ;;  %s2410_s19 = sld [smem:[#allocation33]]  ;;  %s3499_s4 = sld [smem:[#allocation33 + $0x1]] }
 0x625   : > { %3808 = vmatprep.subr.bf16.mxu1 %v5023_v58  ;;  %v3821_v49 = vpack.c.bf16 %v1623_v25, %v1622_v47  ;;  %v1624_v51 = vld [vmem:[#allocation4 + $0x10] sm:$0xff]  ;;  %v1625_v52 = vld [vmem:[#allocation4 + $0x18] sm:$0xff]  ;;  %v1626_v56 = vld [vmem:[#allocation4 + $0x20] sm:$0xff]  ;;  %s3074_s26 = sshll.u32 %s883_s28, 4  ;;  %s6391_s7 = sld [smem:[#allocation79_spill]]  ;;  %s6140_s26 = int_to_ptr.vmem [resolvable:$true] %s3074_s26 }
 0x626   : > { %v3824_v36 = vpack.c.bf16 %v1625_v52, %v1624_v51  ;;  %v1627_v41 = vld [vmem:[#allocation4 + $0x28] sm:$0xff]  ;;  %v3447_v47 = vld [vmem:[#allocation27] ss:$0 sm:$0xff]  ;;  %p6392_p4 = scmp.ne.s32.totalorder %s6324_s5, 0 }
 0x627   : > { %s3422_s6 = sshll.u32 %s6387_s1, 3  ;;  %v1621_v5 = vld [vmem:[#allocation3 + $0x38] sm:$0xff]  ;;  %3822 = vmatpush3.bf16.msra.mxu0 %v3821_v49  ;;  %v3827_v54 = vpack.c.bf16 %v1627_v41, %v1626_v56  ;;  %v2421_v49 = vld [vmem:[%s751_s2] sm:$0xff]  ;;  %s6390_s2 = sld [smem:[#allocation55_spill]] }
 0x628   : > { %s1609_s27 = scalar_lea.vmem [#allocation2], %s3422_s6  ;;  %v3817_v7 = vpack.c.bf16 %v1621_v5, %v1620_v2  ;;  %3826 = vmatprep.subr.bf16.mxu0 %v5023_v58  ;;  %v2444_v56 = vld [vmem:[#allocation14 + $0x38] sm:$0xff]  ;;  %s4801_s6 = scalar_lea.vmem %s6140_s26, 128 }
 0x629   : > { %v1610_v61 = vld [vmem:[%s1609_s27] sm:$0xff]  ;;  %v1611_v1 = vld [vmem:[%s1609_s27 + $0x10] sm:$0xff]  ;;  %p4802_p10 = scmp.ne.s32.totalorder %s6140_s26, %s4801_s6 }
 0x62a   : > { %v1612_v6 = vld [vmem:[%s1609_s27 + $0x20] sm:$0xff]  ;;  %v1613_v8 = vld [vmem:[%s1609_s27 + $0x30] sm:$0xff]  ;;  %s5030_s27 = smov [#allocation34]  }
 0x62b   : > { %3666 = vmatmul.mubr.msk.f32.vlgmr.msra.gmra.mrb[0].mxu1 %vm1631_vm3, %v1610_v61  ;;  %v1628_v61 = vld [vmem:[#allocation4 + $0x30] sm:$0xff]  ;;  %p4803_p1 = pnand %p4802_p10, %p6392_p4 }
 0x62c   : > { %3811 = vmatpush3.bf16.xpose.msk.msra.mxu1 %vm6048_vm4, %v3809_v62  ;;  %3672 = vmatprep.mubr.msk.f32.mxu1 %vm5024_vm5, %v5025_v3  ;;  %v1629_v62 = vld [vmem:[#allocation4 + $0x38] sm:$0xff] }
 0x62d   : > { %3812 = vmatprep.subr.bf16.mxu1 %v5023_v58  ;;  %v3830_v0 = vpack.c.bf16 %v1629_v62, %v1628_v61  ;;  %v2448_v61 = vld [vmem:[#allocation14 + $0x58] sm:$0xff]  ;;  %s3502_s12 = sshll.u32 %s6390_s2, 1  ;;  %p4804_p5 = pneg %p4803_p1 }
 0x62e   : > { %s3070_s17 = sadd.s32 %s6387_s1, %s3502_s12  ;;  %s3059_s1 = scalar_lea.sflag [#allocation7], %s749_s21 }
 0x62f   : > { %s3503_s8 = sshll.u32 %s3070_s17, 7 }
 0x630   : > { %s6138_s22 = scalar_lea.hbm %s6391_s7, %s3503_s8 }
 0x633   : > { %3673 = vmatmul.mubr.msk.f32.vlgmr.msra.gmra.mrb[2].mxu1 %vm1631_vm3, %v1611_v1 }
 0x634   : > { %3815 = vmatpush3.bf16.xpose.msk.msra.mxu1 %vm6048_vm4, %v3813_v57  ;;  %3679 = vmatprep.mubr.msk.f32.mxu1 %vm5024_vm5, %v5025_v3 }
 0x635   : > { %3816 = vmatprep.subr.bf16.mxu1 %v5023_v58 }
 0x63b   : > { %3680 = vmatmul.mubr.msk.f32.vlgmr.msra.gmra.mrb[4].mxu1 %vm1631_vm3, %v1612_v6 }
 0x63c   : > { %3819 = vmatpush3.bf16.xpose.msk.msra.mxu1 %vm6048_vm4, %v3817_v7  ;;  %3686 = vmatprep.mubr.msk.f32.mxu1 %vm5024_vm5, %v5025_v3 }
 0x63d   : > { %3823 = vmatprep.subr.bf16.mxu1 %v5023_v58 }
 0x643   : > { %3687 = vmatmul.mubr.msk.f32.vlgmr.msra.gmra.mrb[6].mxu1 %vm1631_vm3, %v1613_v8  ;;  %v4208_v8 = vld [vmem:[#allocation17] sm:$0xff]  }
 0x644   : > { %3700 = vmatprep.mubr.msk.f32.mxu1 %vm5024_vm5, %v5025_v3  ;;  %3825 = vmatpush3.bf16.msra.mxu1 %v3824_v36 }
 0x645   : > { %3829 = vmatprep.subr.bf16.mxu1 %v5023_v58 }
 0x6fe   : > { %v1707_v60 = vpop.f32.mrb[0].mxu1 }
 0x6ff   : > { %v1708_v11 = vadd.f32 %v1707_v60, %v1630_v9  ;;  %v3667_v12 = vpop.f32.mrb[1].mxu1  ;;  %v4210_v60 = vld [vmem:[#allocation17 + $0x10] sm:$0xff]  }
 0x701   : > { %v1949_v13 = vsel %vm1948_vm6, %v1708_v11, -inf }
 0x702   : > { %1950 = vmax.xlane.f32.xlu0 %v1949_v13 }
 0x706   : > { %v1786_v16 = vpop.f32.mrb[2].mxu1 }
 0x707   : > { %v1787_v17 = vadd.f32 %v1786_v16, %v1630_v9  ;;  %v3674_v18 = vpop.f32.mrb[3].mxu1  ;;  %v4212_v16 = vld [vmem:[#allocation17 + $0x20] sm:$0xff]  }
 0x709   : > { %v1952_v19 = vsel %vm1948_vm6, %v1787_v17, -inf }
 0x70a   : > { %1953 = vmax.xlane.f32.xlu0 %v1952_v19 }
 0x70e   : > { %v1865_v10 = vpop.f32.mrb[4].mxu1 }
 0x70f   : > { %v1866_v20 = vadd.f32 %v1865_v10, %v1630_v9  ;;  %v3681_v23 = vpop.f32.mrb[5].mxu1  ;;  %v4214_v10 = vld [vmem:[#allocation17 + $0x30] sm:$0xff]  }
 0x710   : > { %v4215_v23 = vld [vmem:[#allocation17 + $0x38] sm:$0xff]  }
 0x711   : > { %v1955_v24 = vsel %vm1948_vm6, %v1866_v20, -inf }
 0x712   : > { %1956 = vmax.xlane.f32.xlu1 %v1955_v24 }
 0x716   : > { %v1944_v26 = vpop.f32.mrb[6].mxu1 }
 0x717   : > { %v1945_v29 = vadd.f32 %v1944_v26, %v1630_v9  ;;  %v3688_v30 = vpop.f32.mrb[7].mxu1  ;;  %v4209_v9 = vld [vmem:[#allocation17 + $0x8] sm:$0xff]  }
 0x719   : > { %v1958_v14 = vsel %vm1948_vm6, %v1945_v29, -inf }
 0x71a   : > { %1959 = vmax.xlane.f32.xlu1 %v1958_v14 }
 0x78f   : > { %v1951_v31 = vpop.xlane.xlu0 %1950 }
 0x790   : > { %v1961_v15 = vsub.f32 %v1708_v11, %v1951_v31  ;;  %v4211_v11 = vld [vmem:[#allocation17 + $0x18] sm:$0xff]  }
 0x792   : > { %v1965_v32 = vmul.f32 1.442695, %v1961_v15 }
 0x794   : > { %4280 = vpow2.f32 %v1965_v32 }
 0x797   : > { %v1954_v33 = vpop.xlane.xlu0 %1953 }
 0x798   : > { %v1962_v34 = vsub.f32 %v1787_v17, %v1954_v33  ;;  %v4213_v17 = vld [vmem:[#allocation17 + $0x28] sm:$0xff]  }
 0x79a   : > { %v1967_v35 = vmul.f32 1.442695, %v1962_v34 }
 0x79c   : > { %4282 = vpow2.f32 %v1967_v35 }
 0x79e   : > { %v4281_v37 = vpop.eup %4280 }
 0x79f   : > { %v1957_v38 = vpop.xlane.xlu1 %1956  ;;  %v1973_v21 = vsel %vm1948_vm6, %v4281_v37, 0.0 }
 0x7a0   : > { %v1963_v27 = vsub.f32 %v1866_v20, %v1957_v38  ;;  %1974 = vadd.xlane.f32.xlu0 %v1973_v21  ;;  %v2437_v38 = vld [vmem:[#allocation14] sm:$0xff]  ;;  %v2438_v21 = vld [vmem:[#allocation14 + $0x8] sm:$0xff] }
 0x7a2   : > { %v1969_v28 = vmul.f32 1.442695, %v1963_v27  ;;  %v2439_v27 = vld [vmem:[#allocation14 + $0x10] sm:$0xff] }
 0x7a4   : > { %4284 = vpow2.f32 %v1969_v28  ;;  %v3833_v28 = vpack.c.bf16 %v2438_v21, %v2437_v38  ;;  %v4251_v38 = vld [vmem:[#allocation18 + $0xac] ss:$16 sps:$4 sm:$0xff]   ;;  %v4249_v21 = vld [vmem:[#allocation18 + $0xa8] ss:$16 sps:$4 sm:$0xff]  }
 0x7a6   : > { %v4283_v22 = vpop.eup %4282 }
 0x7a7   : > { %v1960_v39 = vpop.xlane.xlu1 %1959  ;;  %v1976_v40 = vsel %vm1948_vm6, %v4283_v22, 0.0 }
 0x7a8   : > { %v1964_v43 = vsub.f32 %v1945_v29, %v1960_v39  ;;  %1977 = vadd.xlane.f32.xlu1 %v1976_v40  ;;  %v2441_v40 = vld [vmem:[#allocation14 + $0x20] sm:$0xff] }
 0x7aa   : > { %v1971_v44 = vmul.f32 1.442695, %v1964_v43  ;;  %v2442_v43 = vld [vmem:[#allocation14 + $0x28] sm:$0xff] }
 0x7ac   : > { %4286 = vpow2.f32 %v1971_v44  ;;  %v3839_v44 = vpack.c.bf16 %v2442_v43, %v2441_v40  ;;  %v4260_v40 = vld [vmem:[#allocation18 + $0xe4] ss:$16 sps:$4 sm:$0xff]   ;;  %v4263_v43 = vld [vmem:[#allocation18 + $0xec] ss:$16 sps:$4 sm:$0xff]  }
 0x7ae   : > { %v4285_v45 = vpop.eup %4284 }
 0x7af   : > { %v1979_v46 = vsel %vm1948_vm6, %v4285_v45, 0.0 }
 0x7b0   : > { %1980 = vadd.xlane.f32.xlu0 %v1979_v46 }
 0x7b6   : > { %v4287_v48 = vpop.eup %4286 }
 0x7b7   : > { %v1982_v50 = vsel %vm1948_vm6, %v4287_v48, 0.0 }
 0x7b8   : > { %1983 = vadd.xlane.f32.xlu1 %v1982_v50 }
 0x82d   : > { %v1975_v53 = vpop.xlane.xlu0 %1974 }
 0x82e   : > { %4288 = vrcp.f32 %v1975_v53 }
 0x835   : > { %v1978_v55 = vpop.xlane.xlu1 %1977 }
 0x836   : > { %4290 = vrcp.f32 %v1978_v55  ;;  %v2443_v55 = vld [vmem:[#allocation14 + $0x30] sm:$0xff] }
 0x837   : > { %v3842_v41 = vpack.c.bf16 %v2444_v56, %v2443_v55  ;;  %v4266_v55 = vld [vmem:[#allocation20 + $0x48] sm:$0xff]  }
 0x838   : > { %v4289_v59 = vpop.eup %4288  ;;  %v4267_v56 = vld [vmem:[#allocation20 + $0x8] sm:$0xff]  }
 0x839   : > { %v1989_v4 = vmul.f32 %v4289_v59, %v4281_v37  ;;  %v2445_v59 = vld [vmem:[#allocation14 + $0x40] sm:$0xff] }
 0x83b   : > { %3694 = vmatmul.mubr.msk.f32.vlgmr.msra.gmra.mrb[0].mxu0 %vm1948_vm6, %v1989_v4 }
 0x83c   : > { %3828 = vmatpush3.bf16.msra.mxu0 %v3827_v54  ;;  %3707 = vmatprep.mubr.msk.f32.mxu0 %vm5024_vm5, %v5025_v3  ;;  %v2446_v54 = vld [vmem:[#allocation14 + $0x48] sm:$0xff] }
 0x83d   : > { %v1981_v42 = vpop.xlane.xlu0 %1980  ;;  %3717 = vmatprep.subr.bf16.mxu0 %v5025_v3  ;;  %v3845_v4 = vpack.c.bf16 %v2446_v54, %v2445_v59  ;;  %v4269_v59 = vld [vmem:[#allocation20 + $0x10] sm:$0xff]   ;;  %v4270_v54 = vld [vmem:[#allocation20 + $0x58] sm:$0xff]  }
 0x83e   : > { %4292 = vrcp.f32 %v1981_v42  ;;  %v2447_v42 = vld [vmem:[#allocation14 + $0x50] sm:$0xff] }
 0x83f   : > { %v3848_v62 = vpack.c.bf16 %v2448_v61, %v2447_v42  ;;  %v4272_v42 = vld [vmem:[#allocation20 + $0x60] sm:$0xff]  }
 0x840   : > { %v4291_v63 = vpop.eup %4290  ;;  %v4273_v61 = vld [vmem:[#allocation20 + $0x20] sm:$0xff]  }
 0x841   : > { %v1990_v1 = vmul.f32 %v4291_v63, %v4283_v22  ;;  %v2440_v22 = vld [vmem:[#allocation14 + $0x18] sm:$0xff]  ;;  %v2449_v63 = vld [vmem:[#allocation14 + $0x60] sm:$0xff] }
 0x842   : > { %v3836_v39 = vpack.c.bf16 %v2440_v22, %v2439_v27  ;;  %v4254_v27 = vld [vmem:[#allocation18 + $0xc4] ss:$16 sps:$4 sm:$0xff]   ;;  %v4252_v22 = vld [vmem:[#allocation18 + $0xc0] ss:$16 sps:$4 sm:$0xff]  }
 0x843   : > { %3701 = vmatmul.mubr.msk.f32.vlgmr.msra.gmra.mrb[8].mxu1 %vm1948_vm6, %v1990_v1 }
 0x844   : > { %3831 = vmatpush3.bf16.msra.mxu1 %v3830_v0  ;;  %3714 = vmatprep.mubr.msk.f32.mxu1 %vm5024_vm5, %v5025_v3  ;;  %v2450_v0 = vld [vmem:[#allocation14 + $0x68] sm:$0xff] }
 0x845   : > { %v1984_v57 = vpop.xlane.xlu1 %1983  ;;  %3832 = vmatprep.subr.bf16.mxu1 %v5023_v58  ;;  %v3851_v1 = vpack.c.bf16 %v2450_v0, %v2449_v63  ;;  %v4275_v63 = vld [vmem:[#allocation20 + $0x28] sm:$0xff]   ;;  %v4276_v0 = vld [vmem:[#allocation20 + $0x70] sm:$0xff]  }
 0x846   : > { %4294 = vrcp.f32 %v1984_v57  ;;  %v2451_v57 = vld [vmem:[#allocation14 + $0x70] sm:$0xff] }
 0x848   : > { %v4293_v2 = vpop.eup %4292 }
 0x849   : > { %v1991_v5 = vmul.f32 %v4293_v2, %v4285_v45  ;;  %v2411_v45 = vstv %s2410_s19  ;;  %v2452_v2 = vld [vmem:[#allocation14 + $0x78] sm:$0xff] }
 0x84b   : > { %3708 = vmatmul.mubr.msk.f32.vlgmr.msra.gmra.mrb[2].mxu0 %vm1948_vm6, %v1991_v5  ;;  %v3854_v5 = vpack.c.bf16 %v2452_v2, %v2451_v57  ;;  %v4278_v57 = vld [vmem:[#allocation20 + $0x78] sm:$0xff]  }
 0x84c   : > { %3733 = vmatprep.mubr.msk.bf16.mxu0 %vm5024_vm5, %v5025_v3  ;;  %3718 = vmatpush3.bf16.msra.mxu0 %v4208_v8  ;;  %v4221_v8 = vld [vmem:[#allocation18 + $0xc] ss:$16 sps:$4 sm:$0xff]  }
 0x84d   : > { %3719 = vmatprep.subr.bf16.mxu0 %v5025_v3  ;;  %v4279_v2 = vld [vmem:[#allocation20 + $0x38] sm:$0xff]  }
 0x850   : > { %v4295_v6 = vpop.eup %4294  ;;  %3720 = vmatpush3.bf16.msra.mxu0 %v4209_v9  ;;  %v4224_v9 = vld [vmem:[#allocation18 + $0x24] ss:$16 sps:$4 sm:$0xff]  }
 0x851   : > { %v1992_v7 = vmul.f32 %v4295_v6, %v4287_v48  ;;  %3721 = vmatprep.subr.bf16.mxu0 %v5025_v3  ;;  %v4216_v6 = vld [vmem:[#allocation18] ss:$16 sps:$4 sm:$0xff]  }
 0x853   : > { %3715 = vmatmul.mubr.msk.f32.vlgmr.msra.gmra.mrb[10].mxu1 %vm1948_vm6, %v1992_v7  ;;  %v4218_v7 = vld [vmem:[#allocation18 + $0x4] ss:$16 sps:$4 sm:$0xff]  }
 0x854   : > { %3769 = vmatprep.mubr.msk.f32.mxu1 %vm5024_vm5, %v5025_v3  ;;  %3722 = vmatpush3.bf16.msra.mxu0 %v4210_v60  ;;  %v4222_v60 = vld [vmem:[#allocation18 + $0x20] ss:$16 sps:$4 sm:$0xff]  }
 0x855   : > { %3723 = vmatprep.subr.bf16.mxu0 %v5025_v3  ;;  %3834 = vmatpush3.bf16.msra.mxu1 %v3833_v28  ;;  %v4257_v28 = vld [vmem:[#allocation18 + $0xcc] ss:$16 sps:$4 sm:$0xff]  }
 0x856   : > { %3835 = vmatprep.subr.bf16.mxu1 %v5023_v58 }
 0x858   : > { %3724 = vmatpush3.bf16.msra.mxu0 %v4211_v11  ;;  %v4230_v11 = vld [vmem:[#allocation18 + $0x44] ss:$16 sps:$4 sm:$0xff]  }
 0x859   : > { %3725 = vmatprep.subr.bf16.mxu0 %v5025_v3  ;;  %3837 = vmatpush3.bf16.msra.mxu1 %v3836_v39  ;;  %v4255_v39 = vld [vmem:[#allocation18 + $0xc8] ss:$16 sps:$4 sm:$0xff]  }
 0x85a   : > { %3838 = vmatprep.subr.bf16.mxu1 %v5023_v58 }
 0x85c   : > { %3726 = vmatpush3.bf16.msra.mxu0 %v4212_v16  ;;  %v4234_v16 = vld [vmem:[#allocation18 + $0x60] ss:$16 sps:$4 sm:$0xff]  }
 0x85d   : > { %3727 = vmatprep.subr.bf16.mxu0 %v5025_v3  ;;  %3840 = vmatpush3.bf16.msra.mxu1 %v3839_v44  ;;  %v4258_v44 = vld [vmem:[#allocation18 + $0xe0] ss:$16 sps:$4 sm:$0xff]  }
 0x85e   : > { %3841 = vmatprep.subr.bf16.mxu1 %v5023_v58 }
 0x860   : > { %3728 = vmatpush3.bf16.msra.mxu0 %v4213_v17  ;;  %v4242_v17 = vld [vmem:[#allocation18 + $0x84] ss:$16 sps:$4 sm:$0xff]  }
 0x861   : > { %3729 = vmatprep.subr.bf16.mxu0 %v5025_v3  ;;  %3843 = vmatpush3.bf16.msra.mxu1 %v3842_v41  ;;  %v4268_v41 = vld [vmem:[#allocation20 + $0x50] sm:$0xff]  }
 0x862   : > { %3844 = vmatprep.subr.bf16.mxu1 %v5023_v58 }
 0x864   : > { %3730 = vmatpush3.bf16.msra.mxu0 %v4214_v10 }
 0x865   : > { %3731 = vmatprep.subr.bf16.mxu0 %v5025_v3  ;;  %3846 = vmatpush3.bf16.msra.mxu1 %v3845_v4  ;;  %v4271_v4 = vld [vmem:[#allocation20 + $0x18] sm:$0xff]  }
 0x866   : > { %3847 = vmatprep.subr.bf16.mxu1 %v5023_v58 }
 0x868   : > { %3732 = vmatpush3.bf16.msra.mxu0 %v4215_v23 }
 0x869   : > { %3849 = vmatpush3.bf16.msra.mxu1 %v3848_v62  ;;  %2719 = vmatprep.subr.bf16.mxu0 %v4218_v7  ;;  %v4274_v62 = vld [vmem:[#allocation20 + $0x68] sm:$0xff]  }
 0x86a   : > { %3850 = vmatprep.subr.bf16.mxu1 %v5023_v58 }
 0x86d   : > { %3852 = vmatpush3.bf16.msra.mxu1 %v3851_v1  ;;  %v4277_v1 = vld [vmem:[#allocation20 + $0x30] sm:$0xff]  }
 0x86e   : > { %3853 = vmatprep.subr.bf16.mxu1 %v5023_v58  ;;  %v4240_v58 = vld [vmem:[#allocation18 + $0x80] ss:$16 sps:$4 sm:$0xff]  }
 0x871   : > { %3855 = vmatpush3.bf16.msra.mxu1 %v3854_v5  ;;  %v2803_v5 = vlaneseq }
 0x872   : > { %2760 = vmatprep.subr.bf16.mxu1 %v4221_v8  ;;  %v2801_v8 = vld [vmem:[#allocation24] sm:$0xf] }
 0x90e   : > { %v2062_v12 = vpop.f32.mrb[0].mxu0 }
 0x90f   : > { %v3695_v13 = vpop.f32.mrb[1].mxu0 }
 0x910   : > { %v4236_v13 = vld [vmem:[#allocation18 + $0x64] ss:$16 sps:$4 sm:$0xff]  }
 0x916   : > { %v2135_v18 = vpop.f32.mrb[8].mxu1 }
 0x917   : > { %2286 = vrot.lane.b32.xlu0 %v2135_v18, %s5026_s10  ;;  %v3702_v19 = vpop.f32.mrb[9].mxu1  ;;  %v4248_v18 = vld [vmem:[#allocation18 + $0xa4] ss:$16 sps:$4 sm:$0xff]   ;;  %s4805_s10 = sshll.u32 %s5030_s27, 4  ;;  %s4806_s10 = int_to_ptr.vmem [resolvable:$false] %s4805_s10 }
 0x918   : > { %v4246_v19 = vld [vmem:[#allocation18 + $0xa0] ss:$16 sps:$4 sm:$0xff]   ;;  %p4808_p7 = scmp.lt.s32.totalorder %s6140_s26, %s4806_s10 }
 0x91e   : > { %v2208_v20 = vpop.f32.mrb[2].mxu0 }
 0x91f   : > { %v3709_v24 = vpop.f32.mrb[3].mxu0  ;;  %2290 = vrot.lane.b32.xlu1 %v2208_v20, %s5027_s9  ;;  %s4807_s9 = scalar_lea.vmem %s4806_s10, 256 }
 0x920   : > { %p4809_p0 = scmp.lt.s32.totalorder %s4807_s9, %s4801_s6 }
 0x922   : > { %p4810_p2 = por %p4809_p0, %p4808_p7 }
 0x924   : > { %p4811_p9 = pnand %p4810_p2, %p4804_p5 }
 0x926   : > { %v2281_v26 = vpop.f32.mrb[10].mxu1 }
 0x927   : > { %2294 = vrot.lane.b32.xlu1 %v2281_v26, %s5028_s3  ;;  %v3716_v29 = vpop.f32.mrb[11].mxu1  ;;  %v3448_v26 = vld [vmem:[#allocation12 + $0x1] ss:$0 sm:$0xff] }
 0x989   : > { %v2287_v30 = vpop.permute.xlu0 %2286 }
 0x98a   : > { %v2297_v31 = vsel %vm1631_vm3, %v2062_v12, %v2287_v30  ;;  %v4228_v12 = vld [vmem:[#allocation18 + $0x40] ss:$16 sps:$4 sm:$0xff]   ;;  %v4219_v30 = vld [vmem:[#allocation18 + $0x8] ss:$16 sps:$4 sm:$0xff]  }
 0x991   : > { %v2291_v14 = vpop.permute.xlu1 %2290 }
 0x992   : > { %v2299_v15 = vsel %vm2298_vm7, %v2297_v31, %v2291_v14  ;;  %v4227_v31 = vld [vmem:[#allocation18 + $0x2c] ss:$16 sps:$4 sm:$0xff]  }
 0x999   : > { %v2295_v32 = vpop.permute.xlu1 %2294 }
 0x99a   : > { %v2301_v33 = vsel %vm2300_vm8, %v2299_v15, %v2295_v32  ;;  %v4225_v15 = vld [vmem:[#allocation18 + $0x28] ss:$16 sps:$4 sm:$0xff]   ;;  %v4233_v32 = vld [vmem:[#allocation18 + $0x4c] ss:$16 sps:$4 sm:$0xff]  }
 0x99b   : > { %v3858_v3 = vround.rtne.f32 %v2301_v33  ;;  %v4231_v33 = vld [vmem:[#allocation18 + $0x48] ss:$16 sps:$4 sm:$0xff]  }
 0x99d   : > { %v2303_v34 = vmax.f32 %v3858_v3, -128.0  ;;  %v4239_v3 = vld [vmem:[#allocation18 + $0x6c] ss:$16 sps:$4 sm:$0xff]  }
 0x99f   : > { %v2304_v35 = vmin.f32 %v2303_v34, 127.0  ;;  %v4237_v34 = vld [vmem:[#allocation18 + $0x68] ss:$16 sps:$4 sm:$0xff]  }
 0x9a1   : > { %v2305_v37 = vpack.c.bf16 %v2304_v35, %v2304_v35  ;;  %v4245_v35 = vld [vmem:[#allocation18 + $0x8c] ss:$16 sps:$4 sm:$0xff]  }
 0x9a3   : > { %3734 = vmatmul.mubr.bf16.vlgmr.msra.gmra.mrb[4].mxu0 %v2305_v37  ;;  %v4243_v37 = vld [vmem:[#allocation18 + $0x88] ss:$16 sps:$4 sm:$0xff]  }
 0x9a4   : > { %2720 = vmatpush1.bf16.msra.mxu0 %v4216_v6  ;;  %v2804_v6 = vshrl.u32 %v2803_v5, 7 }
 0x9a5   : > { %2721 = vmatprep.subr.bf16.mxu0 %v4224_v9 }
 0x9a6   : > { %v2805_v7 = vsub.s32 0, %v2804_v6  ;;  %v2809_v9 = vsub.s32 1, %v2804_v6 }
 0x9a8   : > { %2722 = vmatpush1.bf16.msra.mxu0 %v4222_v60  ;;  %v2827_v60 = vld [vmem:[#allocation26] sm:$0xf] }
 0x9a9   : > { %2723 = vmatprep.subr.bf16.mxu0 %v4230_v11  ;;  %v2806_v11 = vrot.slane %v2801_v8, %v2805_v7 }
 0x9ac   : > { %2724 = vmatpush1.bf16.msra.mxu0 %v4228_v12  ;;  %v2810_v12 = vrot.slane %v2801_v8, %v2809_v9 }
 0x9ad   : > { %2725 = vmatprep.subr.bf16.mxu0 %v4236_v13  ;;  %v2832_v13 = vrot.slane %v2827_v60, %v2805_v7 }
 0x9b0   : > { %2726 = vmatpush1.bf16.msra.mxu0 %v4234_v16 }
 0x9b1   : > { %2727 = vmatprep.subr.bf16.mxu0 %v4242_v17 }
 0x9b4   : > { %2728 = vmatpush1.bf16.msra.mxu0 %v4240_v58  ;;  %v2836_v58 = vrot.slane %v2827_v60, %v2809_v9 }
 0x9b5   : > { %2729 = vmatprep.subr.bf16.mxu0 %v4248_v18 }
 0x9b8   : > { %2730 = vmatpush1.bf16.msra.mxu0 %v4246_v19 }
 0x9b9   : > { %2731 = vmatprep.subr.bf16.mxu0 %v4254_v27 }
 0x9bc   : > { %2732 = vmatpush1.bf16.msra.mxu0 %v4252_v22 }
 0x9bd   : > { %2733 = vmatprep.subr.bf16.mxu0 %v4260_v40 }
 0x9c0   : > { %2734 = vmatpush1.bf16.msra.mxu0 %v4258_v44 }
 0xa76   : > { %v2404_v46 = vpop.f32.mrb[4].mxu0 }
 0xa77   : > { %v2412_v25 = vmul.f32 %v2411_v45, %v2404_v46  ;;  %v3735_v48 = vpop.f32.mrb[5].mxu0  ;;  %v4261_v45 = vld [vmem:[#allocation18 + $0xe8] ss:$16 sps:$4 sm:$0xff]   ;;  %v5029_v46 = vmov 0  }
 0xa78   : > { %v2407_v50 = vpop.f32.mrb[6].mxu0  ;;  %2751 = vmatprep.mubr.bf16.mxu0 %v5029_v46 }
 0xa79   : > { %v2420_v51 = vadd.f32 %v3447_v47, %v2412_v25  ;;  %v3736_v52 = vpop.f32.mrb[7].mxu0 }
 0xa7a   : > { %v4264_v52 = vld [vmem:[#allocation20 + $0x40] sm:$0xff]  }
 0xa7b   : > { %v6121_v36 = vadd.f32 %v2421_v49, %v2420_v51  ;;  %3584 = vmatprep.subr.bf16.mxu0 %v4264_v52 }
 0xa7d   : > { %v2424_v53 = vmul.f32 %v6121_v36, %v6121_v36 }
 0xa7f   : > { %2425 = vadd.xlane.f32.xlu1 %v2424_v53  ;;  %v4265_v53 = vld [vmem:[#allocation20] sm:$0xff]  }
 0xb0c   : > { %v2426_v10 = vpop.xlane.xlu1 %2425 }
 0xb0d   : > { %v2428_v20 = vmul.f32 0.0078125, %v2426_v10 }
 0xb0f   : > { %v2429_v23 = vadd.f32 1e-06, %v2428_v20 }
 0xb11   : > { %4296 = vrsqrt.f32 %v2429_v23 }
 0xb1b   : > { %v4297_v24 = vpop.eup %4296 }
 0xb1c   : > { %v2431_v29 = vmul.f32 %v4297_v24, %v6121_v36 }
 0xb1e   : > { %v2436_v14 = vmul.f32 %v3448_v26, %v2431_v29 }
 0xb20   : > { %3770 = vmatmul.mubr.f32.vlgmr.msra.gmra.mrb[12].mxu1 %v2436_v14 }
 0xb21   : > { %2761 = vmatpush1.bf16.msra.mxu1 %v4219_v30  ;;  %2792 = vmatprep.mubr.bf16.mxu1 %v5029_v46 }
 0xb22   : > { %2762 = vmatprep.subr.bf16.mxu1 %v4227_v31 }
 0xb25   : > { %2763 = vmatpush1.bf16.msra.mxu1 %v4225_v15 }
 0xb26   : > { %2764 = vmatprep.subr.bf16.mxu1 %v4233_v32 }
 0xb29   : > { %2765 = vmatpush1.bf16.msra.mxu1 %v4231_v33 }
 0xb2a   : > { %2766 = vmatprep.subr.bf16.mxu1 %v4239_v3 }
 0xb2d   : > { %2767 = vmatpush1.bf16.msra.mxu1 %v4237_v34  ;;  %v2813_v34 = vsub.s32 2, %v2804_v6 }
 0xb2e   : > { %2768 = vmatprep.subr.bf16.mxu1 %v4245_v35 }
 0xb31   : > { %2769 = vmatpush1.bf16.msra.mxu1 %v4243_v37  ;;  %v2817_v37 = vsub.s32 3, %v2804_v6 }
 0xb32   : > { %2770 = vmatprep.subr.bf16.mxu1 %v4251_v38  ;;  %v2814_v38 = vrot.slane %v2801_v8, %v2813_v34 }
 0xb35   : > { %2771 = vmatpush1.bf16.msra.mxu1 %v4249_v21  ;;  %v2818_v21 = vrot.slane %v2801_v8, %v2817_v37 }
 0xb36   : > { %2772 = vmatprep.subr.bf16.mxu1 %v4257_v28  ;;  %v2840_v28 = vrot.slane %v2827_v60, %v2813_v34 }
 0xb39   : > { %2773 = vmatpush1.bf16.msra.mxu1 %v4255_v39  ;;  %v2844_v39 = vrot.slane %v2827_v60, %v2817_v37 }
 0xb3a   : > { %2774 = vmatprep.subr.bf16.mxu1 %v4263_v43 }
 0xb3d   : > { %2775 = vmatpush1.bf16.msra.mxu1 %v4261_v45 }
 0xbf3   : > { %v2519_v47 = vpop.f32.mrb[12].mxu1 }
 0xbf4   : > { %v3859_v25 = vround.rtne.f32 %v2519_v47  ;;  %v3771_v48 = vpop.f32.mrb[13].mxu1 }
 0xbf6   : > { %v2524_v49 = vmax.f32 %v3859_v25, -128.0 }
 0xbf8   : > { %v2525_v50 = vmin.f32 %v2524_v49, 127.0 }
 0xbfa   : > { %v2526_v51 = vpack.c.bf16 %v2525_v50, %v2525_v50 }
 0xbfc   : > { %2752 = vmatmul.mubr.bf16.vlgmr.msra.gmra.mrb[8].mxu0 %v2526_v51  ;;  %2793 = vmatmul.mubr.bf16.vlgmr.msra.gmra.mrb[16].mxu1 %v2526_v51 }
 0xbfd   : > { %3585 = vmatpush3.bf16.msra.mxu0 %v4265_v53 }
 0xbfe   : > { %3586 = vmatprep.subr.bf16.mxu0 %v4266_v55 }
 0xc01   : > { %3587 = vmatpush3.bf16.msra.mxu0 %v4267_v56 }
 0xc02   : > { %3588 = vmatprep.subr.bf16.mxu0 %v4268_v41 }
 0xc05   : > { %3589 = vmatpush3.bf16.msra.mxu0 %v4269_v59 }
 0xc06   : > { %3590 = vmatprep.subr.bf16.mxu0 %v4270_v54 }
 0xc09   : > { %3591 = vmatpush3.bf16.msra.mxu0 %v4271_v4  ;;  %v3046_v4 = vstv %s3499_s4 }
 0xc0a   : > { %3592 = vmatprep.subr.bf16.mxu0 %v4272_v42 }
 0xc0d   : > { %3593 = vmatpush3.bf16.msra.mxu0 %v4273_v61 }
 0xc0e   : > { %3594 = vmatprep.subr.bf16.mxu0 %v4274_v62  ;;  %v3500_v62 = vld [vmem:[#allocation29] ss:$0 sm:$0xff] }
 0xc11   : > { %3595 = vmatpush3.bf16.msra.mxu0 %v4275_v63 }
 0xc12   : > { %3596 = vmatprep.subr.bf16.mxu0 %v4276_v0 }
 0xc15   : > { %3597 = vmatpush3.bf16.msra.mxu0 %v4277_v1 }
 0xc16   : > { %3598 = vmatprep.subr.bf16.mxu0 %v4278_v57 }
 0xc19   : > { %3599 = vmatpush3.bf16.msra.mxu0 %v4279_v2 }
 0xccf   : > { %v2753_v16 = vpop.f32.mrb[8].mxu0  ;;  %v2794_v17 = vpop.f32.mrb[16].mxu1 }
 0xcd0   : > { %v2823_v18 = vmul.f32 %v2806_v11, %v2753_v16  ;;  %v2755_v19 = vpop.f32.mrb[9].mxu0  ;;  %v2796_v10 = vpop.f32.mrb[17].mxu1  ;;  %v2825_v27 = vmul.f32 %v2814_v38, %v2794_v17 }
 0xcd1   : > { %v2824_v20 = vmul.f32 %v2810_v12, %v2755_v19  ;;  %v2757_v23 = vpop.f32.mrb[10].mxu0  ;;  %v2798_v24 = vpop.f32.mrb[18].mxu1  ;;  %v2826_v22 = vmul.f32 %v2818_v21, %v2796_v10 }
 0xcd2   : > { %v2849_v26 = vadd.f32 %v2832_v13, %v2823_v18  ;;  %v2758_v29 = vpop.f32.mrb[11].mxu0  ;;  %v2799_v30 = vpop.f32.mrb[19].mxu1  ;;  %v2851_v45 = vadd.f32 %v2840_v28, %v2825_v27 }
 0xcd3   : > { %v2850_v14 = vadd.f32 %v2836_v58, %v2824_v20  ;;  %v2852_v47 = vadd.f32 %v2844_v39, %v2826_v22 }
 0xcd4   : > { %v3481_v31 = vmul.f32 -1.442695, %v2849_v26 }
 0xcd5   : > { %v3482_v15 = vmul.f32 -1.442695, %v2850_v14 }
 0xcd6   : > { %4298 = vpow2.f32 %v3481_v31 }
 0xcd7   : > { %4300 = vpow2.f32 %v3482_v15 }
 0xce0   : > { %v4299_v32 = vpop.eup %4298 }
 0xce1   : > { %v4301_v33 = vpop.eup %4300  ;;  %v2859_v3 = vadd.f32 1.0, %v4299_v32 }
 0xce2   : > { %v2860_v35 = vadd.f32 1.0, %v4301_v33 }
 0xce3   : > { %4302 = vrcp.f32 %v2859_v3 }
 0xce4   : > { %4304 = vrcp.f32 %v2860_v35 }
 0xced   : > { %v4303_v40 = vpop.eup %4302 }
 0xcee   : > { %v4305_v43 = vpop.eup %4304  ;;  %v2865_v44 = vmul.f32 %v4303_v40, %v2849_v26 }
 0xcef   : > { %v2866_v46 = vmul.f32 %v4305_v43, %v2850_v14 }
 0xcf0   : > { %v2867_v25 = vmul.f32 %v2865_v44, %v2851_v45 }
 0xcf1   : > { %v2868_v48 = vmul.f32 %v2866_v46, %v2852_v47 }
 0xcf2   : > { %v3860_v49 = vround.rtne.f32 %v2867_v25 }
 0xcf3   : > { %v3861_v50 = vround.rtne.f32 %v2868_v48 }
 0xcf4   : > { %v2871_v51 = vmax.f32 %v3860_v49, -128.0 }
 0xcf5   : > { %v2872_v52 = vmax.f32 %v3861_v50, -128.0 }
 0xcf6   : > { %v2873_v53 = vmin.f32 %v2871_v51, 127.0 }
 0xcf7   : > { %v2874_v55 = vmin.f32 %v2872_v52, 127.0 }
 0xcf8   : > { %v2875_v41 = vpack.c.bf16 %v2873_v53, %v2873_v53 }
 0xcf9   : > { %v2876_v56 = vpack.c.bf16 %v2874_v55, %v2874_v55 }
 0xcfb   : > { %3037 = vmatprep.mubr.bf16.mxu0 %v2876_v56 }
 0xcfc   : > { %3038 = vmatmul.mubr.bf16.vlgmr.msra.gmra.mrb[12].mxu0 %v2875_v41 }
 0xdcf   : > { %v3600_v59 = vpop.f32.mrb[12].mxu0 }
 0xdd0   : > { %v3601_v54 = vpop.f32.mrb[13].mxu0 }
 0xdd1   : > { %v3602_v42 = vadd.f32 %v3601_v54, %v3600_v59  ;;  %v3603_v61 = vpop.f32.mrb[14].mxu0 }
 0xdd2   : > { %v3604_v63 = vpop.f32.mrb[15].mxu0 }
 0xdd3   : > { %v3047_v0 = vmul.f32 %v3602_v42, %v3046_v4 }
 0xdd5   : > { %v3055_v1 = vadd.f32 %v3500_v62, %v3047_v0 }
 0xdd7   : > { %v3056_v57 = vadd.f32 %v3055_v1, %v6121_v36 }
 0xdd9   : > { %3057 = vst [vmem:[%s883_s28] sm:$0xff] %v3056_v57 }
 0xdda   : > { %4814 = shalt.err (!%p4811_p9)
}
 0xddb   : > { %s4815_s21 = scalar_lea.hbm %s6138_s22, 128  ;;  %s4819_s3 = scalar_lea.hbm %s6391_s7, 512 }
 0xddc   : > { %p4816_p6 = scmp.ne.s32.totalorder %s6138_s22, %s4815_s21  ;;  %p4820_p11 = scmp.lt.u32.totalorder %s6138_s22, %s6391_s7 }
 0xddd   : > { %p4821_p12 = scmp.lt.u32.totalorder %s4819_s3, %s4815_s21  ;;  %p4823_p10 = scmp.lt.u32.totalorder %s4815_s21, %s6138_s22 }
 0xdde   : > { %p4817_p13 = pnand %p4816_p6, %p6392_p4 }
 0xddf   : > { %p4822_p3 = por %p4821_p12, %p4820_p11 }
 0xde0   : > { %p4818_p8 = pneg %p4817_p13 }
 0xde1   : > { %p4824_p1 = por %p4823_p10, %p4822_p3 }
 0xde3   : > { %p4825_p5 = pnand %p4824_p1, %p4818_p8 }
 0xde5   : > { %4828 = shalt.err (!%p4825_p5)
}
 0xde6   : > { %3928 = dma.vmem_to_hbm [thread:$0]  (%p6392_p4), %s6140_s26, 128, %s6138_s22, %s3059_s1  }
 0xde7 PF: > { %s6393_s4 = sld [smem:[#allocation59_spill]]  ;;  %p4021_p7 = scmp.ge.s32.totalorder %s4987_s25, 2 }
 0xde8   : > { %s3086_s12 = sand.u32 1, %s4947_s30  }
 0xde9   : > { %s3087_s17 = scalar_lea.sflag [#allocation7], %s3086_s12 }
 0xded   : > { %p6394_p0 = scmp.ne.s32.totalorder %s6393_s4, 0 }
 0xdef   : > { %p3987_p2 = pnand %p4021_p7, %p6394_p0 }
 0xdf1   : > { %4930 = dma.done.wait (!%p3987_p2), %s3087_s17, 128  }
 0xdf2   : > { %4932 = vsyncadd (!%p3987_p2), %s3087_s17, 4294967168  ;;  %s45_s25 = sadd.s32 1, %s4987_s25   ;;  %s6396_s27 = sld [smem:[#allocation48_spill]] }
 0xdf3   : > { %p6172_p9 = scmp.ge.s32.totalorder %s45_s25, 6   ;;  %s6397_s28 = sld [smem:[#allocation49_spill]] }
 0xdf4   : > { %s6398_s5 = sld [smem:[#allocation50_spill]]  ;;  %s6399_s19 = sld [smem:[#allocation60_spill]] }
 0xdf5   : > { %s6400_s1 = sld [smem:[#allocation52_spill]]  ;;  %s6401_s20 = sld [smem:[#allocation53_spill]] }
 0xdf6   : > { %s6402_s26 = smov %s5634_s29  ;;  %s6403_s13 = sld [smem:[#allocation57_spill]] }
 0xdf7   : > { %s6404_s6 = sld [smem:[#allocation58_spill]]  ;;  %s6405_s29 = smov %s5696_s18 }
 0xdf8   : > { %s6406_s30 = smov %s4951_s0  ;;  %s6408_s21 = smov %s6402_s26 }
 0xdf9   : > { %s6409_s22 = smov %s4979_s23  ;;  %s6410_s2 = smov %s4983_s24 }
 0xdfa   : > { %s6407_s0 = smov %s6398_s5  ;;  %44 = sbr.rel (!%p6172_p9) target bundleno = 40 (0x28), region = 236 }
 0xdfc   : > { %s6411_s23 = smov %s6403_s13 }
 0xdfd   : > { %s6412_s24 = smov %s6404_s6 }
 0xe01   :  { %3092 = vsyncpa [#allocation6], 1 }
 0xe02   :  { %3094 = vsyncpa [#allocation6 + $0x1], 1 }
 0xe03   :  { %3095 = vsyncpa [#allocation10], 1 }
 0xe04   :  { %3097 = vsyncpa [#allocation10 + $0x1], 1 }
 0xe05   :  { %3098 = vsyncpa [#allocation13], 1 }
 0xe06   :  { %3099 = vsyncpa [#allocation16], 1 }
 0xe07   :  { %3100 = vsyncpa [#allocation19], 1 }
 0xe08   :  { %3101 = vsyncpa [#allocation22], 1 }
 0xe09   :  { %3102 = vsyncpa [#allocation25], 1 }
 0xe0a   :  { %3103 = vsyncpa [#allocation28], 1 }
 0xe0b   :  { %3104 = vsyncpa [#allocation31], 1 }
 0xe0c   :  { %3105 = vsyncpa [#allocation7], 1 }
 0xe0d   :  { %3107 = vsyncpa [#allocation7 + $0x1], 1 }
 0xe0e   :  { %3108 = vsyncpa [#allocation8], 1 }
 0xe0f   :  { %3110 = vsyncpa [#allocation8 + $0x1], 1 }

</bundles_post_ra>
